<compile_context>
chip_gen: v5e
topology: v5e:2x2
jax: 0.10.0
libtpu: 0.0.40
codegen_flags: <defaults>
</compile_context>

<pallas_src>
import functools

import jax
import jax.numpy as jnp
from jax import lax
from jax.experimental import pallas as pl
from jax.experimental.pallas import tpu as pltpu


LANE = 128


def _round_up(x, m):
    return (x + m - 1) // m * m


# ----------------------------- Pallas kernels ------------------------------ #

def _matmul_bias_kernel(x_ref, w_ref, b_ref, o_ref):
    """One (tm, K) @ (K, tn) + (1, tn) -> (tm, tn) tile. K kept untiled."""
    o_ref[...] = (
        jnp.dot(x_ref[...], w_ref[...], preferred_element_type=jnp.float32)
        + b_ref[...]
    ).astype(o_ref.dtype)


def _lstm_recurrence_kernel(gin_ref, whh_ref, out_ref, h_sc, c_sc, *, hp, tc):
    """Recurrent part of one LSTM layer; one time-chunk per grid step.

    gin_ref: (tc, B, 4*hp) precomputed x@W_ih + (b_ih+b_hh), time-major
    whh_ref: (hp, 4*hp)    hidden->gates weight (pre-transposed, lane-padded)
    out_ref: (tc, B, hp)   hidden states for this chunk
    h_sc, c_sc: (B, hp)    VMEM scratch carried across chunks.
    Gate order (PyTorch): i, f, g, o; each gate sits in a lane-aligned hp chunk.
    """
    chunk = pl.program_id(0)

    @pl.when(chunk == 0)
    def _():
        h_sc[...] = jnp.zeros_like(h_sc)
        c_sc[...] = jnp.zeros_like(c_sc)

    def step(t, carry):
        h_prev, c_prev = carry
        # Only the hidden->gates matmul stays inside the serial loop.
        gates = gin_ref[t] + jnp.dot(
            h_prev, whh_ref[...], preferred_element_type=jnp.float32)
        i_g = jax.nn.sigmoid(gates[:, 0 * hp:1 * hp])
        f_g = jax.nn.sigmoid(gates[:, 1 * hp:2 * hp])
        g_g = jnp.tanh(gates[:, 2 * hp:3 * hp])
        o_g = jax.nn.sigmoid(gates[:, 3 * hp:4 * hp])
        c_new = f_g * c_prev + i_g * g_g
        h_new = o_g * jnp.tanh(c_new)
        out_ref[t] = h_new.astype(out_ref.dtype)
        return h_new, c_new

    h, c = lax.fori_loop(0, tc, step, (h_sc[...], c_sc[...]), unroll=True)
    h_sc[...] = h
    c_sc[...] = c


# ------------------------------ wrappers ----------------------------------- #

def matmul_bias(x, w, b, *, tm_max=256, tn_max=256):
    """x: (M, K) f32, w: (K, N) f32 (N multiple of 128), b: (1, N). -> (M, N)."""
    M, K = x.shape
    Kw, N = w.shape
    assert K == Kw and N % LANE == 0, (x.shape, w.shape)
    tn = tn_max if N % tn_max == 0 else N
    Mp = _round_up(M, 8)
    tm = min(tm_max, Mp)
    Mp = _round_up(Mp, tm)
    x_p = x if Mp == M else jnp.pad(x, ((0, Mp - M), (0, 0)))

    out = pl.pallas_call(
        _matmul_bias_kernel,
        out_shape=jax.ShapeDtypeStruct((Mp, N), jnp.float32),
        grid_spec=pltpu.PrefetchScalarGridSpec(
            num_scalar_prefetch=0,
            grid=(Mp // tm, N // tn),
            in_specs=[
                pl.BlockSpec((tm, K), lambda i, j: (i, 0)),
                pl.BlockSpec((K, tn), lambda i, j: (0, j)),
                pl.BlockSpec((1, tn), lambda i, j: (0, j)),
            ],
            out_specs=pl.BlockSpec((tm, tn), lambda i, j: (i, j)),
        ),
        compiler_params=pltpu.CompilerParams(
            dimension_semantics=("parallel", "parallel"),
            vmem_limit_bytes=32 * 1024 * 1024),
    )(x_p, w, b)
    return out[:M] if Mp != M else out


def lstm_recurrence(gin_tbg, w_hh_p, hp, *, max_chunk=32):
    """gin_tbg: (T, B, 4*hp) f32 precomputed gate inputs. Returns (T, B, hp)."""
    T, B, G = gin_tbg.shape
    assert G == 4 * hp
    tc = min(T, max_chunk)
    while T % tc:
        tc -= 1
    kernel = functools.partial(_lstm_recurrence_kernel, hp=hp, tc=tc)
    return pl.pallas_call(
        kernel,
        out_shape=jax.ShapeDtypeStruct((T, B, hp), jnp.float32),
        grid_spec=pltpu.PrefetchScalarGridSpec(
            num_scalar_prefetch=0,
            grid=(T // tc,),
            in_specs=[
                pl.BlockSpec((tc, B, 4 * hp), lambda c: (c, 0, 0)),
                pl.BlockSpec((hp, 4 * hp), lambda c: (0, 0)),
            ],
            out_specs=pl.BlockSpec((tc, B, hp), lambda c: (c, 0, 0)),
            scratch_shapes=[
                pltpu.VMEM((B, hp), jnp.float32),
                pltpu.VMEM((B, hp), jnp.float32),
            ],
        ),
        compiler_params=pltpu.CompilerParams(
            dimension_semantics=("arbitrary",),
            vmem_limit_bytes=32 * 1024 * 1024),
    )(gin_tbg, w_hh_p)


@functools.partial(jax.jit, static_argnames=("vocab_size",))
def lstm_protein_generator_forward(x_ids, padded_params, vocab_size):
    """Pallas implementation of LSTMProteinGenerator.forward.

    x_ids: (B, T) int32 token ids. Returns logits (B, T, vocab_size) f32.
    """
    embeds = jnp.take(padded_params["embedding"], x_ids, axis=0)  # (B, T, E)
    x = jnp.transpose(embeds, (1, 0, 2))                          # (T, B, E) small
    T, B, _ = x.shape
    hp = padded_params["lstm"][0]["w_hh"].shape[0]

    for layer in padded_params["lstm"]:
        d_in = x.shape[-1]
        # Hoisted, batched input projection (+ fused bias) over all T timesteps.
        gin = matmul_bias(x.reshape(T * B, d_in), layer["w_ih"], layer["b"])
        x = lstm_recurrence(gin.reshape(T, B, 4 * hp), layer["w_hh"], hp)

    # FC in batch-major order: logits come out directly as (B, T, Vp);
    # only the (much smaller) hidden tensor gets transposed.
    vp = padded_params["fc_w"].shape[1]
    h_bt = jnp.transpose(x, (1, 0, 2)).reshape(B * T, hp)
    logits = matmul_bias(h_bt, padded_params["fc_w"], padded_params["fc_b"])
    return logits.reshape(B, T, vp)[:, :, :vocab_size]


# --------------------------- reference (pure JAX) --------------------------- #

def _reference_forward(x_ids, params, hidden_dim):
    embeds = jnp.take(params["embedding"], x_ids, axis=0)   # (B, T, E)
    x = jnp.transpose(embeds, (1, 0, 2))                    # (T, B, E)
    H = hidden_dim
    for layer in params["lstm"]:
        w_ih, w_hh, b = layer["w_ih"], layer["w_hh"], layer["b"]
        B = x.shape[1]

        def step(carry, x_t):
            h, c = carry
            gates = x_t @ w_ih + h @ w_hh + b[0]
            i = jax.nn.sigmoid(gates[:, 0 * H:1 * H])
            f = jax.nn.sigmoid(gates[:, 1 * H:2 * H])
            g = jnp.tanh(gates[:, 2 * H:3 * H])
            o = jax.nn.sigmoid(gates[:, 3 * H:4 * H])
            c = f * c + i * g
            h = o * jnp.tanh(c)
            return (h, c), h

        init = (jnp.zeros((B, H), jnp.float32), jnp.zeros((B, H), jnp.float32))
        _, x = lax.scan(step, init, x)
    logits = x @ params["fc_w"] + params["fc_b"][0]
    return jnp.transpose(logits, (1, 0, 2))


# ------------------------------ param init ---------------------------------- #

def init_params(key, vocab_size, embedding_dim, hidden_dim, num_layers):
    keys = jax.random.split(key, 3 + 4 * num_layers)
    params = {}
    params["embedding"] = (
        jax.random.normal(keys[0], (vocab_size, embedding_dim), jnp.float32) * 0.1
    )
    lstm = []
    kidx = 1
    in_dim = embedding_dim
    for _ in range(num_layers):
        w_ih = jax.random.normal(
            keys[kidx], (in_dim, 4 * hidden_dim), jnp.float32) * 0.1
        w_hh = jax.random.normal(
            keys[kidx + 1], (hidden_dim, 4 * hidden_dim), jnp.float32) * 0.1
        b_ih = jax.random.normal(
            keys[kidx + 2], (4 * hidden_dim,), jnp.float32) * 0.1
        b_hh = jax.random.normal(
            keys[kidx + 3], (4 * hidden_dim,), jnp.float32) * 0.1
        lstm.append({
            "w_ih": w_ih,
            "w_hh": w_hh,
            "b": (b_ih + b_hh).reshape(1, 4 * hidden_dim),
        })
        kidx += 4
        in_dim = hidden_dim
    params["lstm"] = lstm
    params["fc_w"] = jax.random.normal(
        keys[kidx], (hidden_dim, vocab_size), jnp.float32) * 0.1
    params["fc_b"] = jax.random.normal(
        keys[kidx + 1], (vocab_size,), jnp.float32).reshape(1, vocab_size) * 0.1
    return params


def pad_params(params, hidden_dim, vocab_size):
    """Lane-pad H->128 and V->128. Exact: padded h/c lanes stay identically 0."""
    H = hidden_dim
    Hp = _round_up(H, LANE)
    Vp = _round_up(vocab_size, LANE)

    def pad_gate_cols(w):
        # (D, 4H) -> (D, 4Hp); gate k's real columns go to [k*Hp, k*Hp+H).
        d = w.shape[0]
        out = jnp.zeros((d, 4 * Hp), jnp.float32)
        for k in range(4):
            out = out.at[:, k * Hp:k * Hp + H].set(w[:, k * H:(k + 1) * H])
        return out

    padded = {"embedding": params["embedding"], "lstm": []}
    for li, layer in enumerate(params["lstm"]):
        w_ih = pad_gate_cols(layer["w_ih"])
        if li > 0:                                   # input dim is H for layers >= 1
            w_ih = jnp.pad(w_ih, ((0, Hp - H), (0, 0)))
        w_hh = jnp.pad(pad_gate_cols(layer["w_hh"]), ((0, Hp - H), (0, 0)))
        b = pad_gate_cols(layer["b"])
        padded["lstm"].append({"w_ih": w_ih, "w_hh": w_hh, "b": b})
    padded["fc_w"] = jnp.pad(params["fc_w"],
                             ((0, Hp - H), (0, Vp - vocab_size)))
    padded["fc_b"] = jnp.pad(params["fc_b"], ((0, 0), (0, Vp - vocab_size)))
    return padded


# --------------------------------- main ------------------------------------- #

if __name__ == "__main__":
    vocab_size = 24      # ~20 amino acids + specials
    embedding_dim = 16
    hidden_dim = 32
    num_layers = 2
    batch = 2
    seq_len = 8

    key = jax.random.PRNGKey(0)
    k_in, k_param = jax.random.split(key)

    x_ids = jax.random.randint(k_in, (batch, seq_len), 0, vocab_size, jnp.int32)
    params = init_params(k_param, vocab_size, embedding_dim, hidden_dim,
                         num_layers)
    padded = pad_params(params, hidden_dim, vocab_size)

    logits = lstm_protein_generator_forward(x_ids, padded, vocab_size)
    logits = jax.block_until_ready(logits)

    ref = _reference_forward(x_ids, params, hidden_dim)
    assert logits.shape == (batch, seq_len, vocab_size), logits.shape
    max_err = float(jnp.max(jnp.abs(logits - ref)))
    assert jnp.allclose(logits, ref, atol=1e-4, rtol=1e-4), max_err

    print("KERNEL_OK")
</pallas_src>

<mosaic_0001>
module attributes {stable_mosaic.version = 11 : i64} {
  func.func @_matmul_bias_kernel(%arg0: i32, %arg1: i32, %arg2: memref<16x16xf32, #tpu.memory_space<vmem>>, %arg3: memref<16x256xf32, #tpu.memory_space<vmem>>, %arg4: memref<1x256xf32, #tpu.memory_space<vmem>>, %arg5: memref<16x256xf32, #tpu.memory_space<vmem>>) attributes {dimension_semantics = [#tpu.dimension_semantics<parallel>, #tpu.dimension_semantics<parallel>], iteration_bounds = array<i64: 1, 2>, scalar_prefetch = 0 : i64, scratch_operands = 0 : i64, tpu.core_type = #tpu.core_type<tc>, window_params = [{transform_indices = @transform_0, window_bounds = array<i64: 16, 16>}, {transform_indices = @transform_1, window_bounds = array<i64: 16, 256>}, {transform_indices = @transform_2, window_bounds = array<i64: 1, 256>}, {transform_indices = @transform_3, window_bounds = array<i64: 16, 256>}]} {
    %c0 = arith.constant 0 : index
    %c0_0 = arith.constant 0 : index
    %0 = vector.load %arg2[%c0, %c0_0] : memref<16x16xf32, #tpu.memory_space<vmem>>, vector<16x16xf32>
    %c0_1 = arith.constant 0 : index
    %c0_2 = arith.constant 0 : index
    %1 = vector.load %arg3[%c0_1, %c0_2] : memref<16x256xf32, #tpu.memory_space<vmem>>, vector<16x256xf32>
    %cst = arith.constant dense<0.000000e+00> : vector<16x256xf32>
    %2 = tpu.matmul %0, %1, %cst {dimension_numbers = #tpu.dot_dimension_numbers<[1], [0], [0], [1], [0, 0, 1, 1], [], []>} : vector<16x16xf32>, vector<16x256xf32>, vector<16x256xf32> -> vector<16x256xf32>
    %c0_3 = arith.constant 0 : index
    %c0_4 = arith.constant 0 : index
    %3 = vector.load %arg4[%c0_3, %c0_4] : memref<1x256xf32, #tpu.memory_space<vmem>>, vector<1x256xf32>
    %4 = vector.broadcast %3 : vector<1x256xf32> to vector<16x256xf32>
    %5 = arith.addf %2, %4 : vector<16x256xf32>
    %c0_5 = arith.constant 0 : index
    %c0_6 = arith.constant 0 : index
    %6 = vector.load %arg5[%c0_5, %c0_6] : memref<16x256xf32, #tpu.memory_space<vmem>>, vector<16x256xf32>
    tpu.vector_store %arg5[%c0_5, %c0_6], %5 {strides = array<i32>} : memref<16x256xf32, #tpu.memory_space<vmem>>, vector<16x256xf32>,
    return
  }
  func.func @transform_0(%arg0: i32, %arg1: i32) -> (i32, i32) {
    %c0_i32 = arith.constant 0 : i32
    %c0_i32_0 = arith.constant 0 : i32
    return %arg0, %c0_i32 : i32, i32
  }
  func.func @transform_1(%arg0: i32, %arg1: i32) -> (i32, i32) {
    %c0_i32 = arith.constant 0 : i32
    %c0_i32_0 = arith.constant 0 : i32
    return %c0_i32, %arg1 : i32, i32
  }
  func.func @transform_2(%arg0: i32, %arg1: i32) -> (i32, i32) {
    %c0_i32 = arith.constant 0 : i32
    %c0_i32_0 = arith.constant 0 : i32
    return %c0_i32, %arg1 : i32, i32
  }
  func.func @transform_3(%arg0: i32, %arg1: i32) -> (i32, i32) {
    %c0_i32 = arith.constant 0 : i32
    return %arg0, %arg1 : i32, i32
  }
}

module attributes {stable_mosaic.version = 11 : i64} {
  func.func @_lstm_recurrence_kernel(%arg0: i32, %arg1: memref<8x2x512xf32, #tpu.memory_space<vmem>>, %arg2: memref<128x512xf32, #tpu.memory_space<vmem>>, %arg3: memref<8x2x128xf32, #tpu.memory_space<vmem>>, %arg4: memref<2x128xf32, #tpu.memory_space<vmem>>, %arg5: memref<2x128xf32, #tpu.memory_space<vmem>>) attributes {dimension_semantics = [#tpu.dimension_semantics<arbitrary>], iteration_bounds = array<i64: 1>, scalar_prefetch = 0 : i64, scratch_operands = 2 : i64, tpu.core_type = #tpu.core_type<tc>, window_params = [{transform_indices = @transform_0, window_bounds = array<i64: 8, 2, 512>}, {pipeline_mode = #tpu.pipeline_mode<synchronous>, transform_indices = @transform_1, window_bounds = array<i64: 128, 512>}, {transform_indices = @transform_2, window_bounds = array<i64: 8, 2, 128>}]} {
    %c0_i32 = arith.constant 0 : i32
    %0 = arith.cmpi eq, %arg0, %c0_i32 : i32
    %1 = arith.extui %0 : i1 to i32
    %c0_i32_0 = arith.constant 0 : i32
    %2 = arith.cmpi ne, %1, %c0_i32_0 : i32
    scf.if %2 {
      %cst_88 = arith.constant 0.000000e+00 : f32
      %287 = vector.broadcast %cst_88 : f32 to vector<2x128xf32>
      %c0_89 = arith.constant 0 : index
      %c0_90 = arith.constant 0 : index
      %288 = vector.load %arg4[%c0_89, %c0_90] : memref<2x128xf32, #tpu.memory_space<vmem>>, vector<2x128xf32>
      tpu.vector_store %arg4[%c0_89, %c0_90], %287 {strides = array<i32>} : memref<2x128xf32, #tpu.memory_space<vmem>>, vector<2x128xf32>,
      %cst_91 = arith.constant 0.000000e+00 : f32
      %289 = vector.broadcast %cst_91 : f32 to vector<2x128xf32>
      %c0_92 = arith.constant 0 : index
      %c0_93 = arith.constant 0 : index
      %290 = vector.load %arg5[%c0_92, %c0_93] : memref<2x128xf32, #tpu.memory_space<vmem>>, vector<2x128xf32>
      tpu.vector_store %arg5[%c0_92, %c0_93], %289 {strides = array<i32>} : memref<2x128xf32, #tpu.memory_space<vmem>>, vector<2x128xf32>,
    } else {
    }
    %c0 = arith.constant 0 : index
    %c0_1 = arith.constant 0 : index
    %3 = vector.load %arg4[%c0, %c0_1] : memref<2x128xf32, #tpu.memory_space<vmem>>, vector<2x128xf32>
    %c0_2 = arith.constant 0 : index
    %c0_3 = arith.constant 0 : index
    %4 = vector.load %arg5[%c0_2, %c0_3] : memref<2x128xf32, #tpu.memory_space<vmem>>, vector<2x128xf32>
    %c0_i32_4 = arith.constant 0 : i32
    %5 = arith.index_cast %c0_i32_4 : i32 to index
    %c0_5 = arith.constant 0 : index
    %c0_6 = arith.constant 0 : index
    %6 = vector.load %arg1[%5, %c0_5, %c0_6] : memref<8x2x512xf32, #tpu.memory_space<vmem>>, vector<1x2x512xf32>
    %7 = vector.shape_cast %6 : vector<1x2x512xf32> to vector<2x512xf32>
    %c0_7 = arith.constant 0 : index
    %c0_8 = arith.constant 0 : index
    %8 = vector.load %arg2[%c0_7, %c0_8] : memref<128x512xf32, #tpu.memory_space<vmem>>, vector<128x512xf32>
    %cst = arith.constant dense<0.000000e+00> : vector<2x512xf32>
    %9 = tpu.matmul %3, %8, %cst {dimension_numbers = #tpu.dot_dimension_numbers<[1], [0], [0], [1], [0, 0, 1, 1], [], []>} : vector<2x128xf32>, vector<128x512xf32>, vector<2x512xf32> -> vector<2x512xf32>
    %10 = arith.addf %7, %9 : vector<2x512xf32>
    %11 = vector.extract_strided_slice %10 {offsets = [0, 0], sizes = [2, 128], strides = [1, 1]} : vector<2x512xf32> to vector<2x128xf32>
    %12 = arith.negf %11 : vector<2x128xf32>
    %13 = math.exp %12 : vector<2x128xf32>
    %cst_9 = arith.constant 1.000000e+00 : f32
    %14 = vector.broadcast %cst_9 : f32 to vector<2x128xf32>
    %15 = arith.addf %14, %13 : vector<2x128xf32>
    %16 = arith.divf %14, %15 : vector<2x128xf32>
    %17 = vector.extract_strided_slice %10 {offsets = [0, 128], sizes = [2, 128], strides = [1, 1]} : vector<2x512xf32> to vector<2x128xf32>
    %18 = arith.negf %17 : vector<2x128xf32>
    %19 = math.exp %18 : vector<2x128xf32>
    %cst_10 = arith.constant 1.000000e+00 : f32
    %20 = vector.broadcast %cst_10 : f32 to vector<2x128xf32>
    %21 = arith.addf %20, %19 : vector<2x128xf32>
    %22 = arith.divf %20, %21 : vector<2x128xf32>
    %23 = vector.extract_strided_slice %10 {offsets = [0, 256], sizes = [2, 128], strides = [1, 1]} : vector<2x512xf32> to vector<2x128xf32>
    %24 = math.tanh %23 : vector<2x128xf32>
    %25 = vector.extract_strided_slice %10 {offsets = [0, 384], sizes = [2, 128], strides = [1, 1]} : vector<2x512xf32> to vector<2x128xf32>
    %26 = arith.negf %25 : vector<2x128xf32>
    %27 = math.exp %26 : vector<2x128xf32>
    %cst_11 = arith.constant 1.000000e+00 : f32
    %28 = vector.broadcast %cst_11 : f32 to vector<2x128xf32>
    %29 = arith.addf %28, %27 : vector<2x128xf32>
    %30 = arith.divf %28, %29 : vector<2x128xf32>
    %31 = arith.mulf %22, %4 : vector<2x128xf32>
    %32 = arith.mulf %16, %24 : vector<2x128xf32>
    %33 = arith.addf %31, %32 : vector<2x128xf32>
    %34 = math.tanh %33 : vector<2x128xf32>
    %35 = arith.mulf %30, %34 : vector<2x128xf32>
    %36 = arith.index_cast %c0_i32_4 : i32 to index
    %c0_12 = arith.constant 0 : index
    %c0_13 = arith.constant 0 : index
    %37 = vector.load %arg3[%36, %c0_12, %c0_13] : memref<8x2x128xf32, #tpu.memory_space<vmem>>, vector<1x2x128xf32>
    %38 = vector.shape_cast %37 : vector<1x2x128xf32> to vector<2x128xf32>
    %39 = vector.shape_cast %35 : vector<2x128xf32> to vector<1x2x128xf32>
    tpu.vector_store %arg3[%36, %c0_12, %c0_13], %39 {strides = array<i32>} : memref<8x2x128xf32, #tpu.memory_space<vmem>>, vector<1x2x128xf32>,
    %c1_i32 = arith.constant 1 : i32
    %40 = arith.index_cast %c1_i32 : i32 to index
    %c0_14 = arith.constant 0 : index
    %c0_15 = arith.constant 0 : index
    %41 = vector.load %arg1[%40, %c0_14, %c0_15] : memref<8x2x512xf32, #tpu.memory_space<vmem>>, vector<1x2x512xf32>
    %42 = vector.shape_cast %41 : vector<1x2x512xf32> to vector<2x512xf32>
    %c0_16 = arith.constant 0 : index
    %c0_17 = arith.constant 0 : index
    %43 = vector.load %arg2[%c0_16, %c0_17] : memref<128x512xf32, #tpu.memory_space<vmem>>, vector<128x512xf32>
    %cst_18 = arith.constant dense<0.000000e+00> : vector<2x512xf32>
    %44 = tpu.matmul %35, %43, %cst_18 {dimension_numbers = #tpu.dot_dimension_numbers<[1], [0], [0], [1], [0, 0, 1, 1], [], []>} : vector<2x128xf32>, vector<128x512xf32>, vector<2x512xf32> -> vector<2x512xf32>
    %45 = arith.addf %42, %44 : vector<2x512xf32>
    %46 = vector.extract_strided_slice %45 {offsets = [0, 0], sizes = [2, 128], strides = [1, 1]} : vector<2x512xf32> to vector<2x128xf32>
    %47 = arith.negf %46 : vector<2x128xf32>
    %48 = math.exp %47 : vector<2x128xf32>
    %cst_19 = arith.constant 1.000000e+00 : f32
    %49 = vector.broadcast %cst_19 : f32 to vector<2x128xf32>
    %50 = arith.addf %49, %48 : vector<2x128xf32>
    %51 = arith.divf %49, %50 : vector<2x128xf32>
    %52 = vector.extract_strided_slice %45 {offsets = [0, 128], sizes = [2, 128], strides = [1, 1]} : vector<2x512xf32> to vector<2x128xf32>
    %53 = arith.negf %52 : vector<2x128xf32>
    %54 = math.exp %53 : vector<2x128xf32>
    %cst_20 = arith.constant 1.000000e+00 : f32
    %55 = vector.broadcast %cst_20 : f32 to vector<2x128xf32>
    %56 = arith.addf %55, %54 : vector<2x128xf32>
    %57 = arith.divf %55, %56 : vector<2x128xf32>
    %58 = vector.extract_strided_slice %45 {offsets = [0, 256], sizes = [2, 128], strides = [1, 1]} : vector<2x512xf32> to vector<2x128xf32>
    %59 = math.tanh %58 : vector<2x128xf32>
    %60 = vector.extract_strided_slice %45 {offsets = [0, 384], sizes = [2, 128], strides = [1, 1]} : vector<2x512xf32> to vector<2x128xf32>
    %61 = arith.negf %60 : vector<2x128xf32>
    %62 = math.exp %61 : vector<2x128xf32>
    %cst_21 = arith.constant 1.000000e+00 : f32
    %63 = vector.broadcast %cst_21 : f32 to vector<2x128xf32>
    %64 = arith.addf %63, %62 : vector<2x128xf32>
    %65 = arith.divf %63, %64 : vector<2x128xf32>
    %66 = arith.mulf %57, %33 : vector<2x128xf32>
    %67 = arith.mulf %51, %59 : vector<2x128xf32>
    %68 = arith.addf %66, %67 : vector<2x128xf32>
    %69 = math.tanh %68 : vector<2x128xf32>
    %70 = arith.mulf %65, %69 : vector<2x128xf32>
    %71 = arith.index_cast %c1_i32 : i32 to index
    %c0_22 = arith.constant 0 : index
    %c0_23 = arith.constant 0 : index
    %72 = vector.load %arg3[%71, %c0_22, %c0_23] : memref<8x2x128xf32, #tpu.memory_space<vmem>>, vector<1x2x128xf32>
    %73 = vector.shape_cast %72 : vector<1x2x128xf32> to vector<2x128xf32>
    %74 = vector.shape_cast %70 : vector<2x128xf32> to vector<1x2x128xf32>
    tpu.vector_store %arg3[%71, %c0_22, %c0_23], %74 {strides = array<i32>} : memref<8x2x128xf32, #tpu.memory_space<vmem>>, vector<1x2x128xf32>,
    %c2_i32 = arith.constant 2 : i32
    %75 = arith.index_cast %c2_i32 : i32 to index
    %c0_24 = arith.constant 0 : index
    %c0_25 = arith.constant 0 : index
    %76 = vector.load %arg1[%75, %c0_24, %c0_25] : memref<8x2x512xf32, #tpu.memory_space<vmem>>, vector<1x2x512xf32>
    %77 = vector.shape_cast %76 : vector<1x2x512xf32> to vector<2x512xf32>
    %c0_26 = arith.constant 0 : index
    %c0_27 = arith.constant 0 : index
    %78 = vector.load %arg2[%c0_26, %c0_27] : memref<128x512xf32, #tpu.memory_space<vmem>>, vector<128x512xf32>
    %cst_28 = arith.constant dense<0.000000e+00> : vector<2x512xf32>
    %79 = tpu.matmul %70, %78, %cst_28 {dimension_numbers = #tpu.dot_dimension_numbers<[1], [0], [0], [1], [0, 0, 1, 1], [], []>} : vector<2x128xf32>, vector<128x512xf32>, vector<2x512xf32> -> vector<2x512xf32>
    %80 = arith.addf %77, %79 : vector<2x512xf32>
    %81 = vector.extract_strided_slice %80 {offsets = [0, 0], sizes = [2, 128], strides = [1, 1]} : vector<2x512xf32> to vector<2x128xf32>
    %82 = arith.negf %81 : vector<2x128xf32>
    %83 = math.exp %82 : vector<2x128xf32>
    %cst_29 = arith.constant 1.000000e+00 : f32
    %84 = vector.broadcast %cst_29 : f32 to vector<2x128xf32>
    %85 = arith.addf %84, %83 : vector<2x128xf32>
    %86 = arith.divf %84, %85 : vector<2x128xf32>
    %87 = vector.extract_strided_slice %80 {offsets = [0, 128], sizes = [2, 128], strides = [1, 1]} : vector<2x512xf32> to vector<2x128xf32>
    %88 = arith.negf %87 : vector<2x128xf32>
    %89 = math.exp %88 : vector<2x128xf32>
    %cst_30 = arith.constant 1.000000e+00 : f32
    %90 = vector.broadcast %cst_30 : f32 to vector<2x128xf32>
    %91 = arith.addf %90, %89 : vector<2x128xf32>
    %92 = arith.divf %90, %91 : vector<2x128xf32>
    %93 = vector.extract_strided_slice %80 {offsets = [0, 256], sizes = [2, 128], strides = [1, 1]} : vector<2x512xf32> to vector<2x128xf32>
    %94 = math.tanh %93 : vector<2x128xf32>
    %95 = vector.extract_strided_slice %80 {offsets = [0, 384], sizes = [2, 128], strides = [1, 1]} : vector<2x512xf32> to vector<2x128xf32>
    %96 = arith.negf %95 : vector<2x128xf32>
    %97 = math.exp %96 : vector<2x128xf32>
    %cst_31 = arith.constant 1.000000e+00 : f32
    %98 = vector.broadcast %cst_31 : f32 to vector<2x128xf32>
    %99 = arith.addf %98, %97 : vector<2x128xf32>
    %100 = arith.divf %98, %99 : vector<2x128xf32>
    %101 = arith.mulf %92, %68 : vector<2x128xf32>
    %102 = arith.mulf %86, %94 : vector<2x128xf32>
    %103 = arith.addf %101, %102 : vector<2x128xf32>
    %104 = math.tanh %103 : vector<2x128xf32>
    %105 = arith.mulf %100, %104 : vector<2x128xf32>
    %106 = arith.index_cast %c2_i32 : i32 to index
    %c0_32 = arith.constant 0 : index
    %c0_33 = arith.constant 0 : index
    %107 = vector.load %arg3[%106, %c0_32, %c0_33] : memref<8x2x128xf32, #tpu.memory_space<vmem>>, vector<1x2x128xf32>
    %108 = vector.shape_cast %107 : vector<1x2x128xf32> to vector<2x128xf32>
    %109 = vector.shape_cast %105 : vector<2x128xf32> to vector<1x2x128xf32>
    tpu.vector_store %arg3[%106, %c0_32, %c0_33], %109 {strides = array<i32>} : memref<8x2x128xf32, #tpu.memory_space<vmem>>, vector<1x2x128xf32>,
    %c3_i32 = arith.constant 3 : i32
    %110 = arith.index_cast %c3_i32 : i32 to index
    %c0_34 = arith.constant 0 : index
    %c0_35 = arith.constant 0 : index
    %111 = vector.load %arg1[%110, %c0_34, %c0_35] : memref<8x2x512xf32, #tpu.memory_space<vmem>>, vector<1x2x512xf32>
    %112 = vector.shape_cast %111 : vector<1x2x512xf32> to vector<2x512xf32>
    %c0_36 = arith.constant 0 : index
    %c0_37 = arith.constant 0 : index
    %113 = vector.load %arg2[%c0_36, %c0_37] : memref<128x512xf32, #tpu.memory_space<vmem>>, vector<128x512xf32>
    %cst_38 = arith.constant dense<0.000000e+00> : vector<2x512xf32>
    %114 = tpu.matmul %105, %113, %cst_38 {dimension_numbers = #tpu.dot_dimension_numbers<[1], [0], [0], [1], [0, 0, 1, 1], [], []>} : vector<2x128xf32>, vector<128x512xf32>, vector<2x512xf32> -> vector<2x512xf32>
    %115 = arith.addf %112, %114 : vector<2x512xf32>
    %116 = vector.extract_strided_slice %115 {offsets = [0, 0], sizes = [2, 128], strides = [1, 1]} : vector<2x512xf32> to vector<2x128xf32>
    %117 = arith.negf %116 : vector<2x128xf32>
    %118 = math.exp %117 : vector<2x128xf32>
    %cst_39 = arith.constant 1.000000e+00 : f32
    %119 = vector.broadcast %cst_39 : f32 to vector<2x128xf32>
    %120 = arith.addf %119, %118 : vector<2x128xf32>
    %121 = arith.divf %119, %120 : vector<2x128xf32>
    %122 = vector.extract_strided_slice %115 {offsets = [0, 128], sizes = [2, 128], strides = [1, 1]} : vector<2x512xf32> to vector<2x128xf32>
    %123 = arith.negf %122 : vector<2x128xf32>
    %124 = math.exp %123 : vector<2x128xf32>
    %cst_40 = arith.constant 1.000000e+00 : f32
    %125 = vector.broadcast %cst_40 : f32 to vector<2x128xf32>
    %126 = arith.addf %125, %124 : vector<2x128xf32>
    %127 = arith.divf %125, %126 : vector<2x128xf32>
    %128 = vector.extract_strided_slice %115 {offsets = [0, 256], sizes = [2, 128], strides = [1, 1]} : vector<2x512xf32> to vector<2x128xf32>
    %129 = math.tanh %128 : vector<2x128xf32>
    %130 = vector.extract_strided_slice %115 {offsets = [0, 384], sizes = [2, 128], strides = [1, 1]} : vector<2x512xf32> to vector<2x128xf32>
    %131 = arith.negf %130 : vector<2x128xf32>
    %132 = math.exp %131 : vector<2x128xf32>
    %cst_41 = arith.constant 1.000000e+00 : f32
    %133 = vector.broadcast %cst_41 : f32 to vector<2x128xf32>
    %134 = arith.addf %133, %132 : vector<2x128xf32>
    %135 = arith.divf %133, %134 : vector<2x128xf32>
    %136 = arith.mulf %127, %103 : vector<2x128xf32>
    %137 = arith.mulf %121, %129 : vector<2x128xf32>
    %138 = arith.addf %136, %137 : vector<2x128xf32>
    %139 = math.tanh %138 : vector<2x128xf32>
    %140 = arith.mulf %135, %139 : vector<2x128xf32>
    %141 = arith.index_cast %c3_i32 : i32 to index
    %c0_42 = arith.constant 0 : index
    %c0_43 = arith.constant 0 : index
    %142 = vector.load %arg3[%141, %c0_42, %c0_43] : memref<8x2x128xf32, #tpu.memory_space<vmem>>, vector<1x2x128xf32>
    %143 = vector.shape_cast %142 : vector<1x2x128xf32> to vector<2x128xf32>
    %144 = vector.shape_cast %140 : vector<2x128xf32> to vector<1x2x128xf32>
    tpu.vector_store %arg3[%141, %c0_42, %c0_43], %144 {strides = array<i32>} : memref<8x2x128xf32, #tpu.memory_space<vmem>>, vector<1x2x128xf32>,
    %c4_i32 = arith.constant 4 : i32
    %145 = arith.index_cast %c4_i32 : i32 to index
    %c0_44 = arith.constant 0 : index
    %c0_45 = arith.constant 0 : index
    %146 = vector.load %arg1[%145, %c0_44, %c0_45] : memref<8x2x512xf32, #tpu.memory_space<vmem>>, vector<1x2x512xf32>
    %147 = vector.shape_cast %146 : vector<1x2x512xf32> to vector<2x512xf32>
    %c0_46 = arith.constant 0 : index
    %c0_47 = arith.constant 0 : index
    %148 = vector.load %arg2[%c0_46, %c0_47] : memref<128x512xf32, #tpu.memory_space<vmem>>, vector<128x512xf32>
    %cst_48 = arith.constant dense<0.000000e+00> : vector<2x512xf32>
    %149 = tpu.matmul %140, %148, %cst_48 {dimension_numbers = #tpu.dot_dimension_numbers<[1], [0], [0], [1], [0, 0, 1, 1], [], []>} : vector<2x128xf32>, vector<128x512xf32>, vector<2x512xf32> -> vector<2x512xf32>
    %150 = arith.addf %147, %149 : vector<2x512xf32>
    %151 = vector.extract_strided_slice %150 {offsets = [0, 0], sizes = [2, 128], strides = [1, 1]} : vector<2x512xf32> to vector<2x128xf32>
    %152 = arith.negf %151 : vector<2x128xf32>
    %153 = math.exp %152 : vector<2x128xf32>
    %cst_49 = arith.constant 1.000000e+00 : f32
    %154 = vector.broadcast %cst_49 : f32 to vector<2x128xf32>
    %155 = arith.addf %154, %153 : vector<2x128xf32>
    %156 = arith.divf %154, %155 : vector<2x128xf32>
    %157 = vector.extract_strided_slice %150 {offsets = [0, 128], sizes = [2, 128], strides = [1, 1]} : vector<2x512xf32> to vector<2x128xf32>
    %158 = arith.negf %157 : vector<2x128xf32>
    %159 = math.exp %158 : vector<2x128xf32>
    %cst_50 = arith.constant 1.000000e+00 : f32
    %160 = vector.broadcast %cst_50 : f32 to vector<2x128xf32>
    %161 = arith.addf %160, %159 : vector<2x128xf32>
    %162 = arith.divf %160, %161 : vector<2x128xf32>
    %163 = vector.extract_strided_slice %150 {offsets = [0, 256], sizes = [2, 128], strides = [1, 1]} : vector<2x512xf32> to vector<2x128xf32>
    %164 = math.tanh %163 : vector<2x128xf32>
    %165 = vector.extract_strided_slice %150 {offsets = [0, 384], sizes = [2, 128], strides = [1, 1]} : vector<2x512xf32> to vector<2x128xf32>
    %166 = arith.negf %165 : vector<2x128xf32>
    %167 = math.exp %166 : vector<2x128xf32>
    %cst_51 = arith.constant 1.000000e+00 : f32
    %168 = vector.broadcast %cst_51 : f32 to vector<2x128xf32>
    %169 = arith.addf %168, %167 : vector<2x128xf32>
    %170 = arith.divf %168, %169 : vector<2x128xf32>
    %171 = arith.mulf %162, %138 : vector<2x128xf32>
    %172 = arith.mulf %156, %164 : vector<2x128xf32>
    %173 = arith.addf %171, %172 : vector<2x128xf32>
    %174 = math.tanh %173 : vector<2x128xf32>
    %175 = arith.mulf %170, %174 : vector<2x128xf32>
    %176 = arith.index_cast %c4_i32 : i32 to index
    %c0_52 = arith.constant 0 : index
    %c0_53 = arith.constant 0 : index
    %177 = vector.load %arg3[%176, %c0_52, %c0_53] : memref<8x2x128xf32, #tpu.memory_space<vmem>>, vector<1x2x128xf32>
    %178 = vector.shape_cast %177 : vector<1x2x128xf32> to vector<2x128xf32>
    %179 = vector.shape_cast %175 : vector<2x128xf32> to vector<1x2x128xf32>
    tpu.vector_store %arg3[%176, %c0_52, %c0_53], %179 {strides = array<i32>} : memref<8x2x128xf32, #tpu.memory_space<vmem>>, vector<1x2x128xf32>,
    %c5_i32 = arith.constant 5 : i32
    %180 = arith.index_cast %c5_i32 : i32 to index
    %c0_54 = arith.constant 0 : index
    %c0_55 = arith.constant 0 : index
    %181 = vector.load %arg1[%180, %c0_54, %c0_55] : memref<8x2x512xf32, #tpu.memory_space<vmem>>, vector<1x2x512xf32>
    %182 = vector.shape_cast %181 : vector<1x2x512xf32> to vector<2x512xf32>
    %c0_56 = arith.constant 0 : index
    %c0_57 = arith.constant 0 : index
    %183 = vector.load %arg2[%c0_56, %c0_57] : memref<128x512xf32, #tpu.memory_space<vmem>>, vector<128x512xf32>
    %cst_58 = arith.constant dense<0.000000e+00> : vector<2x512xf32>
    %184 = tpu.matmul %175, %183, %cst_58 {dimension_numbers = #tpu.dot_dimension_numbers<[1], [0], [0], [1], [0, 0, 1, 1], [], []>} : vector<2x128xf32>, vector<128x512xf32>, vector<2x512xf32> -> vector<2x512xf32>
    %185 = arith.addf %182, %184 : vector<2x512xf32>
    %186 = vector.extract_strided_slice %185 {offsets = [0, 0], sizes = [2, 128], strides = [1, 1]} : vector<2x512xf32> to vector<2x128xf32>
    %187 = arith.negf %186 : vector<2x128xf32>
    %188 = math.exp %187 : vector<2x128xf32>
    %cst_59 = arith.constant 1.000000e+00 : f32
    %189 = vector.broadcast %cst_59 : f32 to vector<2x128xf32>
    %190 = arith.addf %189, %188 : vector<2x128xf32>
    %191 = arith.divf %189, %190 : vector<2x128xf32>
    %192 = vector.extract_strided_slice %185 {offsets = [0, 128], sizes = [2, 128], strides = [1, 1]} : vector<2x512xf32> to vector<2x128xf32>
    %193 = arith.negf %192 : vector<2x128xf32>
    %194 = math.exp %193 : vector<2x128xf32>
    %cst_60 = arith.constant 1.000000e+00 : f32
    %195 = vector.broadcast %cst_60 : f32 to vector<2x128xf32>
    %196 = arith.addf %195, %194 : vector<2x128xf32>
    %197 = arith.divf %195, %196 : vector<2x128xf32>
    %198 = vector.extract_strided_slice %185 {offsets = [0, 256], sizes = [2, 128], strides = [1, 1]} : vector<2x512xf32> to vector<2x128xf32>
    %199 = math.tanh %198 : vector<2x128xf32>
    %200 = vector.extract_strided_slice %185 {offsets = [0, 384], sizes = [2, 128], strides = [1, 1]} : vector<2x512xf32> to vector<2x128xf32>
    %201 = arith.negf %200 : vector<2x128xf32>
    %202 = math.exp %201 : vector<2x128xf32>
    %cst_61 = arith.constant 1.000000e+00 : f32
    %203 = vector.broadcast %cst_61 : f32 to vector<2x128xf32>
    %204 = arith.addf %203, %202 : vector<2x128xf32>
    %205 = arith.divf %203, %204 : vector<2x128xf32>
    %206 = arith.mulf %197, %173 : vector<2x128xf32>
    %207 = arith.mulf %191, %199 : vector<2x128xf32>
    %208 = arith.addf %206, %207 : vector<2x128xf32>
    %209 = math.tanh %208 : vector<2x128xf32>
    %210 = arith.mulf %205, %209 : vector<2x128xf32>
    %211 = arith.index_cast %c5_i32 : i32 to index
    %c0_62 = arith.constant 0 : index
    %c0_63 = arith.constant 0 : index
    %212 = vector.load %arg3[%211, %c0_62, %c0_63] : memref<8x2x128xf32, #tpu.memory_space<vmem>>, vector<1x2x128xf32>
    %213 = vector.shape_cast %212 : vector<1x2x128xf32> to vector<2x128xf32>
    %214 = vector.shape_cast %210 : vector<2x128xf32> to vector<1x2x128xf32>
    tpu.vector_store %arg3[%211, %c0_62, %c0_63], %214 {strides = array<i32>} : memref<8x2x128xf32, #tpu.memory_space<vmem>>, vector<1x2x128xf32>,
    %c6_i32 = arith.constant 6 : i32
    %215 = arith.index_cast %c6_i32 : i32 to index
    %c0_64 = arith.constant 0 : index
    %c0_65 = arith.constant 0 : index
    %216 = vector.load %arg1[%215, %c0_64, %c0_65] : memref<8x2x512xf32, #tpu.memory_space<vmem>>, vector<1x2x512xf32>
    %217 = vector.shape_cast %216 : vector<1x2x512xf32> to vector<2x512xf32>
    %c0_66 = arith.constant 0 : index
    %c0_67 = arith.constant 0 : index
    %218 = vector.load %arg2[%c0_66, %c0_67] : memref<128x512xf32, #tpu.memory_space<vmem>>, vector<128x512xf32>
    %cst_68 = arith.constant dense<0.000000e+00> : vector<2x512xf32>
    %219 = tpu.matmul %210, %218, %cst_68 {dimension_numbers = #tpu.dot_dimension_numbers<[1], [0], [0], [1], [0, 0, 1, 1], [], []>} : vector<2x128xf32>, vector<128x512xf32>, vector<2x512xf32> -> vector<2x512xf32>
    %220 = arith.addf %217, %219 : vector<2x512xf32>
    %221 = vector.extract_strided_slice %220 {offsets = [0, 0], sizes = [2, 128], strides = [1, 1]} : vector<2x512xf32> to vector<2x128xf32>
    %222 = arith.negf %221 : vector<2x128xf32>
    %223 = math.exp %222 : vector<2x128xf32>
    %cst_69 = arith.constant 1.000000e+00 : f32
    %224 = vector.broadcast %cst_69 : f32 to vector<2x128xf32>
    %225 = arith.addf %224, %223 : vector<2x128xf32>
    %226 = arith.divf %224, %225 : vector<2x128xf32>
    %227 = vector.extract_strided_slice %220 {offsets = [0, 128], sizes = [2, 128], strides = [1, 1]} : vector<2x512xf32> to vector<2x128xf32>
    %228 = arith.negf %227 : vector<2x128xf32>
    %229 = math.exp %228 : vector<2x128xf32>
    %cst_70 = arith.constant 1.000000e+00 : f32
    %230 = vector.broadcast %cst_70 : f32 to vector<2x128xf32>
    %231 = arith.addf %230, %229 : vector<2x128xf32>
    %232 = arith.divf %230, %231 : vector<2x128xf32>
    %233 = vector.extract_strided_slice %220 {offsets = [0, 256], sizes = [2, 128], strides = [1, 1]} : vector<2x512xf32> to vector<2x128xf32>
    %234 = math.tanh %233 : vector<2x128xf32>
    %235 = vector.extract_strided_slice %220 {offsets = [0, 384], sizes = [2, 128], strides = [1, 1]} : vector<2x512xf32> to vector<2x128xf32>
    %236 = arith.negf %235 : vector<2x128xf32>
    %237 = math.exp %236 : vector<2x128xf32>
    %cst_71 = arith.constant 1.000000e+00 : f32
    %238 = vector.broadcast %cst_71 : f32 to vector<2x128xf32>
    %239 = arith.addf %238, %237 : vector<2x128xf32>
    %240 = arith.divf %238, %239 : vector<2x128xf32>
    %241 = arith.mulf %232, %208 : vector<2x128xf32>
    %242 = arith.mulf %226, %234 : vector<2x128xf32>
    %243 = arith.addf %241, %242 : vector<2x128xf32>
    %244 = math.tanh %243 : vector<2x128xf32>
    %245 = arith.mulf %240, %244 : vector<2x128xf32>
    %246 = arith.index_cast %c6_i32 : i32 to index
    %c0_72 = arith.constant 0 : index
    %c0_73 = arith.constant 0 : index
    %247 = vector.load %arg3[%246, %c0_72, %c0_73] : memref<8x2x128xf32, #tpu.memory_space<vmem>>, vector<1x2x128xf32>
    %248 = vector.shape_cast %247 : vector<1x2x128xf32> to vector<2x128xf32>
    %249 = vector.shape_cast %245 : vector<2x128xf32> to vector<1x2x128xf32>
    tpu.vector_store %arg3[%246, %c0_72, %c0_73], %249 {strides = array<i32>} : memref<8x2x128xf32, #tpu.memory_space<vmem>>, vector<1x2x128xf32>,
    %c7_i32 = arith.constant 7 : i32
    %250 = arith.index_cast %c7_i32 : i32 to index
    %c0_74 = arith.constant 0 : index
    %c0_75 = arith.constant 0 : index
    %251 = vector.load %arg1[%250, %c0_74, %c0_75] : memref<8x2x512xf32, #tpu.memory_space<vmem>>, vector<1x2x512xf32>
    %252 = vector.shape_cast %251 : vector<1x2x512xf32> to vector<2x512xf32>
    %c0_76 = arith.constant 0 : index
    %c0_77 = arith.constant 0 : index
    %253 = vector.load %arg2[%c0_76, %c0_77] : memref<128x512xf32, #tpu.memory_space<vmem>>, vector<128x512xf32>
    %cst_78 = arith.constant dense<0.000000e+00> : vector<2x512xf32>
    %254 = tpu.matmul %245, %253, %cst_78 {dimension_numbers = #tpu.dot_dimension_numbers<[1], [0], [0], [1], [0, 0, 1, 1], [], []>} : vector<2x128xf32>, vector<128x512xf32>, vector<2x512xf32> -> vector<2x512xf32>
    %255 = arith.addf %252, %254 : vector<2x512xf32>
    %256 = vector.extract_strided_slice %255 {offsets = [0, 0], sizes = [2, 128], strides = [1, 1]} : vector<2x512xf32> to vector<2x128xf32>
    %257 = arith.negf %256 : vector<2x128xf32>
    %258 = math.exp %257 : vector<2x128xf32>
    %cst_79 = arith.constant 1.000000e+00 : f32
    %259 = vector.broadcast %cst_79 : f32 to vector<2x128xf32>
    %260 = arith.addf %259, %258 : vector<2x128xf32>
    %261 = arith.divf %259, %260 : vector<2x128xf32>
    %262 = vector.extract_strided_slice %255 {offsets = [0, 128], sizes = [2, 128], strides = [1, 1]} : vector<2x512xf32> to vector<2x128xf32>
    %263 = arith.negf %262 : vector<2x128xf32>
    %264 = math.exp %263 : vector<2x128xf32>
    %cst_80 = arith.constant 1.000000e+00 : f32
    %265 = vector.broadcast %cst_80 : f32 to vector<2x128xf32>
    %266 = arith.addf %265, %264 : vector<2x128xf32>
    %267 = arith.divf %265, %266 : vector<2x128xf32>
    %268 = vector.extract_strided_slice %255 {offsets = [0, 256], sizes = [2, 128], strides = [1, 1]} : vector<2x512xf32> to vector<2x128xf32>
    %269 = math.tanh %268 : vector<2x128xf32>
    %270 = vector.extract_strided_slice %255 {offsets = [0, 384], sizes = [2, 128], strides = [1, 1]} : vector<2x512xf32> to vector<2x128xf32>
    %271 = arith.negf %270 : vector<2x128xf32>
    %272 = math.exp %271 : vector<2x128xf32>
    %cst_81 = arith.constant 1.000000e+00 : f32
    %273 = vector.broadcast %cst_81 : f32 to vector<2x128xf32>
    %274 = arith.addf %273, %272 : vector<2x128xf32>
    %275 = arith.divf %273, %274 : vector<2x128xf32>
    %276 = arith.mulf %267, %243 : vector<2x128xf32>
    %277 = arith.mulf %261, %269 : vector<2x128xf32>
    %278 = arith.addf %276, %277 : vector<2x128xf32>
    %279 = math.tanh %278 : vector<2x128xf32>
    %280 = arith.mulf %275, %279 : vector<2x128xf32>
    %281 = arith.index_cast %c7_i32 : i32 to index
    %c0_82 = arith.constant 0 : index
    %c0_83 = arith.constant 0 : index
    %282 = vector.load %arg3[%281, %c0_82, %c0_83] : memref<8x2x128xf32, #tpu.memory_space<vmem>>, vector<1x2x128xf32>
    %283 = vector.shape_cast %282 : vector<1x2x128xf32> to vector<2x128xf32>
    %284 = vector.shape_cast %280 : vector<2x128xf32> to vector<1x2x128xf32>
    tpu.vector_store %arg3[%281, %c0_82, %c0_83], %284 {strides = array<i32>} : memref<8x2x128xf32, #tpu.memory_space<vmem>>, vector<1x2x128xf32>,
    %c8_i32 = arith.constant 8 : i32
    %c0_84 = arith.constant 0 : index
    %c0_85 = arith.constant 0 : index
    %285 = vector.load %arg4[%c0_84, %c0_85] : memref<2x128xf32, #tpu.memory_space<vmem>>, vector<2x128xf32>
    tpu.vector_store %arg4[%c0_84, %c0_85], %280 {strides = array<i32>} : memref<2x128xf32, #tpu.memory_space<vmem>>, vector<2x128xf32>,
    %c0_86 = arith.constant 0 : index
    %c0_87 = arith.constant 0 : index
    %286 = vector.load %arg5[%c0_86, %c0_87] : memref<2x128xf32, #tpu.memory_space<vmem>>, vector<2x128xf32>
    tpu.vector_store %arg5[%c0_86, %c0_87], %278 {strides = array<i32>} : memref<2x128xf32, #tpu.memory_space<vmem>>, vector<2x128xf32>,
    return
  }
  func.func @transform_0(%arg0: i32) -> (i32, i32, i32) {
    %c0_i32 = arith.constant 0 : i32
    %c0_i32_0 = arith.constant 0 : i32
    %c0_i32_1 = arith.constant 0 : i32
    return %arg0, %c0_i32, %c0_i32_0 : i32, i32, i32
  }
  func.func @transform_1(%arg0: i32) -> (i32, i32) {
    %c0_i32 = arith.constant 0 : i32
    %c0_i32_0 = arith.constant 0 : i32
    %c0_i32_1 = arith.constant 0 : i32
    return %c0_i32, %c0_i32_0 : i32, i32
  }
  func.func @transform_2(%arg0: i32) -> (i32, i32, i32) {
    %c0_i32 = arith.constant 0 : i32
    %c0_i32_0 = arith.constant 0 : i32
    %c0_i32_1 = arith.constant 0 : i32
    return %arg0, %c0_i32, %c0_i32_0 : i32, i32, i32
  }
}

module attributes {stable_mosaic.version = 11 : i64} {
  func.func @_matmul_bias_kernel(%arg0: i32, %arg1: i32, %arg2: memref<16x128xf32, #tpu.memory_space<vmem>>, %arg3: memref<128x128xf32, #tpu.memory_space<vmem>>, %arg4: memref<1x128xf32, #tpu.memory_space<vmem>>, %arg5: memref<16x128xf32, #tpu.memory_space<vmem>>) attributes {dimension_semantics = [#tpu.dimension_semantics<parallel>, #tpu.dimension_semantics<parallel>], iteration_bounds = array<i64: 1, 1>, scalar_prefetch = 0 : i64, scratch_operands = 0 : i64, tpu.core_type = #tpu.core_type<tc>, window_params = [{transform_indices = @transform_0, window_bounds = array<i64: 16, 128>}, {transform_indices = @transform_1, window_bounds = array<i64: 128, 128>}, {transform_indices = @transform_2, window_bounds = array<i64: 1, 128>}, {transform_indices = @transform_3, window_bounds = array<i64: 16, 128>}]} {
    %c0 = arith.constant 0 : index
    %c0_0 = arith.constant 0 : index
    %0 = vector.load %arg2[%c0, %c0_0] : memref<16x128xf32, #tpu.memory_space<vmem>>, vector<16x128xf32>
    %c0_1 = arith.constant 0 : index
    %c0_2 = arith.constant 0 : index
    %1 = vector.load %arg3[%c0_1, %c0_2] : memref<128x128xf32, #tpu.memory_space<vmem>>, vector<128x128xf32>
    %cst = arith.constant dense<0.000000e+00> : vector<16x128xf32>
    %2 = tpu.matmul %0, %1, %cst {dimension_numbers = #tpu.dot_dimension_numbers<[1], [0], [0], [1], [0, 0, 1, 1], [], []>} : vector<16x128xf32>, vector<128x128xf32>, vector<16x128xf32> -> vector<16x128xf32>
    %c0_3 = arith.constant 0 : index
    %c0_4 = arith.constant 0 : index
    %3 = vector.load %arg4[%c0_3, %c0_4] : memref<1x128xf32, #tpu.memory_space<vmem>>, vector<1x128xf32>
    %4 = vector.broadcast %3 : vector<1x128xf32> to vector<16x128xf32>
    %5 = arith.addf %2, %4 : vector<16x128xf32>
    %c0_5 = arith.constant 0 : index
    %c0_6 = arith.constant 0 : index
    %6 = vector.load %arg5[%c0_5, %c0_6] : memref<16x128xf32, #tpu.memory_space<vmem>>, vector<16x128xf32>
    tpu.vector_store %arg5[%c0_5, %c0_6], %5 {strides = array<i32>} : memref<16x128xf32, #tpu.memory_space<vmem>>, vector<16x128xf32>,
    return
  }
  func.func @transform_0(%arg0: i32, %arg1: i32) -> (i32, i32) {
    %c0_i32 = arith.constant 0 : i32
    %c0_i32_0 = arith.constant 0 : i32
    return %arg0, %c0_i32 : i32, i32
  }
  func.func @transform_1(%arg0: i32, %arg1: i32) -> (i32, i32) {
    %c0_i32 = arith.constant 0 : i32
    %c0_i32_0 = arith.constant 0 : i32
    return %c0_i32, %arg1 : i32, i32
  }
  func.func @transform_2(%arg0: i32, %arg1: i32) -> (i32, i32) {
    %c0_i32 = arith.constant 0 : i32
    %c0_i32_0 = arith.constant 0 : i32
    return %c0_i32, %arg1 : i32, i32
  }
  func.func @transform_3(%arg0: i32, %arg1: i32) -> (i32, i32) {
    %c0_i32 = arith.constant 0 : i32
    return %arg0, %arg1 : i32, i32
  }
}

module attributes {stable_mosaic.version = 11 : i64} {
  func.func @_matmul_bias_kernel(%arg0: i32, %arg1: i32, %arg2: memref<16x128xf32, #tpu.memory_space<vmem>>, %arg3: memref<128x256xf32, #tpu.memory_space<vmem>>, %arg4: memref<1x256xf32, #tpu.memory_space<vmem>>, %arg5: memref<16x256xf32, #tpu.memory_space<vmem>>) attributes {dimension_semantics = [#tpu.dimension_semantics<parallel>, #tpu.dimension_semantics<parallel>], iteration_bounds = array<i64: 1, 2>, scalar_prefetch = 0 : i64, scratch_operands = 0 : i64, tpu.core_type = #tpu.core_type<tc>, window_params = [{transform_indices = @transform_0, window_bounds = array<i64: 16, 128>}, {transform_indices = @transform_1, window_bounds = array<i64: 128, 256>}, {transform_indices = @transform_2, window_bounds = array<i64: 1, 256>}, {transform_indices = @transform_3, window_bounds = array<i64: 16, 256>}]} {
    %c0 = arith.constant 0 : index
    %c0_0 = arith.constant 0 : index
    %0 = vector.load %arg2[%c0, %c0_0] : memref<16x128xf32, #tpu.memory_space<vmem>>, vector<16x128xf32>
    %c0_1 = arith.constant 0 : index
    %c0_2 = arith.constant 0 : index
    %1 = vector.load %arg3[%c0_1, %c0_2] : memref<128x256xf32, #tpu.memory_space<vmem>>, vector<128x256xf32>
    %cst = arith.constant dense<0.000000e+00> : vector<16x256xf32>
    %2 = tpu.matmul %0, %1, %cst {dimension_numbers = #tpu.dot_dimension_numbers<[1], [0], [0], [1], [0, 0, 1, 1], [], []>} : vector<16x128xf32>, vector<128x256xf32>, vector<16x256xf32> -> vector<16x256xf32>
    %c0_3 = arith.constant 0 : index
    %c0_4 = arith.constant 0 : index
    %3 = vector.load %arg4[%c0_3, %c0_4] : memref<1x256xf32, #tpu.memory_space<vmem>>, vector<1x256xf32>
    %4 = vector.broadcast %3 : vector<1x256xf32> to vector<16x256xf32>
    %5 = arith.addf %2, %4 : vector<16x256xf32>
    %c0_5 = arith.constant 0 : index
    %c0_6 = arith.constant 0 : index
    %6 = vector.load %arg5[%c0_5, %c0_6] : memref<16x256xf32, #tpu.memory_space<vmem>>, vector<16x256xf32>
    tpu.vector_store %arg5[%c0_5, %c0_6], %5 {strides = array<i32>} : memref<16x256xf32, #tpu.memory_space<vmem>>, vector<16x256xf32>,
    return
  }
  func.func @transform_0(%arg0: i32, %arg1: i32) -> (i32, i32) {
    %c0_i32 = arith.constant 0 : i32
    %c0_i32_0 = arith.constant 0 : i32
    return %arg0, %c0_i32 : i32, i32
  }
  func.func @transform_1(%arg0: i32, %arg1: i32) -> (i32, i32) {
    %c0_i32 = arith.constant 0 : i32
    %c0_i32_0 = arith.constant 0 : i32
    return %c0_i32, %arg1 : i32, i32
  }
  func.func @transform_2(%arg0: i32, %arg1: i32) -> (i32, i32) {
    %c0_i32 = arith.constant 0 : i32
    %c0_i32_0 = arith.constant 0 : i32
    return %c0_i32, %arg1 : i32, i32
  }
  func.func @transform_3(%arg0: i32, %arg1: i32) -> (i32, i32) {
    %c0_i32 = arith.constant 0 : i32
    return %arg0, %arg1 : i32, i32
  }
}

</mosaic_0001>

<bundles_post_ra>
// kernel: lstm_protein_generator_forward.5
= control target key start
LH: loop header
LB: loop body
LE: loop exit
PB: predicated region body
PF: predicated region fallthrough
CT: control target
= control target key end

     0   :  { %s573_s12 = smov 0   ;;  %s575_s13 = smov 0   ;;  %s659_s0 = inlined_call_operand.vmem [shape: f32[16,16], index: 0, kind: input, shape index: {}]   ;;  %s660_s1 = inlined_call_operand.vmem [shape: f32[16,512], index: 1, kind: input, shape index: {}]   ;;  %s661_s2 = inlined_call_operand.vmem [shape: f32[1,512], index: 2, kind: input, shape index: {}]   ;;  %s662_s3 = inlined_call_operand.vmem [shape: f32[16,512], index: 3, kind: output, shape index: {}]  }
   0x1   :  { %s577_s14 = smov 0   ;;  %s579_s15 = smov 0  }
   0x2   :  { %s581_s16 = smov 0  }
   0x3 LB: > { %s22_s17 = sadd.s32 1, %s547_s15  ;;  %s446_s18 = sadd.s32 4294967295, %s551_s16   ;;  %s551_s16 = sphi %s581_s16, %s13_s16   ;;  %s547_s15 = sphi %s579_s15, %s667_s15   ;;  %s543_s14 = sphi %s577_s14, %s666_s14   ;;  %s539_s13 = sphi %s575_s13, %s665_s13   ;;  %s535_s12 = sphi %s573_s12, %s664_s12  }
   0x4   : > { %p23_p0 = scmp.ge.s32.totalorder %s22_s17, 2  ;;  %p65_p1 = scmp.ne.s32.totalorder %s539_s13, %s535_s12 }
   0x5   : > { %p66_p2 = scmp.eq.s32.totalorder %s551_s16, 0  ;;  %p123_p4 = scmp.eq.s32.totalorder %s446_s18, 1 }
   0x6   : > { %s669_s17 = smov (%p23_p0, %s22_s17), 0  ;;  %s58_s20 = sadd.s32 1, %s539_s13 }
   0x7   : > { %p67_p3 = por %p66_p2, %p65_p1  ;;  %s55_s19 = ssub.s32 %s547_s15, %s669_s17 }
   0x8   : > { %p56_p5 = scmp.eq.s32.totalorder %s55_s19, 0  ;;  %p608_p6 = por %p123_p4, %p65_p1 }
   0x9   : > { %p450_p7 = scmp.ge.s32.totalorder %s551_s16, 2 }
   0xa   : > { %s613_s22 = scalar_select %p56_p5, %s539_s13, %s58_s20  }
   0xb   : > { %154 = sbr.rel (%p450_p7) target bundleno = 24 (0x18), region = 20 }
  0x10   : > { %157 = sbr.rel (!%p67_p3) target bundleno = 24 (0x18), region = 24  ;;  %s159_s23 = sand.u32 (%p67_p3), 1, %s539_s13  }
  0x11   : > { %s467_s24 = sshll.u32 (%p67_p3), %s547_s15, 4  ;;  %s451_s25 = sshll.u32 (%p67_p3), %s159_s23, 5 }
  0x12   : > { %s164_s28 = scalar_lea.vmem (%p67_p3), %s660_s1, %s467_s24  ;;  %s161_s29 = scalar_lea.vmem (%p67_p3), [#allocation2], %s451_s25 }
  0x13   : > { %v177_v0 = vld [vmem:[%s164_s28] sm:$0xff] (%p67_p3)  ;;  %v179_v1 = vld [vmem:[%s164_s28 + $0x8] sm:$0xff] (%p67_p3) }
  0x14   : > { %v181_v2 = vld [vmem:[%s164_s28 + $0x20] sm:$0xff] (%p67_p3)  ;;  %178 = vst [vmem:[%s161_s29] sm:$0xff] (%p67_p3), %v177_v0  ;;  %v183_v3 = vld [vmem:[%s164_s28 + $0x28] sm:$0xff] (%p67_p3) }
  0x15   : > { %180 = vst [vmem:[%s161_s29 + $0x8] sm:$0xff] %v179_v1 }
  0x16   : > { %182 = vst [vmem:[%s161_s29 + $0x10] sm:$0xff] %v181_v2 }
  0x17   : > { %184 = vst [vmem:[%s161_s29 + $0x18] sm:$0xff] %v183_v3 }
  0x18 PF: > { %p454_p8 = scmp.ge.s32.totalorder %s551_s16, 1  ;;  %p197_p9 = scmp.lt.s32.totalorder %s551_s16, 3 }
  0x1a   : > { %p198_p10 = pnand %p454_p8, %p197_p9 }
  0x1b   : > { %s204_s30 = sand.u32 (!%p198_p10), 1, %s535_s12   ;;  %s457_s10 = sshll.u32 (!%p198_p10), %s543_s14, 1 }
  0x1c   : > { %201 = sbr.rel (%p198_p10) target bundleno = 181 (0xb5), region = 51  ;;  %s624_s4 = sshll.u32 (!%p198_p10), %s204_s30, 5 }
  0x1d   : > { %s206_s5 = scalar_lea.vmem (!%p198_p10), [#allocation2], %s624_s4  ;;  %p243_p11 = scmp.lt.s32.totalorder (!%p198_p10), %s457_s10, 3 }
  0x1e   : > { %s234_s19 = scalar_lea.vmem (!%p198_p10), [#allocation3], %s624_s4 }
  0x21   : > { %v253_v4 = vld [vmem:[%s206_s5 + $0x10] sm:$0xff]  ;;  %v254_v5 = vld [vmem:[%s206_s5 + $0x18] sm:$0xff]  ;;  %v251_v6 = vld [vmem:[%s206_s5] sm:$0xff]  ;;  %vm261_vm0 = vcmask 130048   ;;  %s671_s10 = smov (!%p243_p11, %s457_s10), 3  ;;  %s468_s20 = sshll.u32 (%p608_p6), %s543_s14, 4 }
  0x22   : > { %469 = vmatpush.msra.mxu2 %v253_v4  ;;  %471 = vmatpush.msra.mxu3 %v254_v5  ;;  %v252_v7 = vld [vmem:[%s206_s5 + $0x8] sm:$0xff]  ;;  %v249_v9 = vld [vmem:[%s659_s0] sm:$0xff]  ;;  %s245_s18 = scalar_lea.vmem %s661_s2, %s671_s10  ;;  %s330_s25 = scalar_lea.vmem (%p608_p6), %s662_s3, %s468_s20 }
  0x23   : > { %v250_v8 = vld [vmem:[%s659_s0 + $0x8] sm:$0xff]  ;;  %282 = vmatpush.msra.mxu0 %v253_v4  ;;  %305 = vmatpush.msra.mxu1 %v254_v5  ;;  %v255_v10 = vld [vmem:[%s245_s18] sm:$0x3] }
  0x24   : > { %470 = vmatpush.msra.mxu2 %v251_v6  ;;  %472 = vmatpush.msra.mxu3 %v252_v7  ;;  %v257_v11 = vperm.slane %v255_v10, 0  ;;  %v258_v12 = vperm.slane %v255_v10, 1 }
  0x25   : > { %459 = vmatmul.msk.f32.vlgmr.msra.gmra.mxu2 %vm261_vm0, %v250_v8  ;;  %461 = vmatmul.msk.f32.vlgmr.msra.gmra.mxu3 %vm261_vm0, %v250_v8 }
  0x26   : > { %283 = vmatpush.msra.mxu0 %v251_v6  ;;  %306 = vmatpush.msra.mxu1 %v252_v7 }
  0x27   : > { %458 = vmatmul.msk.f32.vlgmr.msra.gmra.mxu0 %vm261_vm0, %v249_v9  ;;  %460 = vmatmul.msk.f32.vlgmr.msra.gmra.mxu1 %vm261_vm0, %v249_v9 }
  0xa4   : > { %v285_v13 = vpop.f32.mrf.mxu0  ;;  %v308_v14 = vpop.f32.mrf.mxu1 }
  0xa5   : > { %v286_v15 = vadd.f32 %v285_v13, %v257_v11  ;;  %v309_v16 = vadd.f32 %v308_v14, %v258_v12 }
  0xa7   : > { %314 = vst [vmem:[%s234_s19] sm:$0xff] %v286_v15 }
  0xa8   : > { %v288_v17 = vpop.f32.mrf.mxu2  ;;  %315 = vst [vmem:[%s234_s19 + $0x8] sm:$0xff] %v309_v16  ;;  %v311_v18 = vpop.f32.mrf.mxu3  ;;  %324 = sbr.rel (!%p608_p6) target bundleno = 181 (0xb5), region = 59 }
  0xa9   : > { %v289_v19 = vadd.f32 %v288_v17, %v257_v11  ;;  %v312_v20 = vadd.f32 %v311_v18, %v258_v12 }
  0xab   : > { %316 = vst [vmem:[%s234_s19 + $0x10] sm:$0xff] %v289_v19 }
  0xac   : > { %317 = vst [vmem:[%s234_s19 + $0x18] sm:$0xff] %v312_v20 }
  0xae   : > { %v343_v21 = vld [vmem:[%s234_s19] sm:$0xff] }
  0xaf   : > { %v345_v22 = vld [vmem:[%s234_s19 + $0x8] sm:$0xff]  ;;  %344 = vst [vmem:[%s330_s25] sm:$0xff] %v343_v21 }
  0xb0   : > { %346 = vst [vmem:[%s330_s25 + $0x8] sm:$0xff] %v345_v22 }
  0xb2   : > { %v347_v23 = vld [vmem:[%s234_s19 + $0x10] sm:$0xff] }
  0xb3   : > { %v349_v24 = vld [vmem:[%s234_s19 + $0x18] sm:$0xff]  ;;  %348 = vst [vmem:[%s330_s25 + $0x20] sm:$0xff] %v347_v23 }
  0xb4   : > { %350 = vst [vmem:[%s330_s25 + $0x28] sm:$0xff] %v349_v24 }
  0xb5 PF: > { %s13_s16 = sadd.s32 1, %s551_s16   ;;  %s664_s12 = smov %s539_s13 }
  0xb6   : > { %p10_p12 = scmp.ge.s32.totalorder %s13_s16, 4   ;;  %s665_s13 = smov %s613_s22 }
  0xb7   : > { %s666_s14 = smov %s547_s15  ;;  %s667_s15 = smov %s669_s17 }
  0xb8   :  { %12 = sbr.rel (!%p10_p12) target bundleno = 3 (0x3), region = 119 }

// kernel: lstm_protein_generator_forward.9
= control target key start
LH: loop header
LB: loop body
LE: loop exit
PB: predicated region body
PF: predicated region fallthrough
CT: control target
= control target key end

     0   :  { %s209_s0 = inlined_call_operand.vmem [shape: f32[16,128], index: 0, kind: input, shape index: {}]   ;;  %s210_s1 = inlined_call_operand.vmem [shape: f32[128,128], index: 1, kind: input, shape index: {}]   ;;  %s211_s2 = inlined_call_operand.vmem [shape: f32[1,128], index: 2, kind: input, shape index: {}]   ;;  %s212_s3 = inlined_call_operand.hbm [shape: f32[16,128], index: 3, kind: output, shape index: {}]  }
   0x1   :  { %v32_v0 = vld [vmem:[%s210_s1 + $0x78] sm:$0xff]  ;;  %v31_v1 = vld [vmem:[%s210_s1 + $0x70] sm:$0xff]  ;;  %v30_v2 = vld [vmem:[%s210_s1 + $0x68] sm:$0xff] }
   0x2   :  { %37 = vmatpush.msra.mxu0 %v32_v0  ;;  %80 = vmatpush.msra.mxu1 %v32_v0  ;;  %v29_v3 = vld [vmem:[%s210_s1 + $0x60] sm:$0xff]  ;;  %v28_v4 = vld [vmem:[%s210_s1 + $0x58] sm:$0xff] }
   0x4   :  { %38 = vmatpush.msra.mxu0 %v31_v1  ;;  %81 = vmatpush.msra.mxu1 %v31_v1 }
   0x6   :  { %39 = vmatpush.msra.mxu0 %v30_v2  ;;  %82 = vmatpush.msra.mxu1 %v30_v2 }
   0x7   :  { %8 = vsyncpa [#allocation3], 0  ;;  %v27_v5 = vld [vmem:[%s210_s1 + $0x50] sm:$0xff]  ;;  %v26_v6 = vld [vmem:[%s210_s1 + $0x48] sm:$0xff]  ;;  %s126_s23 = smov [#allocation2]   ;;  %s68_s26 = sshll.u32 %s212_s3, 4  ;;  %s69_s26 = int_to_ptr.hbm [resolvable:$true] %s68_s26 }
   0x8   :  { %40 = vmatpush.msra.mxu0 %v29_v3  ;;  %83 = vmatpush.msra.mxu1 %v29_v3  ;;  %v25_v7 = vld [vmem:[%s210_s1 + $0x40] sm:$0xff]  ;;  %v24_v8 = vld [vmem:[%s210_s1 + $0x38] sm:$0xff]  ;;  %v23_v9 = vld [vmem:[%s210_s1 + $0x30] sm:$0xff]  ;;  %s128_s27 = smov 8  }
   0x9   :  { %v22_v10 = vld [vmem:[%s210_s1 + $0x28] sm:$0xff]  ;;  %v21_v11 = vld [vmem:[%s210_s1 + $0x20] sm:$0xff]  ;;  %v20_v12 = vld [vmem:[%s210_s1 + $0x18] sm:$0xff] }
   0xa   :  { %41 = vmatpush.msra.mxu0 %v28_v4  ;;  %84 = vmatpush.msra.mxu1 %v28_v4  ;;  %v19_v13 = vld [vmem:[%s210_s1 + $0x10] sm:$0xff]  ;;  %v18_v14 = vld [vmem:[%s210_s1 + $0x8] sm:$0xff]  ;;  %v17_v15 = vld [vmem:[%s210_s1] sm:$0xff]  ;;  %s66_s1 = sshll.u32 %s126_s23, 4  ;;  %s67_s1 = int_to_ptr.vmem [resolvable:$true] %s66_s1 }
   0xb   :  { %v15_v16 = vld [vmem:[%s209_s0] sm:$0xff]  ;;  %v16_v17 = vld [vmem:[%s209_s0 + $0x8] sm:$0xff]  ;;  %s127_s0 = smov 128  }
   0xc   :  { %42 = vmatpush.msra.mxu0 %v27_v5  ;;  %85 = vmatpush.msra.mxu1 %v27_v5  ;;  %v99_v18 = vld [vmem:[%s211_s2] ss:$0 sm:$0xff] }
   0xe   :  { %43 = vmatpush.msra.mxu0 %v26_v6  ;;  %86 = vmatpush.msra.mxu1 %v26_v6 }
  0x10   :  { %44 = vmatpush.msra.mxu0 %v25_v7  ;;  %87 = vmatpush.msra.mxu1 %v25_v7 }
  0x12   :  { %45 = vmatpush.msra.mxu0 %v24_v8  ;;  %88 = vmatpush.msra.mxu1 %v24_v8 }
  0x14   :  { %46 = vmatpush.msra.mxu0 %v23_v9  ;;  %89 = vmatpush.msra.mxu1 %v23_v9 }
  0x16   :  { %47 = vmatpush.msra.mxu0 %v22_v10  ;;  %90 = vmatpush.msra.mxu1 %v22_v10 }
  0x18   :  { %48 = vmatpush.msra.mxu0 %v21_v11  ;;  %91 = vmatpush.msra.mxu1 %v21_v11 }
  0x1a   :  { %49 = vmatpush.msra.mxu0 %v20_v12  ;;  %92 = vmatpush.msra.mxu1 %v20_v12 }
  0x1c   :  { %50 = vmatpush.msra.mxu0 %v19_v13  ;;  %93 = vmatpush.msra.mxu1 %v19_v13 }
  0x1e   :  { %51 = vmatpush.msra.mxu0 %v18_v14  ;;  %94 = vmatpush.msra.mxu1 %v18_v14 }
  0x20   :  { %52 = vmatpush.msra.mxu0 %v17_v15  ;;  %95 = vmatpush.msra.mxu1 %v17_v15 }
  0x21   :  { %53 = vmatmul.f32.vlgmr.msra.gmra.mxu0 %v15_v16  ;;  %56 = vmatmul.f32.vlgmr.msra.gmra.mxu1 %v16_v17 }
  0x9e   :  { %v54_v19 = vpop.f32.mrf.mxu0  ;;  %v57_v20 = vpop.f32.mrf.mxu1 }
  0x9f   :  { %v55_v21 = vadd.f32 %v99_v18, %v54_v19  ;;  %v58_v22 = vadd.f32 %v99_v18, %v57_v20 }
  0xa1   :  { %60 = vst [vmem:[#allocation2] sm:$0xff] %v55_v21 }
  0xa2   :  { %61 = vst [vmem:[#allocation2 + $0x8] sm:$0xff] %v58_v22 }
  0xa3   :  { %74 = dma.vmem_to_hbm [thread:$0]  %s67_s1, 256, %s69_s26, [#allocation3], %s127_s0, %s127_s0, %s128_s27  }
  0xa4   :  { %124 = dma.done.wait [#allocation3], 256  }
  0xa5   :  { %125 = vsyncadd [#allocation3], 4294967040 }
  0xa6   :  { %79 = vsyncpa [#allocation3], 1 }

// kernel: lstm_protein_generator_forward.7
= control target key start
LH: loop header
LB: loop body
LE: loop exit
PB: predicated region body
PF: predicated region fallthrough
CT: control target
= control target key end

     0   :  { %8 = vsyncpa [#allocation3], 0  ;;  %s824_s0 = inlined_call_operand.vmem [shape: f32[16,128], index: 0, kind: input, shape index: {}]   ;;  %s825_s1 = inlined_call_operand.hbm [shape: f32[128,512], index: 1, kind: input, shape index: {}]   ;;  %s826_s2 = inlined_call_operand.vmem [shape: f32[1,512], index: 2, kind: input, shape index: {}]   ;;  %s827_s3 = inlined_call_operand.vmem [shape: f32[16,512], index: 3, kind: output, shape index: {}]  }
   0x1   :  { %10 = vsyncpa [#allocation3 + $0x1], 0  ;;  %s682_s12 = smov 0   ;;  %s684_s13 = smov 0  }
   0x2   :  { %s686_s14 = smov 0   ;;  %s688_s15 = smov 0  }
   0x3   :  { %s690_s16 = smov 0   ;;  %s692_s17 = smov 0  }
   0x4 LB: > { %s468_s18 = sadd.s32 4294967295, %s657_s17   ;;  %s25_s19 = sadd.s32 1, %s653_s16  ;;  %s657_s17 = sphi %s692_s17, %s16_s17   ;;  %s653_s16 = sphi %s690_s16, %s835_s16   ;;  %s649_s15 = sphi %s688_s15, %s834_s15   ;;  %s645_s14 = sphi %s686_s14, %s833_s14   ;;  %s641_s13 = sphi %s684_s13, %s832_s13   ;;  %s637_s12 = sphi %s682_s12, %s831_s12  }
   0x5   : > { %p26_p0 = scmp.ge.s32.totalorder %s25_s19, 2  ;;  %s61_s20 = sadd.s32 1, %s645_s14 }
   0x6   : > { %p68_p1 = scmp.ne.s32.totalorder %s645_s14, %s641_s13  ;;  %p69_p2 = scmp.eq.s32.totalorder %s657_s17, 0 }
   0x7   : > { %s837_s19 = smov (%p26_p0, %s25_s19), 0  ;;  %p74_p4 = scmp.ne.s32.totalorder %s641_s13, %s637_s12 }
   0x8   : > { %p718_p3 = por %p69_p2, %p68_p1  ;;  %s58_s22 = ssub.s32 %s653_s16, %s837_s19 }
   0x9   : > { %p75_p5 = scmp.eq.s32.totalorder %s468_s18, 0  ;;  %p59_p6 = scmp.eq.s32.totalorder %s58_s22, 0 }
   0xa   : > { %p126_p7 = scmp.eq.s32.totalorder %s468_s18, 1  ;;  %p525_p10 = scmp.lt.s32.totalorder %s657_s17, 2 }
   0xb   : > { %p725_p8 = por %p75_p5, %p74_p4  ;;  %s161_s26 = sand.u32 1, %s645_s14  }
   0xc   : > { %s730_s24 = scalar_select %p59_p6, %s645_s14, %s61_s20  }
   0xd   : > { %p732_p9 = por %p126_p7, %p68_p1  ;;  %s485_s27 = sshll.u32 %s653_s16, 4 }
   0xe   : > { %s473_s28 = sshll.u32 %s161_s26, 8  ;;  %s170_s4 = scalar_lea.hbm %s825_s1, %s485_s27 }
   0xf   : > { %s171_s5 = sshll.u32 %s170_s4, 4  ;;  %s165_s6 = scalar_lea.vmem [#allocation2], %s473_s28  ;;  %s172_s5 = int_to_ptr.hbm [resolvable:$true] %s171_s5 }
  0x10   : > { %s173_s7 = sshll.u32 %s165_s6, 4  ;;  %p522_p11 = pnand %p525_p10, %p718_p3  ;;  %s174_s7 = int_to_ptr.vmem [resolvable:$true] %s173_s7 }
  0x11   : > { %p476_p12 = scmp.ge.s32.totalorder %s657_s17, 1  ;;  %s162_s8 = scalar_lea.sflag [#allocation3], %s161_s26 }
  0x12   : > { %s659_s9 = smov 512   ;;  %s660_s10 = smov 256  }
  0x13   : > { %s661_s11 = smov 16   ;;  %p189_p13 = scmp.lt.s32.totalorder %s657_s17, 3 }
  0x14   : > { %524 = dma.hbm_to_vmem [thread:$0]  (!%p522_p11), %s172_s5, 4096, %s174_s7, %s162_s8, %s659_s9, %s660_s10, %s661_s11  }
  0x15   : > { %p190_p0 = pnand %p476_p12, %p189_p13 }
  0x16   : > { %s747_s12 = sand.u32 (!%p190_p0), 1, %s641_s13  }
  0x17   : > { %193 = sbr.rel (%p190_p0) target bundleno = 205 (0xcd), region = 32  ;;  %s477_s18 = sshll.u32 (!%p190_p0), %s747_s12, 8 }
  0x18   : > { %s196_s20 = scalar_lea.sflag (!%p190_p0), [#allocation3], %s747_s12  ;;  %s751_s22 = scalar_lea.vmem (!%p190_p0), [#allocation2], %s477_s18 }
  0x1c   : > { %632 = dma.done.wait (%p725_p8), %s196_s20, 4096  }
  0x1d   : > { %634 = vsyncadd (%p725_p8), %s196_s20, 4294963200  ;;  %v277_v0 = vld [vmem:[%s751_s22 + $0xf0] sm:$0xff]  ;;  %v278_v1 = vld [vmem:[%s751_s22 + $0xf8] sm:$0xff]  ;;  %s479_s28 = sshll.u32 %s649_s15, 1  ;;  %s478_s5 = sshll.u32 %s747_s12, 5 }
  0x1e   : > { %v275_v2 = vld [vmem:[%s751_s22 + $0xe0] sm:$0xff]  ;;  %487 = vmatpush.msra.mxu2 %v277_v0  ;;  %503 = vmatpush.msra.mxu3 %v278_v1  ;;  %v276_v3 = vld [vmem:[%s751_s22 + $0xe8] sm:$0xff]  ;;  %v273_v4 = vld [vmem:[%s751_s22 + $0xd0] sm:$0xff]  ;;  %p239_p1 = scmp.lt.s32.totalorder %s479_s28, 3  ;;  %s230_s6 = scalar_lea.vmem [#allocation4], %s478_s5 }
  0x1f   : > { %v274_v5 = vld [vmem:[%s751_s22 + $0xd8] sm:$0xff]  ;;  %285 = vmatpush.msra.mxu0 %v277_v0  ;;  %308 = vmatpush.msra.mxu1 %v278_v1  ;;  %v271_v6 = vld [vmem:[%s751_s22 + $0xc0] sm:$0xff]  ;;  %v272_v7 = vld [vmem:[%s751_s22 + $0xc8] sm:$0xff]  ;;  %s486_s7 = sshll.u32 (%p732_p9), %s649_s15, 4 }
  0x20   : > { %488 = vmatpush.msra.mxu2 %v275_v2  ;;  %504 = vmatpush.msra.mxu3 %v276_v3  ;;  %v269_v8 = vld [vmem:[%s751_s22 + $0xb0] sm:$0xff]  ;;  %v270_v9 = vld [vmem:[%s751_s22 + $0xb8] sm:$0xff]  ;;  %v267_v10 = vld [vmem:[%s751_s22 + $0xa0] sm:$0xff]  ;;  %s839_s28 = smov (!%p239_p1, %s479_s28), 3  ;;  %s347_s10 = scalar_lea.vmem (%p732_p9), %s827_s3, %s486_s7 }
  0x21   : > { %286 = vmatpush.msra.mxu0 %v275_v2  ;;  %309 = vmatpush.msra.mxu1 %v276_v3  ;;  %v268_v11 = vld [vmem:[%s751_s22 + $0xa8] sm:$0xff]  ;;  %v265_v12 = vld [vmem:[%s751_s22 + $0x90] sm:$0xff]  ;;  %v266_v13 = vld [vmem:[%s751_s22 + $0x98] sm:$0xff]  ;;  %s241_s4 = scalar_lea.vmem %s826_s2, %s839_s28 }
  0x22   : > { %489 = vmatpush.msra.mxu2 %v273_v4  ;;  %505 = vmatpush.msra.mxu3 %v274_v5  ;;  %v263_v14 = vld [vmem:[%s751_s22 + $0x80] sm:$0xff]  ;;  %v264_v15 = vld [vmem:[%s751_s22 + $0x88] sm:$0xff]  ;;  %v261_v16 = vld [vmem:[%s751_s22 + $0x70] sm:$0xff] }
  0x23   : > { %287 = vmatpush.msra.mxu0 %v273_v4  ;;  %310 = vmatpush.msra.mxu1 %v274_v5  ;;  %v262_v17 = vld [vmem:[%s751_s22 + $0x78] sm:$0xff]  ;;  %v259_v18 = vld [vmem:[%s751_s22 + $0x60] sm:$0xff]  ;;  %v260_v19 = vld [vmem:[%s751_s22 + $0x68] sm:$0xff] }
  0x24   : > { %490 = vmatpush.msra.mxu2 %v271_v6  ;;  %506 = vmatpush.msra.mxu3 %v272_v7  ;;  %v257_v20 = vld [vmem:[%s751_s22 + $0x50] sm:$0xff]  ;;  %v258_v21 = vld [vmem:[%s751_s22 + $0x58] sm:$0xff]  ;;  %v255_v22 = vld [vmem:[%s751_s22 + $0x40] sm:$0xff] }
  0x25   : > { %288 = vmatpush.msra.mxu0 %v271_v6  ;;  %311 = vmatpush.msra.mxu1 %v272_v7  ;;  %v256_v23 = vld [vmem:[%s751_s22 + $0x48] sm:$0xff]  ;;  %v253_v24 = vld [vmem:[%s751_s22 + $0x30] sm:$0xff]  ;;  %v254_v25 = vld [vmem:[%s751_s22 + $0x38] sm:$0xff] }
  0x26   : > { %491 = vmatpush.msra.mxu2 %v269_v8  ;;  %507 = vmatpush.msra.mxu3 %v270_v9  ;;  %v251_v26 = vld [vmem:[%s751_s22 + $0x20] sm:$0xff]  ;;  %v252_v27 = vld [vmem:[%s751_s22 + $0x28] sm:$0xff]  ;;  %v249_v28 = vld [vmem:[%s751_s22 + $0x10] sm:$0xff] }
  0x27   : > { %289 = vmatpush.msra.mxu0 %v269_v8  ;;  %312 = vmatpush.msra.mxu1 %v270_v9  ;;  %v250_v29 = vld [vmem:[%s751_s22 + $0x18] sm:$0xff]  ;;  %v247_v30 = vld [vmem:[%s751_s22] sm:$0xff]  ;;  %v248_v31 = vld [vmem:[%s751_s22 + $0x8] sm:$0xff] }
  0x28   : > { %492 = vmatpush.msra.mxu2 %v267_v10  ;;  %508 = vmatpush.msra.mxu3 %v268_v11  ;;  %v246_v32 = vld [vmem:[%s824_s0 + $0x8] sm:$0xff]  ;;  %v245_v33 = vld [vmem:[%s824_s0] sm:$0xff] }
  0x29   : > { %290 = vmatpush.msra.mxu0 %v267_v10  ;;  %313 = vmatpush.msra.mxu1 %v268_v11  ;;  %v279_v34 = vld [vmem:[%s241_s4] sm:$0x3] }
  0x2a   : > { %493 = vmatpush.msra.mxu2 %v265_v12  ;;  %509 = vmatpush.msra.mxu3 %v266_v13  ;;  %v281_v35 = vperm.slane %v279_v34, 0  ;;  %v282_v36 = vperm.slane %v279_v34, 1 }
  0x2b   : > { %291 = vmatpush.msra.mxu0 %v265_v12  ;;  %314 = vmatpush.msra.mxu1 %v266_v13 }
  0x2c   : > { %494 = vmatpush.msra.mxu2 %v263_v14  ;;  %510 = vmatpush.msra.mxu3 %v264_v15 }
  0x2d   : > { %292 = vmatpush.msra.mxu0 %v263_v14  ;;  %315 = vmatpush.msra.mxu1 %v264_v15 }
  0x2e   : > { %495 = vmatpush.msra.mxu2 %v261_v16  ;;  %511 = vmatpush.msra.mxu3 %v262_v17 }
  0x2f   : > { %293 = vmatpush.msra.mxu0 %v261_v16  ;;  %316 = vmatpush.msra.mxu1 %v262_v17 }
  0x30   : > { %496 = vmatpush.msra.mxu2 %v259_v18  ;;  %512 = vmatpush.msra.mxu3 %v260_v19 }
  0x31   : > { %294 = vmatpush.msra.mxu0 %v259_v18  ;;  %317 = vmatpush.msra.mxu1 %v260_v19 }
  0x32   : > { %497 = vmatpush.msra.mxu2 %v257_v20  ;;  %513 = vmatpush.msra.mxu3 %v258_v21 }
  0x33   : > { %295 = vmatpush.msra.mxu0 %v257_v20  ;;  %318 = vmatpush.msra.mxu1 %v258_v21 }
  0x34   : > { %498 = vmatpush.msra.mxu2 %v255_v22  ;;  %514 = vmatpush.msra.mxu3 %v256_v23 }
  0x35   : > { %296 = vmatpush.msra.mxu0 %v255_v22  ;;  %319 = vmatpush.msra.mxu1 %v256_v23 }
  0x36   : > { %499 = vmatpush.msra.mxu2 %v253_v24  ;;  %515 = vmatpush.msra.mxu3 %v254_v25 }
  0x37   : > { %297 = vmatpush.msra.mxu0 %v253_v24  ;;  %320 = vmatpush.msra.mxu1 %v254_v25 }
  0x38   : > { %500 = vmatpush.msra.mxu2 %v251_v26  ;;  %516 = vmatpush.msra.mxu3 %v252_v27 }
  0x39   : > { %298 = vmatpush.msra.mxu0 %v251_v26  ;;  %321 = vmatpush.msra.mxu1 %v252_v27 }
  0x3a   : > { %501 = vmatpush.msra.mxu2 %v249_v28  ;;  %517 = vmatpush.msra.mxu3 %v250_v29 }
  0x3b   : > { %299 = vmatpush.msra.mxu0 %v249_v28  ;;  %322 = vmatpush.msra.mxu1 %v250_v29 }
  0x3c   : > { %502 = vmatpush.msra.mxu2 %v247_v30  ;;  %518 = vmatpush.msra.mxu3 %v248_v31 }
  0x3d   : > { %304 = vmatmul.f32.vlgmr.msra.gmra.mxu2 %v246_v32  ;;  %327 = vmatmul.f32.vlgmr.msra.gmra.mxu3 %v246_v32 }
  0x3e   : > { %300 = vmatpush.msra.mxu0 %v247_v30  ;;  %323 = vmatpush.msra.mxu1 %v248_v31 }
  0x3f   : > { %301 = vmatmul.f32.vlgmr.msra.gmra.mxu0 %v245_v33  ;;  %324 = vmatmul.f32.vlgmr.msra.gmra.mxu1 %v245_v33 }
  0xbc   : > { %v302_v37 = vpop.f32.mrf.mxu0  ;;  %v325_v38 = vpop.f32.mrf.mxu1 }
  0xbd   : > { %v303_v39 = vadd.f32 %v302_v37, %v281_v35  ;;  %v326_v40 = vadd.f32 %v325_v38, %v282_v36 }
  0xbf   : > { %331 = vst [vmem:[%s230_s6] sm:$0xff] %v303_v39 }
  0xc0   : > { %v305_v41 = vpop.f32.mrf.mxu2  ;;  %332 = vst [vmem:[%s230_s6 + $0x8] sm:$0xff] %v326_v40  ;;  %v328_v42 = vpop.f32.mrf.mxu3  ;;  %341 = sbr.rel (!%p732_p9) target bundleno = 205 (0xcd), region = 40 }
  0xc1   : > { %v306_v43 = vadd.f32 %v305_v41, %v281_v35  ;;  %v329_v44 = vadd.f32 %v328_v42, %v282_v36 }
  0xc3   : > { %333 = vst [vmem:[%s230_s6 + $0x10] sm:$0xff] %v306_v43 }
  0xc4   : > { %334 = vst [vmem:[%s230_s6 + $0x18] sm:$0xff] %v329_v44 }
  0xc6   : > { %v360_v45 = vld [vmem:[%s230_s6] sm:$0xff] }
  0xc7   : > { %v362_v46 = vld [vmem:[%s230_s6 + $0x8] sm:$0xff]  ;;  %361 = vst [vmem:[%s347_s10] sm:$0xff] %v360_v45 }
  0xc8   : > { %363 = vst [vmem:[%s347_s10 + $0x8] sm:$0xff] %v362_v46 }
  0xca   : > { %v364_v47 = vld [vmem:[%s230_s6 + $0x10] sm:$0xff] }
  0xcb   : > { %v366_v48 = vld [vmem:[%s230_s6 + $0x18] sm:$0xff]  ;;  %365 = vst [vmem:[%s347_s10 + $0x20] sm:$0xff] %v364_v47 }
  0xcc   : > { %367 = vst [vmem:[%s347_s10 + $0x28] sm:$0xff] %v366_v48 }
  0xcd PF: > { %s16_s17 = sadd.s32 1, %s657_s17   ;;  %s831_s12 = smov %s641_s13 }
  0xce   : > { %p13_p2 = scmp.ge.s32.totalorder %s16_s17, 4   ;;  %s832_s13 = smov %s645_s14 }
  0xcf   : > { %s833_s14 = smov %s730_s24  ;;  %s834_s15 = smov %s653_s16 }
  0xd0   : > { %s835_s16 = smov %s837_s19  ;;  %15 = sbr.rel (!%p13_p2) target bundleno = 4 (0x4), region = 101 }
  0xd5   :  { %383 = vsyncpa [#allocation3], 1 }
  0xd6   :  { %385 = vsyncpa [#allocation3 + $0x1], 1 }

// kernel: lstm_protein_generator_forward.6
= control target key start
LH: loop header
LB: loop body
LE: loop exit
PB: predicated region body
PF: predicated region fallthrough
CT: control target
= control target key end

     0   :  { %7 = vsyncpa [#allocation5], 0  ;;  %s2079_s12 = smov [#allocation4]   ;;  %s2080_s14 = smov 512   ;;  %s3169_s0 = inlined_call_operand.vmem [shape: f32[8,2,512], index: 0, kind: input, shape index: {}]   ;;  %s3170_s1 = inlined_call_operand.hbm [shape: f32[128,512], index: 1, kind: input, shape index: {}]   ;;  %s3171_s2 = inlined_call_operand.vmem [shape: f32[8,2,128], index: 2, kind: output, shape index: {}]  }
   0x1   :  { %s14_s11 = sshll.u32 %s3170_s1, 4  ;;  %s16_s13 = sshll.u32 %s2079_s12, 4  ;;  %s15_s11 = int_to_ptr.hbm [resolvable:$true] %s14_s11  ;;  %s17_s13 = int_to_ptr.vmem [resolvable:$true] %s16_s13 }
   0x2   :  { %s2081_s15 = smov 32  }
   0x3   :  { %22 = dma.hbm_to_vmem [thread:$0]  %s15_s11, 8192, %s17_s13, [#allocation5], %s2080_s14, %s2080_s14, %s2081_s15  }
   0x4   :  { %2077 = dma.done.wait [#allocation5], 8192  }
   0x5   :  { %2078 = vsyncadd [#allocation5], 4294959104  ;;  %v2082_v0 = vmov 0.0   ;;  %v2101_v1 = vld [vmem:[#allocation4 + $0x1f0] sm:$0xff]  ;;  %v2103_v2 = vld [vmem:[#allocation4 + $0x1f8] sm:$0xff]  ;;  %vm187_vm0 = vcmask 1041408  }
   0x6   :  { %31 = vst [vmem:[#allocation2] sm:$0x3] %v2082_v0  ;;  %v2105_v3 = vld [vmem:[#allocation4 + $0x1d0] sm:$0xff]  ;;  %140 = vmatpush.msra.mxu2 %v2101_v1  ;;  %160 = vmatpush.msra.mxu3 %v2103_v2  ;;  %v2109_v4 = vld [vmem:[#allocation4 + $0x1d8] sm:$0xff]  ;;  %v2115_v7 = vld [vmem:[#allocation4 + $0x1e8] sm:$0xff]  ;;  %vm189_vm1 = vcmask 1045508  }
   0x7   :  { %32 = vst [vmem:[#allocation3] sm:$0x3] %v2082_v0  ;;  %v2111_v5 = vld [vmem:[#allocation4 + $0x1b0] sm:$0xff]  ;;  %v2113_v6 = vld [vmem:[#allocation4 + $0x1b8] sm:$0xff]  ;;  %v2119_v8 = vld [vmem:[#allocation4 + $0x1e0] sm:$0xff]  ;;  %120 = vmatpush.msra.mxu1 %v2115_v7  ;;  %vm191_vm2 = vcmask 1043456  }
   0x8   :  { %141 = vmatpush.msra.mxu2 %v2105_v3  ;;  %161 = vmatpush.msra.mxu3 %v2109_v4  ;;  %v2121_v9 = vld [vmem:[#allocation4 + $0x1c8] sm:$0xff]  ;;  %v2124_v10 = vld [vmem:[#allocation4 + $0x190] sm:$0xff]  ;;  %v2126_v11 = vld [vmem:[#allocation4 + $0x198] sm:$0xff] }
   0x9   :  { %100 = vmatpush.msra.mxu0 %v2119_v8  ;;  %v2129_v12 = vld [vmem:[#allocation4 + $0x1c0] sm:$0xff]  ;;  %v2133_v13 = vld [vmem:[#allocation4 + $0x1a8] sm:$0xff]  ;;  %121 = vmatpush.msra.mxu1 %v2121_v9  ;;  %v2138_v15 = vld [vmem:[#allocation4 + $0x170] sm:$0xff] }
   0xa   :  { %142 = vmatpush.msra.mxu2 %v2111_v5  ;;  %162 = vmatpush.msra.mxu3 %v2113_v6  ;;  %v2135_v14 = vld [vmem:[#allocation4 + $0x1a0] sm:$0xff]  ;;  %v2140_v16 = vld [vmem:[#allocation4 + $0x178] sm:$0xff]  ;;  %v2145_v17 = vld [vmem:[#allocation4 + $0x188] sm:$0xff] }
   0xb   :  { %101 = vmatpush.msra.mxu0 %v2129_v12  ;;  %v2147_v18 = vld [vmem:[#allocation4 + $0x180] sm:$0xff]  ;;  %122 = vmatpush.msra.mxu1 %v2133_v13  ;;  %v2150_v19 = vld [vmem:[#allocation4 + $0x150] sm:$0xff]  ;;  %v2152_v20 = vld [vmem:[#allocation4 + $0x158] sm:$0xff] }
   0xc   :  { %143 = vmatpush.msra.mxu2 %v2124_v10  ;;  %163 = vmatpush.msra.mxu3 %v2126_v11  ;;  %v2157_v21 = vld [vmem:[#allocation4 + $0x168] sm:$0xff]  ;;  %v2159_v22 = vld [vmem:[#allocation4 + $0x160] sm:$0xff]  ;;  %v2162_v23 = vld [vmem:[#allocation4 + $0x130] sm:$0xff] }
   0xd   :  { %102 = vmatpush.msra.mxu0 %v2135_v14  ;;  %123 = vmatpush.msra.mxu1 %v2145_v17  ;;  %v2164_v24 = vld [vmem:[#allocation4 + $0x138] sm:$0xff]  ;;  %v2169_v25 = vld [vmem:[#allocation4 + $0x148] sm:$0xff]  ;;  %v2171_v26 = vld [vmem:[#allocation4 + $0x140] sm:$0xff] }
   0xe   :  { %144 = vmatpush.msra.mxu2 %v2138_v15  ;;  %164 = vmatpush.msra.mxu3 %v2140_v16  ;;  %v2174_v27 = vld [vmem:[#allocation4 + $0x110] sm:$0xff]  ;;  %v2176_v28 = vld [vmem:[#allocation4 + $0x118] sm:$0xff]  ;;  %v2181_v29 = vld [vmem:[#allocation4 + $0x128] sm:$0xff] }
   0xf   :  { %103 = vmatpush.msra.mxu0 %v2147_v18  ;;  %124 = vmatpush.msra.mxu1 %v2157_v21  ;;  %v2183_v30 = vld [vmem:[#allocation4 + $0x120] sm:$0xff]  ;;  %v2186_v31 = vld [vmem:[#allocation4 + $0xf0] sm:$0xff]  ;;  %v2188_v32 = vld [vmem:[#allocation4 + $0xf8] sm:$0xff] }
  0x10   :  { %145 = vmatpush.msra.mxu2 %v2150_v19  ;;  %165 = vmatpush.msra.mxu3 %v2152_v20  ;;  %v2193_v33 = vld [vmem:[#allocation4 + $0x108] sm:$0xff]  ;;  %v2195_v34 = vld [vmem:[#allocation4 + $0x100] sm:$0xff]  ;;  %v2198_v35 = vld [vmem:[#allocation4 + $0xd0] sm:$0xff] }
  0x11   :  { %104 = vmatpush.msra.mxu0 %v2159_v22  ;;  %125 = vmatpush.msra.mxu1 %v2169_v25  ;;  %v2200_v36 = vld [vmem:[#allocation4 + $0xd8] sm:$0xff]  ;;  %v2205_v37 = vld [vmem:[#allocation4 + $0xe8] sm:$0xff]  ;;  %v2207_v38 = vld [vmem:[#allocation4 + $0xe0] sm:$0xff] }
  0x12   :  { %146 = vmatpush.msra.mxu2 %v2162_v23  ;;  %166 = vmatpush.msra.mxu3 %v2164_v24  ;;  %v2210_v39 = vld [vmem:[#allocation4 + $0xb0] sm:$0xff]  ;;  %v2212_v40 = vld [vmem:[#allocation4 + $0xb8] sm:$0xff]  ;;  %v2217_v41 = vld [vmem:[#allocation4 + $0xc8] sm:$0xff] }
  0x13   :  { %105 = vmatpush.msra.mxu0 %v2171_v26  ;;  %126 = vmatpush.msra.mxu1 %v2181_v29  ;;  %v2219_v42 = vld [vmem:[#allocation4 + $0xc0] sm:$0xff]  ;;  %v2222_v43 = vld [vmem:[#allocation4 + $0x90] sm:$0xff]  ;;  %v2224_v44 = vld [vmem:[#allocation4 + $0x98] sm:$0xff] }
  0x14   :  { %147 = vmatpush.msra.mxu2 %v2174_v27  ;;  %167 = vmatpush.msra.mxu3 %v2176_v28  ;;  %v2229_v45 = vld [vmem:[#allocation4 + $0xa8] sm:$0xff]  ;;  %v2231_v46 = vld [vmem:[#allocation4 + $0xa0] sm:$0xff]  ;;  %v2234_v47 = vld [vmem:[#allocation4 + $0x70] sm:$0xff] }
  0x15   :  { %106 = vmatpush.msra.mxu0 %v2183_v30  ;;  %127 = vmatpush.msra.mxu1 %v2193_v33  ;;  %v2236_v48 = vld [vmem:[#allocation4 + $0x78] sm:$0xff]  ;;  %v2241_v49 = vld [vmem:[#allocation4 + $0x88] sm:$0xff]  ;;  %v2243_v50 = vld [vmem:[#allocation4 + $0x80] sm:$0xff] }
  0x16   :  { %148 = vmatpush.msra.mxu2 %v2186_v31  ;;  %168 = vmatpush.msra.mxu3 %v2188_v32  ;;  %v2246_v51 = vld [vmem:[#allocation4 + $0x50] sm:$0xff]  ;;  %v2248_v52 = vld [vmem:[#allocation4 + $0x58] sm:$0xff]  ;;  %v2253_v53 = vld [vmem:[#allocation4 + $0x68] sm:$0xff] }
  0x17   :  { %107 = vmatpush.msra.mxu0 %v2195_v34  ;;  %128 = vmatpush.msra.mxu1 %v2205_v37  ;;  %v2255_v54 = vld [vmem:[#allocation4 + $0x60] sm:$0xff]  ;;  %v2258_v55 = vld [vmem:[#allocation4 + $0x30] sm:$0xff]  ;;  %v2260_v56 = vld [vmem:[#allocation4 + $0x38] sm:$0xff] }
  0x18   :  { %149 = vmatpush.msra.mxu2 %v2198_v35  ;;  %169 = vmatpush.msra.mxu3 %v2200_v36  ;;  %3207 = vst [vmem:[#allocation7_spill] sm:$0xff] %v2258_v55  ;;  %v2265_v57 = vld [vmem:[#allocation4 + $0x48] sm:$0xff]  ;;  %v2267_v58 = vld [vmem:[#allocation4 + $0x40] sm:$0xff]  ;;  %v2270_v59 = vld [vmem:[#allocation4 + $0x10] sm:$0xff] }
  0x19   :  { %108 = vmatpush.msra.mxu0 %v2207_v38  ;;  %129 = vmatpush.msra.mxu1 %v2217_v41  ;;  %v2272_v60 = vld [vmem:[#allocation4 + $0x18] sm:$0xff]  ;;  %v2279_v62 = vld [vmem:[#allocation4 + $0x28] sm:$0xff]  ;;  %v2281_v63 = vld [vmem:[#allocation4 + $0x20] sm:$0xff] }
  0x1a   :  { %150 = vmatpush.msra.mxu2 %v2210_v39  ;;  %170 = vmatpush.msra.mxu3 %v2212_v40  ;;  %v33_v61 = vld [vmem:[#allocation2] sm:$0x3]  ;;  %v2285_v0 = vld [vmem:[#allocation4 + $0x8] sm:$0xff] }
  0x1b   :  { %109 = vmatpush.msra.mxu0 %v2219_v42  ;;  %130 = vmatpush.msra.mxu1 %v2229_v45 }
  0x1c   :  { %151 = vmatpush.msra.mxu2 %v2222_v43  ;;  %171 = vmatpush.msra.mxu3 %v2224_v44 }
  0x1d   :  { %110 = vmatpush.msra.mxu0 %v2231_v46  ;;  %131 = vmatpush.msra.mxu1 %v2241_v49 }
  0x1e   :  { %152 = vmatpush.msra.mxu2 %v2234_v47  ;;  %172 = vmatpush.msra.mxu3 %v2236_v48 }
  0x1f   :  { %111 = vmatpush.msra.mxu0 %v2243_v50  ;;  %132 = vmatpush.msra.mxu1 %v2253_v53 }
  0x20   :  { %153 = vmatpush.msra.mxu2 %v2246_v51  ;;  %173 = vmatpush.msra.mxu3 %v2248_v52 }
  0x21   :  { %112 = vmatpush.msra.mxu0 %v2255_v54  ;;  %133 = vmatpush.msra.mxu1 %v2265_v57 }
  0x22   :  { %154 = vmatpush.msra.mxu2 %v2258_v55  ;;  %174 = vmatpush.msra.mxu3 %v2260_v56  ;;  %v2287_v55 = vld [vmem:[#allocation4] sm:$0xff] }
  0x23   :  { %113 = vmatpush.msra.mxu0 %v2267_v58  ;;  %134 = vmatpush.msra.mxu1 %v2279_v62 }
  0x24   :  { %155 = vmatpush.msra.mxu2 %v2270_v59  ;;  %175 = vmatpush.msra.mxu3 %v2272_v60 }
  0x25   :  { %156 = vmatmul.f32.vlgmr.msra.gmra.mxu2 %v33_v61  ;;  %176 = vmatmul.f32.vlgmr.msra.gmra.mxu3 %v33_v61 }
  0x26   :  { %114 = vmatpush.msra.mxu0 %v2281_v63  ;;  %372 = vmatpush.msrb.mxu2 %v2101_v1 }
  0x27   :  { %392 = vmatpush.msrb.mxu3 %v2103_v2  ;;  %135 = vmatpush.msra.mxu1 %v2285_v0 }
  0x28   :  { %115 = vmatpush.msra.mxu0 %v2287_v55  ;;  %136 = vmatmul.f32.vlgmr.msra.gmra.mxu1 %v33_v61 }
  0x29   :  { %116 = vmatmul.f32.vlgmr.msra.gmra.mxu0 %v33_v61  ;;  %352 = vmatpush.msrb.mxu1 %v2115_v7  ;;  %v3208_v61 = vld [vmem:[#allocation7_spill] sm:$0xff] }
  0x2a   :  { %332 = vmatpush.msrb.mxu0 %v2119_v8  ;;  %373 = vmatpush.msrb.mxu2 %v2105_v3 }
  0x2b   :  { %393 = vmatpush.msrb.mxu3 %v2109_v4  ;;  %353 = vmatpush.msrb.mxu1 %v2121_v9 }
  0x2c   :  { %333 = vmatpush.msrb.mxu0 %v2129_v12  ;;  %374 = vmatpush.msrb.mxu2 %v2111_v5 }
  0x2d   :  { %394 = vmatpush.msrb.mxu3 %v2113_v6  ;;  %354 = vmatpush.msrb.mxu1 %v2133_v13 }
  0x2e   :  { %334 = vmatpush.msrb.mxu0 %v2135_v14  ;;  %375 = vmatpush.msrb.mxu2 %v2124_v10 }
  0x2f   :  { %395 = vmatpush.msrb.mxu3 %v2126_v11  ;;  %355 = vmatpush.msrb.mxu1 %v2145_v17 }
  0x30   :  { %335 = vmatpush.msrb.mxu0 %v2147_v18  ;;  %376 = vmatpush.msrb.mxu2 %v2138_v15 }
  0x31   :  { %396 = vmatpush.msrb.mxu3 %v2140_v16  ;;  %356 = vmatpush.msrb.mxu1 %v2157_v21 }
  0x32   :  { %336 = vmatpush.msrb.mxu0 %v2159_v22  ;;  %377 = vmatpush.msrb.mxu2 %v2150_v19 }
  0x33   :  { %397 = vmatpush.msrb.mxu3 %v2152_v20  ;;  %357 = vmatpush.msrb.mxu1 %v2169_v25 }
  0x34   :  { %337 = vmatpush.msrb.mxu0 %v2171_v26  ;;  %378 = vmatpush.msrb.mxu2 %v2162_v23 }
  0x35   :  { %398 = vmatpush.msrb.mxu3 %v2164_v24  ;;  %358 = vmatpush.msrb.mxu1 %v2181_v29 }
  0x36   :  { %338 = vmatpush.msrb.mxu0 %v2183_v30  ;;  %379 = vmatpush.msrb.mxu2 %v2174_v27 }
  0x37   :  { %399 = vmatpush.msrb.mxu3 %v2176_v28  ;;  %359 = vmatpush.msrb.mxu1 %v2193_v33 }
  0x38   :  { %339 = vmatpush.msrb.mxu0 %v2195_v34  ;;  %380 = vmatpush.msrb.mxu2 %v2186_v31 }
  0x39   :  { %400 = vmatpush.msrb.mxu3 %v2188_v32  ;;  %360 = vmatpush.msrb.mxu1 %v2205_v37 }
  0x3a   :  { %340 = vmatpush.msrb.mxu0 %v2207_v38  ;;  %381 = vmatpush.msrb.mxu2 %v2198_v35 }
  0x3b   :  { %401 = vmatpush.msrb.mxu3 %v2200_v36  ;;  %361 = vmatpush.msrb.mxu1 %v2217_v41 }
  0x3c   :  { %341 = vmatpush.msrb.mxu0 %v2219_v42  ;;  %382 = vmatpush.msrb.mxu2 %v2210_v39 }
  0x3d   :  { %402 = vmatpush.msrb.mxu3 %v2212_v40  ;;  %362 = vmatpush.msrb.mxu1 %v2229_v45 }
  0x3e   :  { %342 = vmatpush.msrb.mxu0 %v2231_v46  ;;  %383 = vmatpush.msrb.mxu2 %v2222_v43 }
  0x3f   :  { %403 = vmatpush.msrb.mxu3 %v2224_v44  ;;  %363 = vmatpush.msrb.mxu1 %v2241_v49 }
  0x40   :  { %343 = vmatpush.msrb.mxu0 %v2243_v50  ;;  %384 = vmatpush.msrb.mxu2 %v2234_v47 }
  0x41   :  { %404 = vmatpush.msrb.mxu3 %v2236_v48  ;;  %364 = vmatpush.msrb.mxu1 %v2253_v53 }
  0x42   :  { %344 = vmatpush.msrb.mxu0 %v2255_v54  ;;  %385 = vmatpush.msrb.mxu2 %v2246_v51 }
  0x43   :  { %405 = vmatpush.msrb.mxu3 %v2248_v52  ;;  %365 = vmatpush.msrb.mxu1 %v2265_v57 }
  0x44   :  { %345 = vmatpush.msrb.mxu0 %v2267_v58  ;;  %386 = vmatpush.msrb.mxu2 %v3208_v61 }
  0x45   :  { %406 = vmatpush.msrb.mxu3 %v2260_v56  ;;  %366 = vmatpush.msrb.mxu1 %v2279_v62 }
  0x46   :  { %346 = vmatpush.msrb.mxu0 %v2281_v63  ;;  %387 = vmatpush.msrb.mxu2 %v2270_v59 }
  0x47   :  { %407 = vmatpush.msrb.mxu3 %v2272_v60  ;;  %367 = vmatpush.msrb.mxu1 %v2285_v0 }
  0x48   :  { %347 = vmatpush.msrb.mxu0 %v2287_v55  ;;  %602 = vmatpush.msra.mxu2 %v2101_v1 }
  0x49   :  { %582 = vmatpush.msra.mxu1 %v2115_v7  ;;  %622 = vmatpush.msra.mxu3 %v2103_v2 }
  0x4a   :  { %562 = vmatpush.msra.mxu0 %v2119_v8  ;;  %603 = vmatpush.msra.mxu2 %v2105_v3 }
  0x4b   :  { %583 = vmatpush.msra.mxu1 %v2121_v9  ;;  %623 = vmatpush.msra.mxu3 %v2109_v4  ;;  %v35_v9 = vld [vmem:[%s3169_s0] sm:$0xff] }
  0x4c   :  { %563 = vmatpush.msra.mxu0 %v2129_v12  ;;  %604 = vmatpush.msra.mxu2 %v2111_v5 }
  0x4d   :  { %584 = vmatpush.msra.mxu1 %v2133_v13  ;;  %624 = vmatpush.msra.mxu3 %v2113_v6 }
  0x4e   :  { %564 = vmatpush.msra.mxu0 %v2135_v14  ;;  %605 = vmatpush.msra.mxu2 %v2124_v10 }
  0x4f   :  { %585 = vmatpush.msra.mxu1 %v2145_v17  ;;  %625 = vmatpush.msra.mxu3 %v2126_v11 }
  0x50   :  { %565 = vmatpush.msra.mxu0 %v2147_v18  ;;  %606 = vmatpush.msra.mxu2 %v2138_v15 }
  0x51   :  { %586 = vmatpush.msra.mxu1 %v2157_v21  ;;  %626 = vmatpush.msra.mxu3 %v2140_v16 }
  0x52   :  { %566 = vmatpush.msra.mxu0 %v2159_v22  ;;  %607 = vmatpush.msra.mxu2 %v2150_v19 }
  0x53   :  { %587 = vmatpush.msra.mxu1 %v2169_v25  ;;  %627 = vmatpush.msra.mxu3 %v2152_v20 }
  0x54   :  { %567 = vmatpush.msra.mxu0 %v2171_v26  ;;  %608 = vmatpush.msra.mxu2 %v2162_v23 }
  0x55   :  { %588 = vmatpush.msra.mxu1 %v2181_v29  ;;  %628 = vmatpush.msra.mxu3 %v2164_v24 }
  0x56   :  { %568 = vmatpush.msra.mxu0 %v2183_v30  ;;  %609 = vmatpush.msra.mxu2 %v2174_v27 }
  0x57   :  { %589 = vmatpush.msra.mxu1 %v2193_v33  ;;  %629 = vmatpush.msra.mxu3 %v2176_v28 }
  0x58   :  { %569 = vmatpush.msra.mxu0 %v2195_v34  ;;  %610 = vmatpush.msra.mxu2 %v2186_v31 }
  0x59   :  { %590 = vmatpush.msra.mxu1 %v2205_v37  ;;  %630 = vmatpush.msra.mxu3 %v2188_v32 }
  0x5a   :  { %570 = vmatpush.msra.mxu0 %v2207_v38  ;;  %611 = vmatpush.msra.mxu2 %v2198_v35 }
  0x5b   :  { %591 = vmatpush.msra.mxu1 %v2217_v41  ;;  %631 = vmatpush.msra.mxu3 %v2200_v36 }
  0x5c   :  { %571 = vmatpush.msra.mxu0 %v2219_v42  ;;  %612 = vmatpush.msra.mxu2 %v2210_v39 }
  0x5d   :  { %592 = vmatpush.msra.mxu1 %v2229_v45  ;;  %632 = vmatpush.msra.mxu3 %v2212_v40  ;;  %v34_v45 = vld [vmem:[#allocation3] sm:$0x3] }
  0x5e   :  { %572 = vmatpush.msra.mxu0 %v2231_v46  ;;  %613 = vmatpush.msra.mxu2 %v2222_v43 }
  0x5f   :  { %593 = vmatpush.msra.mxu1 %v2241_v49  ;;  %633 = vmatpush.msra.mxu3 %v2224_v44 }
  0x60   :  { %573 = vmatpush.msra.mxu0 %v2243_v50  ;;  %614 = vmatpush.msra.mxu2 %v2234_v47 }
  0x61   :  { %594 = vmatpush.msra.mxu1 %v2253_v53  ;;  %634 = vmatpush.msra.mxu3 %v2236_v48 }
  0x62   :  { %574 = vmatpush.msra.mxu0 %v2255_v54  ;;  %615 = vmatpush.msra.mxu2 %v2246_v51 }
  0x63   :  { %595 = vmatpush.msra.mxu1 %v2265_v57  ;;  %635 = vmatpush.msra.mxu3 %v2248_v52 }
  0x64   :  { %575 = vmatpush.msra.mxu0 %v2267_v58  ;;  %616 = vmatpush.msra.mxu2 %v3208_v61 }
  0x65   :  { %596 = vmatpush.msra.mxu1 %v2279_v62  ;;  %636 = vmatpush.msra.mxu3 %v2260_v56 }
  0x66   :  { %576 = vmatpush.msra.mxu0 %v2281_v63  ;;  %617 = vmatpush.msra.mxu2 %v2270_v59 }
  0x67   :  { %597 = vmatpush.msra.mxu1 %v2285_v0  ;;  %637 = vmatpush.msra.mxu3 %v2272_v60 }
  0x68   :  { %577 = vmatpush.msra.mxu0 %v2287_v55 }
  0xa5   :  { %v137_v1 = vpop.f32.mrf.mxu1 }
  0xa6   :  { %v117_v2 = vpop.f32.mrf.mxu0  ;;  %v184_v3 = vrot.slane %v137_v1, 6 }
  0xa8   :  { %v157_v4 = vpop.f32.mrf.mxu2  ;;  %v177_v5 = vpop.f32.mrf.mxu3  ;;  %v188_v8 = vsel %vm187_vm0, %v117_v2, %v184_v3 }
  0xa9   :  { %v185_v6 = vrot.slane %v157_v4, 4  ;;  %v186_v7 = vrot.slane %v177_v5, 2  ;;  %v1886_v5 = vld [vmem:[%s3169_s0 + $0x8] sm:$0xff] }
  0xab   :  { %v190_v10 = vsel %vm189_vm1, %v185_v6, %v186_v7 }
  0xac   :  { %v192_v11 = vsel %vm191_vm2, %v188_v8, %v190_v10 }
  0xad   :  { %v194_v12 = vadd.f32 %v192_v11, %v35_v9 }
  0xaf   :  { %v1883_v13 = vmul.f32 -1.442695, %v194_v12  ;;  %v215_v14 = vrot.slane %v194_v12, 2  ;;  %v239_v15 = vrot.slane %v194_v12, 6  ;;  %v236_v28 = vrot.slane %v194_v12, 4 }
  0xb1   :  { %1925 = vpow2.f32 %v1883_v13  ;;  %v1884_v16 = vmul.f32 -1.442695, %v215_v14  ;;  %v1885_v17 = vmul.f32 -1.442695, %v239_v15 }
  0xb3   :  { %1927 = vpow2.f32 %v1884_v16 }
  0xb4   :  { %1929 = vpow2.f32 %v1885_v17 }
  0xb7   :  { %v1926_v18 = vpop.eup %1925 }
  0xb8   :  { %v198_v19 = vadd.f32 1.0, %v1926_v18 }
  0xb9   :  { %v1928_v20 = vpop.eup %1927 }
  0xba   :  { %v1930_v21 = vpop.eup %1929  ;;  %1931 = vrcp.f32 %v198_v19  ;;  %v220_v22 = vadd.f32 1.0, %v1928_v20  ;;  %v210_v32 = vand.u32 2147483648, %v198_v19  ;;  %v208_v34 = vand.u32 2147483647, %v198_v19 }
  0xbb   :  { %v244_v23 = vadd.f32 1.0, %v1930_v21  ;;  %vm204_vm4 = vweird.f32 %v198_v19 }
  0xbc   :  { %1933 = vrcp.f32 %v220_v22  ;;  %v232_v37 = vand.u32 2147483648, %v220_v22  ;;  %v230_v39 = vand.u32 2147483647, %v220_v22  ;;  %v211_v41 = vor.u32 1.1754944e-38, %v210_v32 }
  0xbd   :  { %1935 = vrcp.f32 %v244_v23  ;;  %vm209_vm7 = vcmp.eq.f32.partialorder %v208_v34, 8.507059e+37  ;;  %vm226_vm8 = vweird.f32 %v220_v22  ;;  %v256_v55 = vand.u32 2147483648, %v244_v23 }
  0xbe   :  { %1937 = vtanh.f32 %v236_v28  ;;  %v233_v46 = vor.u32 1.1754944e-38, %v232_v37  ;;  %vm231_vm10 = vcmp.eq.f32.partialorder %v230_v39, 8.507059e+37  ;;  %vm250_vm12 = vweird.f32 %v244_v23 }
  0xbf   :  { %v254_v56 = vand.u32 2147483647, %v244_v23  ;;  %v257_v58 = vor.u32 1.1754944e-38, %v256_v55 }
  0xc0   :  { %v1932_v24 = vpop.eup %1931 }
  0xc1   :  { %v200_v25 = vmul.f32 %v1932_v24, %v198_v19  ;;  %vm205_vm3 = vweird.f32 %v1932_v24  ;;  %vm255_vm14 = vcmp.eq.f32.partialorder %v254_v56, 8.507059e+37 }
  0xc2   :  { %v1934_v26 = vpop.eup %1933  ;;  %vm206_vm5 = vmor %vm204_vm4, %vm205_vm3 }
  0xc3   :  { %v201_v27 = vsub.f32 1.0, %v200_v25  ;;  %v1936_v29 = vpop.eup %1935  ;;  %v222_v30 = vmul.f32 %v1934_v26, %v220_v22  ;;  %vm227_vm6 = vweird.f32 %v1934_v26 }
  0xc4   :  { %v246_v33 = vmul.f32 %v1936_v29, %v244_v23  ;;  %vm228_vm9 = vmor %vm226_vm8, %vm227_vm6  ;;  %v1938_v48 = vpop.eup %1937  ;;  %vm251_vm11 = vweird.f32 %v1936_v29 }
  0xc5   :  { %v202_v31 = vmul.f32 %v1932_v24, %v201_v27  ;;  %v223_v35 = vsub.f32 1.0, %v222_v30  ;;  %vm252_vm13 = vmor %vm250_vm12, %vm251_vm11 }
  0xc6   :  { %v247_v42 = vsub.f32 1.0, %v246_v33 }
  0xc7   :  { %v203_v36 = vadd.f32 %v1932_v24, %v202_v31  ;;  %v224_v38 = vmul.f32 %v1934_v26, %v223_v35 }
  0xc8   :  { %v248_v50 = vmul.f32 %v1936_v29, %v247_v42 }
  0xc9   :  { %v207_v40 = vsel %vm206_vm5, %v1932_v24, %v203_v36  ;;  %v225_v43 = vadd.f32 %v1934_v26, %v224_v38 }
  0xca   :  { %v212_v44 = vsel %vm209_vm7, %v211_v41, %v207_v40  ;;  %v249_v54 = vadd.f32 %v1936_v29, %v248_v50 }
  0xcb   :  { %v229_v47 = vsel %vm228_vm9, %v1934_v26, %v225_v43  ;;  %v261_v51 = vmul.f32 %v1938_v48, %v212_v44 }
  0xcc   :  { %v234_v49 = vsel %vm231_vm10, %v233_v46, %v229_v47  ;;  %v253_v57 = vsel %vm252_vm13, %v1936_v29, %v249_v54 }
  0xcd   :  { %v260_v52 = vmul.f32 %v234_v49, %v34_v45  ;;  %v258_v60 = vsel %vm255_vm14, %v257_v58, %v253_v57 }
  0xcf   :  { %v2427_v53 = vadd.f32 %v261_v51, %v260_v52 }
  0xd1   :  { %1939 = vtanh.f32 %v2427_v53 }
  0xd7   :  { %v1940_v59 = vpop.eup %1939 }
  0xd8   :  { %v264_v62 = vmul.f32 %v1940_v59, %v258_v60  ;;  %v2448_v59 = vld [vmem:[#allocation4 + $0x1e8] sm:$0xff]  ;;  %v2450_v60 = vld [vmem:[#allocation4 + $0x1f0] sm:$0xff] }
  0xda   :  { %265 = vst [vmem:[%s3171_s2] sm:$0x3] %v264_v62  ;;  %348 = vmatmul.f32.vlgmr.msrb.gmra.mxu0 %v264_v62  ;;  %368 = vmatmul.f32.vlgmr.msrb.gmra.mxu1 %v264_v62 }
  0xdb   :  { %388 = vmatmul.f32.vlgmr.msrb.gmra.mxu2 %v264_v62  ;;  %408 = vmatmul.f32.vlgmr.msrb.gmra.mxu3 %v264_v62  ;;  %v2454_v62 = vld [vmem:[#allocation4 + $0x1f8] sm:$0xff] }
  0xdc   :  { %812 = vmatpush.msrb.mxu1 %v2448_v59  ;;  %3209 = vst [vmem:[#allocation7_spill] sm:$0xff] %v2454_v62  ;;  %832 = vmatpush.msrb.mxu2 %v2450_v60 }
  0xdd   :  { %852 = vmatpush.msrb.mxu3 %v2454_v62 }
 0x157   :  { %v369_v63 = vpop.f32.mrf.mxu1  ;;  %v349_v4 = vpop.f32.mrf.mxu0 }
 0x158   :  { %v416_v0 = vrot.slane %v369_v63, 6  ;;  %v2458_v63 = vld [vmem:[#allocation4 + $0x1c0] sm:$0xff] }
 0x159   :  { %3210 = vst [vmem:[#allocation8_spill] sm:$0xff] %v2458_v63 }
 0x15a   :  { %v419_v6 = vsel %vm187_vm0, %v349_v4, %v416_v0  ;;  %v2460_v0 = vld [vmem:[#allocation4 + $0x1c8] sm:$0xff]  ;;  %v2474_v4 = vld [vmem:[#allocation4 + $0x1b0] sm:$0xff] }
 0x15b   :  { %813 = vmatpush.msrb.mxu1 %v2460_v0  ;;  %3214 = vst [vmem:[#allocation12_spill] sm:$0xff] %v2474_v4 }
 0x15e   :  { %v389_v61 = vpop.f32.mrf.mxu2  ;;  %v409_v1 = vpop.f32.mrf.mxu3 }
 0x15f   :  { %v417_v2 = vrot.slane %v389_v61, 4  ;;  %v418_v3 = vrot.slane %v409_v1, 2  ;;  %v2462_v61 = vld [vmem:[#allocation4 + $0x1d0] sm:$0xff]  ;;  %v2466_v1 = vld [vmem:[#allocation4 + $0x1d8] sm:$0xff] }
 0x160   :  { %3211 = vst [vmem:[#allocation9_spill] sm:$0xff] %v2462_v61  ;;  %833 = vmatpush.msrb.mxu2 %v2462_v61  ;;  %853 = vmatpush.msrb.mxu3 %v2466_v1 }
 0x161   :  { %v420_v7 = vsel %vm189_vm1, %v417_v2, %v418_v3  ;;  %3212 = vst [vmem:[#allocation10_spill] sm:$0xff] %v2466_v1  ;;  %v2470_v2 = vld [vmem:[#allocation4 + $0x1a0] sm:$0xff]  ;;  %v2472_v3 = vld [vmem:[#allocation4 + $0x1a8] sm:$0xff] }
 0x162   :  { %v421_v8 = vsel %vm191_vm2, %v419_v6, %v420_v7  ;;  %3213 = vst [vmem:[#allocation11_spill] sm:$0xff] %v2470_v2  ;;  %814 = vmatpush.msrb.mxu1 %v2472_v3  ;;  %834 = vmatpush.msrb.mxu2 %v2474_v4  ;;  %v2482_v6 = vld [vmem:[#allocation4 + $0x180] sm:$0xff]  ;;  %v2484_v7 = vld [vmem:[#allocation4 + $0x188] sm:$0xff] }
 0x163   :  { %v423_v9 = vadd.f32 %v1886_v5, %v421_v8  ;;  %v2478_v5 = vld [vmem:[#allocation4 + $0x1b8] sm:$0xff]  ;;  %3216 = vst [vmem:[#allocation14_spill] sm:$0xff] %v2484_v7  ;;  %v2486_v8 = vld [vmem:[#allocation4 + $0x190] sm:$0xff] }
 0x164   :  { %3215 = vst [vmem:[#allocation13_spill] sm:$0xff] %v2478_v5  ;;  %854 = vmatpush.msrb.mxu3 %v2478_v5  ;;  %815 = vmatpush.msrb.mxu1 %v2484_v7 }
 0x165   :  { %v1887_v10 = vmul.f32 -1.442695, %v423_v9  ;;  %v444_v11 = vrot.slane %v423_v9, 2  ;;  %v468_v12 = vrot.slane %v423_v9, 6  ;;  %v465_v24 = vrot.slane %v423_v9, 4  ;;  %v2490_v9 = vld [vmem:[#allocation4 + $0x198] sm:$0xff]  ;;  %835 = vmatpush.msrb.mxu2 %v2486_v8 }
 0x166   :  { %3217 = vst [vmem:[#allocation15_spill] sm:$0xff] %v2490_v9  ;;  %855 = vmatpush.msrb.mxu3 %v2490_v9 }
 0x167   :  { %1941 = vpow2.f32 %v1887_v10  ;;  %v1888_v13 = vmul.f32 -1.442695, %v444_v11  ;;  %v1889_v14 = vmul.f32 -1.442695, %v468_v12  ;;  %v2494_v10 = vld [vmem:[#allocation4 + $0x160] sm:$0xff]  ;;  %v2496_v11 = vld [vmem:[#allocation4 + $0x168] sm:$0xff] }
 0x168   :  { %3218 = vst [vmem:[#allocation16_spill] sm:$0xff] %v2494_v10  ;;  %v2498_v12 = vld [vmem:[#allocation4 + $0x170] sm:$0xff]  ;;  %816 = vmatpush.msrb.mxu1 %v2496_v11 }
 0x169   :  { %1943 = vpow2.f32 %v1888_v13  ;;  %3219 = vst [vmem:[#allocation17_spill] sm:$0xff] %v2496_v11  ;;  %836 = vmatpush.msrb.mxu2 %v2498_v12 }
 0x16a   :  { %1945 = vpow2.f32 %v1889_v14  ;;  %v2502_v14 = vld [vmem:[#allocation4 + $0x178] sm:$0xff] }
 0x16b   :  { %856 = vmatpush.msrb.mxu3 %v2502_v14 }
 0x16d   :  { %v1942_v15 = vpop.eup %1941 }
 0x16e   :  { %v427_v16 = vadd.f32 1.0, %v1942_v15  ;;  %v2506_v15 = vld [vmem:[#allocation4 + $0x140] sm:$0xff] }
 0x16f   :  { %v1944_v17 = vpop.eup %1943 }
 0x170   :  { %v1946_v18 = vpop.eup %1945  ;;  %1947 = vrcp.f32 %v427_v16  ;;  %v449_v19 = vadd.f32 1.0, %v1944_v17  ;;  %v439_v28 = vand.u32 2147483648, %v427_v16  ;;  %v437_v32 = vand.u32 2147483647, %v427_v16  ;;  %v2510_v17 = vld [vmem:[#allocation4 + $0x150] sm:$0xff] }
 0x171   :  { %v473_v20 = vadd.f32 1.0, %v1946_v18  ;;  %vm433_vm3 = vweird.f32 %v427_v16  ;;  %v2514_v18 = vld [vmem:[#allocation4 + $0x158] sm:$0xff]  ;;  %837 = vmatpush.msrb.mxu2 %v2510_v17 }
 0x172   :  { %1949 = vrcp.f32 %v449_v19  ;;  %v461_v33 = vand.u32 2147483648, %v449_v19  ;;  %v459_v36 = vand.u32 2147483647, %v449_v19  ;;  %v440_v37 = vor.u32 1.1754944e-38, %v439_v28  ;;  %857 = vmatpush.msrb.mxu3 %v2514_v18  ;;  %v2532_v28 = vld [vmem:[#allocation4 + $0x110] sm:$0xff] }
 0x173   :  { %1951 = vrcp.f32 %v473_v20  ;;  %vm438_vm6 = vcmp.eq.f32.partialorder %v437_v32, 8.507059e+37  ;;  %vm455_vm7 = vweird.f32 %v449_v19  ;;  %v485_v51 = vand.u32 2147483648, %v473_v20  ;;  %v2538_v32 = vld [vmem:[#allocation4 + $0xe0] sm:$0xff] }
 0x174   :  { %1953 = vtanh.f32 %v465_v24  ;;  %v462_v42 = vor.u32 1.1754944e-38, %v461_v33  ;;  %vm460_vm9 = vcmp.eq.f32.partialorder %v459_v36, 8.507059e+37  ;;  %vm479_vm11 = vweird.f32 %v473_v20  ;;  %v2526_v24 = vld [vmem:[#allocation4 + $0x100] sm:$0xff]  ;;  %v2540_v33 = vld [vmem:[#allocation4 + $0xe8] sm:$0xff]  ;;  %v2547_v36 = vld [vmem:[#allocation4 + $0xf0] sm:$0xff] }
 0x175   :  { %v483_v52 = vand.u32 2147483647, %v473_v20  ;;  %v486_v55 = vor.u32 1.1754944e-38, %v485_v51 }
 0x176   :  { %v1948_v21 = vpop.eup %1947 }
 0x177   :  { %v429_v22 = vmul.f32 %v1948_v21, %v427_v16  ;;  %vm434_vm15 = vweird.f32 %v1948_v21  ;;  %vm484_vm13 = vcmp.eq.f32.partialorder %v483_v52, 8.507059e+37  ;;  %v2508_v16 = vld [vmem:[#allocation4 + $0x148] sm:$0xff] }
 0x178   :  { %v1950_v23 = vpop.eup %1949  ;;  %vm435_vm5 = vmor %vm433_vm3, %vm434_vm15  ;;  %3220 = vst [vmem:[#allocation18_spill] sm:$0xff] %v2508_v16  ;;  %817 = vmatpush.msrb.mxu1 %v2508_v16 }
 0x179   :  { %v1952_v25 = vpop.eup %1951  ;;  %v430_v26 = vsub.f32 1.0, %v429_v22  ;;  %v451_v27 = vmul.f32 %v1950_v23, %v449_v19  ;;  %vm456_vm4 = vweird.f32 %v1950_v23  ;;  %v2516_v19 = vld [vmem:[#allocation4 + $0x120] sm:$0xff]  ;;  %v2522_v22 = vld [vmem:[#allocation4 + $0x130] sm:$0xff] }
 0x17a   :  { %v475_v29 = vmul.f32 %v1952_v25, %v473_v20  ;;  %vm457_vm8 = vmor %vm455_vm7, %vm456_vm4  ;;  %v1954_v44 = vpop.eup %1953  ;;  %vm480_vm10 = vweird.f32 %v1952_v25  ;;  %v2518_v20 = vld [vmem:[#allocation4 + $0x128] sm:$0xff]  ;;  %838 = vmatpush.msrb.mxu2 %v2522_v22 }
 0x17b   :  { %v452_v30 = vsub.f32 1.0, %v451_v27  ;;  %v431_v31 = vmul.f32 %v1948_v21, %v430_v26  ;;  %vm481_vm12 = vmor %vm479_vm11, %vm480_vm10  ;;  %818 = vmatpush.msrb.mxu1 %v2518_v20  ;;  %v2530_v27 = vld [vmem:[#allocation4 + $0x108] sm:$0xff] }
 0x17c   :  { %v476_v38 = vsub.f32 1.0, %v475_v29  ;;  %v2534_v29 = vld [vmem:[#allocation4 + $0x118] sm:$0xff]  ;;  %839 = vmatpush.msrb.mxu2 %v2532_v28 }
 0x17d   :  { %v432_v34 = vadd.f32 %v1948_v21, %v431_v31  ;;  %v453_v35 = vmul.f32 %v1950_v23, %v452_v30  ;;  %819 = vmatpush.msrb.mxu1 %v2530_v27 }
 0x17e   :  { %v477_v46 = vmul.f32 %v1952_v25, %v476_v38  ;;  %840 = vmatpush.msrb.mxu2 %v2547_v36 }
 0x17f   :  { %v436_v39 = vsel %vm435_vm5, %v1948_v21, %v432_v34  ;;  %v454_v40 = vadd.f32 %v1950_v23, %v453_v35  ;;  %v1891_v35 = vld [vmem:[%s3169_s0 + $0x10] sm:$0xff]  ;;  %820 = vmatpush.msrb.mxu1 %v2540_v33 }
 0x180   :  { %v441_v41 = vsel %vm438_vm6, %v440_v37, %v436_v39  ;;  %v478_v50 = vadd.f32 %v1952_v25, %v477_v46  ;;  %v2549_v37 = vld [vmem:[#allocation4 + $0xf8] sm:$0xff]  ;;  %v2570_v46 = vld [vmem:[#allocation4 + $0xa0] sm:$0xff] }
 0x181   :  { %v458_v43 = vsel %vm457_vm8, %v1950_v23, %v454_v40  ;;  %v490_v48 = vmul.f32 %v1954_v44, %v441_v41  ;;  %v2524_v23 = vld [vmem:[#allocation4 + $0x138] sm:$0xff]  ;;  %v2555_v40 = vld [vmem:[#allocation4 + $0xc0] sm:$0xff]  ;;  %v2557_v41 = vld [vmem:[#allocation4 + $0xc8] sm:$0xff] }
 0x182   :  { %v463_v45 = vsel %vm460_vm9, %v462_v42, %v458_v43  ;;  %v482_v54 = vsel %vm481_vm12, %v1952_v25, %v478_v50  ;;  %858 = vmatpush.msrb.mxu3 %v2524_v23  ;;  %v2562_v43 = vld [vmem:[#allocation4 + $0xd0] sm:$0xff]  ;;  %v2564_v44 = vld [vmem:[#allocation4 + $0xd8] sm:$0xff]  ;;  %821 = vmatpush.msrb.mxu1 %v2557_v41 }
 0x183   :  { %v489_v47 = vmul.f32 %v463_v45, %v2427_v53  ;;  %v487_v57 = vsel %vm484_vm13, %v486_v55, %v482_v54  ;;  %v2446_v53 = vld [vmem:[#allocation4 + $0x1e0] sm:$0xff]  ;;  %v2578_v50 = vld [vmem:[#allocation4 + $0xb8] sm:$0xff]  ;;  %841 = vmatpush.msrb.mxu2 %v2562_v43 }
 0x184   :  { %792 = vmatpush.msrb.mxu0 %v2446_v53  ;;  %859 = vmatpush.msrb.mxu3 %v2534_v29  ;;  %v2585_v55 = vld [vmem:[#allocation4 + $0x80] sm:$0xff] }
 0x185   :  { %v2440_v49 = vadd.f32 %v490_v48, %v489_v47  ;;  %v2572_v47 = vld [vmem:[#allocation4 + $0xa8] sm:$0xff]  ;;  %v2576_v48 = vld [vmem:[#allocation4 + $0xb0] sm:$0xff] }
 0x186   :  { %793 = vmatpush.msrb.mxu0 %v2458_v63  ;;  %860 = vmatpush.msrb.mxu3 %v2549_v37 }
 0x187   :  { %1955 = vtanh.f32 %v2440_v49  ;;  %822 = vmatpush.msrb.mxu1 %v2572_v47  ;;  %842 = vmatpush.msrb.mxu2 %v2576_v48 }
 0x188   :  { %794 = vmatpush.msrb.mxu0 %v2470_v2  ;;  %861 = vmatpush.msrb.mxu3 %v2564_v44 }
 0x18a   :  { %795 = vmatpush.msrb.mxu0 %v2482_v6  ;;  %862 = vmatpush.msrb.mxu3 %v2578_v50 }
 0x18c   :  { %796 = vmatpush.msrb.mxu0 %v2494_v10 }
 0x18d   :  { %v1956_v56 = vpop.eup %1955 }
 0x18e   :  { %v493_v58 = vmul.f32 %v1956_v56, %v487_v57  ;;  %797 = vmatpush.msrb.mxu0 %v2506_v15  ;;  %v2587_v56 = vld [vmem:[#allocation4 + $0x88] sm:$0xff]  ;;  %v2591_v57 = vld [vmem:[#allocation4 + $0x90] sm:$0xff] }
 0x18f   :  { %823 = vmatpush.msrb.mxu1 %v2587_v56  ;;  %843 = vmatpush.msrb.mxu2 %v2591_v57 }
 0x190   :  { %1890 = vst [vmem:[%s3171_s2 + $0x2] sm:$0x3] %v493_v58  ;;  %578 = vmatmul.f32.vlgmr.msra.gmra.mxu0 %v493_v58  ;;  %598 = vmatmul.f32.vlgmr.msra.gmra.mxu1 %v493_v58 }
 0x191   :  { %618 = vmatmul.f32.vlgmr.msra.gmra.mxu2 %v493_v58  ;;  %638 = vmatmul.f32.vlgmr.msra.gmra.mxu3 %v493_v58  ;;  %v2593_v58 = vld [vmem:[#allocation4 + $0x98] sm:$0xff] }
 0x192   :  { %798 = vmatpush.msrb.mxu0 %v2516_v19  ;;  %863 = vmatpush.msrb.mxu3 %v2593_v58 }
 0x194   :  { %799 = vmatpush.msrb.mxu0 %v2526_v24 }
 0x196   :  { %800 = vmatpush.msrb.mxu0 %v2538_v32 }
 0x198   :  { %801 = vmatpush.msrb.mxu0 %v2555_v40 }
 0x19a   :  { %802 = vmatpush.msrb.mxu0 %v2570_v46 }
 0x19c   :  { %803 = vmatpush.msrb.mxu0 %v2585_v55 }
 0x20d   :  { %v599_v13 = vpop.f32.mrf.mxu1  ;;  %v579_v34 = vpop.f32.mrf.mxu0 }
 0x20e   :  { %v646_v21 = vrot.slane %v599_v13, 6 }
 0x210   :  { %v649_v38 = vsel %vm187_vm0, %v579_v34, %v646_v21  ;;  %v2609_v34 = vld [vmem:[#allocation4 + $0x40] sm:$0xff] }
 0x211   :  { %3224 = vst [vmem:[#allocation22_spill] sm:$0xff] %v2609_v34 }
 0x214   :  { %v619_v25 = vpop.f32.mrf.mxu2  ;;  %v639_v26 = vpop.f32.mrf.mxu3 }
 0x215   :  { %v647_v30 = vrot.slane %v619_v25, 4  ;;  %v648_v31 = vrot.slane %v639_v26, 2  ;;  %v2597_v25 = vld [vmem:[#allocation4 + $0x60] sm:$0xff]  ;;  %v2599_v26 = vld [vmem:[#allocation4 + $0x68] sm:$0xff] }
 0x216   :  { %3221 = vst [vmem:[#allocation19_spill] sm:$0xff] %v2599_v26  ;;  %804 = vmatpush.msrb.mxu0 %v2597_v25  ;;  %824 = vmatpush.msrb.mxu1 %v2599_v26 }
 0x217   :  { %v650_v39 = vsel %vm189_vm1, %v647_v30, %v648_v31  ;;  %v2603_v30 = vld [vmem:[#allocation4 + $0x70] sm:$0xff]  ;;  %v2605_v31 = vld [vmem:[#allocation4 + $0x78] sm:$0xff] }
 0x218   :  { %v651_v42 = vsel %vm191_vm2, %v649_v38, %v650_v39  ;;  %3222 = vst [vmem:[#allocation20_spill] sm:$0xff] %v2603_v30  ;;  %v2615_v38 = vld [vmem:[#allocation4 + $0x50] sm:$0xff]  ;;  %v2617_v39 = vld [vmem:[#allocation4 + $0x58] sm:$0xff]  ;;  %844 = vmatpush.msrb.mxu2 %v2603_v30  ;;  %864 = vmatpush.msrb.mxu3 %v2605_v31 }
 0x219   :  { %v2566_v45 = vadd.f32 %v1891_v35, %v651_v42  ;;  %3223 = vst [vmem:[#allocation21_spill] sm:$0xff] %v2605_v31  ;;  %v2611_v35 = vld [vmem:[#allocation4 + $0x48] sm:$0xff]  ;;  %v2621_v42 = vld [vmem:[#allocation4 + $0x20] sm:$0xff]  ;;  %805 = vmatpush.msrb.mxu0 %v2609_v34  ;;  %v2643_v34 = vld [vmem:[#allocation4 + $0x18] sm:$0xff] }
 0x21a   :  { %3225 = vst [vmem:[#allocation23_spill] sm:$0xff] %v2611_v35  ;;  %825 = vmatpush.msrb.mxu1 %v2611_v35  ;;  %845 = vmatpush.msrb.mxu2 %v2615_v38  ;;  %v2635_v31 = vld [vmem:[#allocation4 + $0x8] sm:$0xff]  ;;  %v2641_v35 = vld [vmem:[#allocation4 + $0x10] sm:$0xff] }
 0x21b   :  { %v1892_v51 = vmul.f32 -1.442695, %v2566_v45  ;;  %v674_v52 = vrot.slane %v2566_v45, 2  ;;  %v698_v54 = vrot.slane %v2566_v45, 6  ;;  %3226 = vst [vmem:[#allocation24_spill] sm:$0xff] %v2615_v38  ;;  %865 = vmatpush.msrb.mxu3 %v2617_v39  ;;  %806 = vmatpush.msrb.mxu0 %v2621_v42 }
 0x21c   :  { %3227 = vst [vmem:[#allocation25_spill] sm:$0xff] %v2617_v39 }
 0x21d   :  { %1957 = vpow2.f32 %v1892_v51  ;;  %v1893_v13 = vmul.f32 -1.442695, %v674_v52  ;;  %v1894_v21 = vmul.f32 -1.442695, %v698_v54  ;;  %v2623_v51 = vld [vmem:[#allocation4 + $0x28] sm:$0xff]  ;;  %v2627_v52 = vld [vmem:[#allocation4 + $0x30] sm:$0xff] }
 0x21e   :  { %v2629_v54 = vld [vmem:[#allocation4 + $0x38] sm:$0xff]  ;;  %826 = vmatpush.msrb.mxu1 %v2623_v51  ;;  %846 = vmatpush.msrb.mxu2 %v2627_v52 }
 0x21f   :  { %1959 = vpow2.f32 %v1893_v13  ;;  %866 = vmatpush.msrb.mxu3 %v2629_v54 }
 0x220   :  { %1961 = vpow2.f32 %v1894_v21  ;;  %v2633_v21 = vld [vmem:[#allocation4] sm:$0xff]  ;;  %827 = vmatpush.msrb.mxu1 %v2635_v31  ;;  %847 = vmatpush.msrb.mxu2 %v2641_v35 }
 0x221   :  { %807 = vmatpush.msrb.mxu0 %v2633_v21  ;;  %867 = vmatpush.msrb.mxu3 %v2643_v34 }
 0x222   :  { %1042 = vmatpush.msra.mxu1 %v2448_v59  ;;  %1062 = vmatpush.msra.mxu2 %v2450_v60 }
 0x223   :  { %v1958_v13 = vpop.eup %1957  ;;  %1022 = vmatpush.msra.mxu0 %v2446_v53  ;;  %1082 = vmatpush.msra.mxu3 %v2454_v62 }
 0x224   :  { %v2637_v30 = vadd.f32 1.0, %v1958_v13  ;;  %1043 = vmatpush.msra.mxu1 %v2460_v0  ;;  %1063 = vmatpush.msra.mxu2 %v2462_v61 }
 0x225   :  { %v1960_v26 = vpop.eup %1959  ;;  %1023 = vmatpush.msra.mxu0 %v2458_v63  ;;  %1083 = vmatpush.msra.mxu3 %v2466_v1  ;;  %v695_v63 = vrot.slane %v2566_v45, 4 }
 0x226   :  { %v1962_v39 = vpop.eup %1961  ;;  %1963 = vrcp.f32 %v2637_v30  ;;  %v2648_v38 = vadd.f32 1.0, %v1960_v26  ;;  %1044 = vmatpush.msra.mxu1 %v2472_v3  ;;  %1064 = vmatpush.msra.mxu2 %v2474_v4  ;;  %v669_v4 = vand.u32 2147483648, %v2637_v30  ;;  %vm663_vm15 = vweird.f32 %v2637_v30 }
 0x227   :  { %v2652_v13 = vadd.f32 1.0, %v1962_v39  ;;  %1024 = vmatpush.msra.mxu0 %v2470_v2  ;;  %1084 = vmatpush.msra.mxu3 %v2478_v5 }
 0x228   :  { %1965 = vrcp.f32 %v2648_v38  ;;  %1045 = vmatpush.msra.mxu1 %v2484_v7  ;;  %1065 = vmatpush.msra.mxu2 %v2486_v8  ;;  %vm685_vm6 = vweird.f32 %v2648_v38 }
 0x229   :  { %1967 = vrcp.f32 %v2652_v13  ;;  %1025 = vmatpush.msra.mxu0 %v2482_v6  ;;  %1085 = vmatpush.msra.mxu3 %v2490_v9  ;;  %v691_v9 = vand.u32 2147483648, %v2648_v38  ;;  %vm709_vm10 = vweird.f32 %v2652_v13 }
 0x22a   :  { %1046 = vmatpush.msra.mxu1 %v2496_v11  ;;  %1066 = vmatpush.msra.mxu2 %v2498_v12  ;;  %1969 = vtanh.f32 %v695_v63  ;;  %v670_v63 = vor.u32 1.1754944e-38, %v669_v4 }
 0x22b   :  { %1026 = vmatpush.msra.mxu0 %v2494_v10  ;;  %1086 = vmatpush.msra.mxu3 %v2502_v14 }
 0x22c   :  { %v1964_v26 = vpop.eup %1963  ;;  %1047 = vmatpush.msra.mxu1 %v2508_v16  ;;  %1067 = vmatpush.msra.mxu2 %v2510_v17 }
 0x22d   :  { %v659_v39 = vmul.f32 %v1964_v26, %v2637_v30  ;;  %vm664_vm14 = vweird.f32 %v1964_v26  ;;  %1027 = vmatpush.msra.mxu0 %v2506_v15  ;;  %1087 = vmatpush.msra.mxu3 %v2514_v18 }
 0x22e   :  { %v1966_v62 = vpop.eup %1965  ;;  %vm665_vm4 = vmor %vm663_vm15, %vm664_vm14  ;;  %1048 = vmatpush.msra.mxu1 %v2518_v20  ;;  %1068 = vmatpush.msra.mxu2 %v2522_v22 }
 0x22f   :  { %v2674_v61 = vpop.eup %1967  ;;  %v660_v1 = vsub.f32 1.0, %v659_v39  ;;  %v681_v2 = vmul.f32 %v1966_v62, %v2648_v38  ;;  %v667_v39 = vand.u32 2147483647, %v2637_v30  ;;  %vm686_vm3 = vweird.f32 %v1966_v62  ;;  %1028 = vmatpush.msra.mxu0 %v2516_v19  ;;  %1088 = vmatpush.msra.mxu3 %v2524_v23 }
 0x230   :  { %v705_v5 = vmul.f32 %v2674_v61, %v2652_v13  ;;  %vm687_vm7 = vmor %vm685_vm6, %vm686_vm3  ;;  %1049 = vmatpush.msra.mxu1 %v2530_v27  ;;  %1069 = vmatpush.msra.mxu2 %v2532_v28  ;;  %vm710_vm9 = vweird.f32 %v2674_v61 }
 0x231   :  { %v682_v45 = vsub.f32 1.0, %v681_v2  ;;  %v661_v7 = vmul.f32 %v1964_v26, %v660_v1  ;;  %v689_v1 = vand.u32 2147483647, %v2648_v38  ;;  %vm668_vm5 = vcmp.eq.f32.partialorder %v667_v39, 8.507059e+37  ;;  %1029 = vmatpush.msra.mxu0 %v2526_v24  ;;  %1089 = vmatpush.msra.mxu3 %v2534_v29  ;;  %vm711_vm11 = vmor %vm709_vm10, %vm710_vm9 }
 0x232   :  { %v706_v2 = vsub.f32 1.0, %v705_v5  ;;  %v1970_v5 = vpop.eup %1969  ;;  %1050 = vmatpush.msra.mxu1 %v2540_v33  ;;  %1070 = vmatpush.msra.mxu2 %v2547_v36 }
 0x233   :  { %v662_v10 = vadd.f32 %v1964_v26, %v661_v7  ;;  %v683_v11 = vmul.f32 %v1966_v62, %v682_v45  ;;  %v692_v45 = vor.u32 1.1754944e-38, %v691_v9  ;;  %vm690_vm8 = vcmp.eq.f32.partialorder %v689_v1, 8.507059e+37  ;;  %1030 = vmatpush.msra.mxu0 %v2538_v32  ;;  %1090 = vmatpush.msra.mxu3 %v2549_v37  ;;  %v3228_v1 = vld [vmem:[#allocation19_spill] sm:$0xff] }
 0x234   :  { %1051 = vmatpush.msra.mxu1 %v2557_v41  ;;  %1071 = vmatpush.msra.mxu2 %v2562_v43 }
 0x235   :  { %v666_v30 = vsel %vm665_vm4, %v1964_v26, %v662_v10  ;;  %v684_v16 = vadd.f32 %v1966_v62, %v683_v11  ;;  %v707_v11 = vmul.f32 %v2674_v61, %v706_v2  ;;  %1031 = vmatpush.msra.mxu0 %v2555_v40  ;;  %1091 = vmatpush.msra.mxu3 %v2564_v44  ;;  %v713_v26 = vand.u32 2147483647, %v2652_v13  ;;  %v3229_v2 = vld [vmem:[#allocation20_spill] sm:$0xff] }
 0x236   :  { %v671_v7 = vsel %vm668_vm5, %v670_v63, %v666_v30  ;;  %1052 = vmatpush.msra.mxu1 %v2572_v47  ;;  %1072 = vmatpush.msra.mxu2 %v2576_v48  ;;  %v3230_v30 = vld [vmem:[#allocation21_spill] sm:$0xff] }
 0x237   :  { %v688_v4 = vsel %vm687_vm7, %v1966_v62, %v684_v16  ;;  %v720_v38 = vmul.f32 %v1970_v5, %v671_v7  ;;  %v708_v16 = vadd.f32 %v2674_v61, %v707_v11  ;;  %1032 = vmatpush.msra.mxu0 %v2570_v46  ;;  %1092 = vmatpush.msra.mxu3 %v2578_v50  ;;  %vm714_vm12 = vcmp.eq.f32.partialorder %v713_v26, 8.507059e+37  ;;  %v3232_v7 = vld [vmem:[#allocation23_spill] sm:$0xff]  ;;  %v3233_v5 = vld [vmem:[#allocation24_spill] sm:$0xff] }
 0x238   :  { %v693_v10 = vsel %vm690_vm8, %v692_v45, %v688_v4  ;;  %1053 = vmatpush.msra.mxu1 %v2587_v56  ;;  %1073 = vmatpush.msra.mxu2 %v2591_v57  ;;  %v3235_v11 = vld [vmem:[#allocation7_spill] sm:$0xff]  ;;  %v3240_v26 = vld [vmem:[#allocation12_spill] sm:$0xff] }
 0x239   :  { %v719_v9 = vmul.f32 %v693_v10, %v2440_v49  ;;  %v715_v49 = vand.u32 2147483648, %v2652_v13  ;;  %1033 = vmatpush.msra.mxu0 %v2585_v55  ;;  %1093 = vmatpush.msra.mxu3 %v2593_v58  ;;  %v712_v39 = vsel %vm711_vm11, %v2674_v61, %v708_v16  ;;  %v3231_v13 = vld [vmem:[#allocation22_spill] sm:$0xff]  ;;  %v3234_v10 = vld [vmem:[#allocation25_spill] sm:$0xff] }
 0x23a   :  { %1054 = vmatpush.msra.mxu1 %v3228_v1  ;;  %1074 = vmatpush.msra.mxu2 %v3229_v2  ;;  %v3238_v16 = vld [vmem:[#allocation10_spill] sm:$0xff] }
 0x23b   :  { %v2713_v62 = vadd.f32 %v720_v38, %v719_v9  ;;  %1034 = vmatpush.msra.mxu0 %v2597_v25  ;;  %v716_v63 = vor.u32 1.1754944e-38, %v715_v49  ;;  %1094 = vmatpush.msra.mxu3 %v3230_v30  ;;  %v3236_v9 = vld [vmem:[#allocation8_spill] sm:$0xff]  ;;  %v3237_v38 = vld [vmem:[#allocation9_spill] sm:$0xff]  ;;  %v3239_v49 = vld [vmem:[#allocation11_spill] sm:$0xff] }
 0x23c   :  { %1055 = vmatpush.msra.mxu1 %v3232_v7  ;;  %1075 = vmatpush.msra.mxu2 %v3233_v5 }
 0x23d   :  { %1971 = vtanh.f32 %v2713_v62  ;;  %1035 = vmatpush.msra.mxu0 %v3231_v13  ;;  %v717_v4 = vsel %vm714_vm12, %v716_v63, %v712_v39  ;;  %1095 = vmatpush.msra.mxu3 %v3234_v10  ;;  %v3245_v39 = vld [vmem:[#allocation17_spill] sm:$0xff] }
 0x23e   :  { %1056 = vmatpush.msra.mxu1 %v2623_v51  ;;  %1076 = vmatpush.msra.mxu2 %v2627_v52 }
 0x23f   :  { %1036 = vmatpush.msra.mxu0 %v2621_v42  ;;  %1096 = vmatpush.msra.mxu3 %v2629_v54 }
 0x240   :  { %1057 = vmatpush.msra.mxu1 %v2635_v31  ;;  %1077 = vmatpush.msra.mxu2 %v2641_v35 }
 0x241   :  { %1037 = vmatpush.msra.mxu0 %v2633_v21  ;;  %1097 = vmatpush.msra.mxu3 %v2643_v34 }
 0x243   :  { %v1972_v45 = vpop.eup %1971 }
 0x244   :  { %v723_v61 = vmul.f32 %v1972_v45, %v717_v4 }
 0x246   :  { %1895 = vst [vmem:[%s3171_s2 + $0x4] sm:$0x3] %v723_v61  ;;  %808 = vmatmul.f32.vlgmr.msrb.gmra.mxu0 %v723_v61  ;;  %828 = vmatmul.f32.vlgmr.msrb.gmra.mxu1 %v723_v61 }
 0x247   :  { %848 = vmatmul.f32.vlgmr.msrb.gmra.mxu2 %v723_v61  ;;  %868 = vmatmul.f32.vlgmr.msrb.gmra.mxu3 %v723_v61 }
 0x248   :  { %1252 = vmatpush.msrb.mxu0 %v2446_v53  ;;  %1272 = vmatpush.msrb.mxu1 %v2448_v59  ;;  %v3241_v53 = vld [vmem:[#allocation13_spill] sm:$0xff]  ;;  %v3242_v59 = vld [vmem:[#allocation14_spill] sm:$0xff] }
 0x249   :  { %1292 = vmatpush.msrb.mxu2 %v2450_v60  ;;  %1312 = vmatpush.msrb.mxu3 %v3235_v11  ;;  %v3243_v60 = vld [vmem:[#allocation15_spill] sm:$0xff] }
 0x24a   :  { %1253 = vmatpush.msrb.mxu0 %v3236_v9  ;;  %1273 = vmatpush.msrb.mxu1 %v2460_v0  ;;  %v3244_v0 = vld [vmem:[#allocation16_spill] sm:$0xff] }
 0x24b   :  { %1293 = vmatpush.msrb.mxu2 %v3237_v38  ;;  %1313 = vmatpush.msrb.mxu3 %v3238_v16 }
 0x24c   :  { %1254 = vmatpush.msrb.mxu0 %v3239_v49  ;;  %1274 = vmatpush.msrb.mxu1 %v2472_v3  ;;  %v3246_v3 = vld [vmem:[#allocation18_spill] sm:$0xff] }
 0x24d   :  { %1294 = vmatpush.msrb.mxu2 %v3240_v26  ;;  %1314 = vmatpush.msrb.mxu3 %v3241_v53 }
 0x24e   :  { %1255 = vmatpush.msrb.mxu0 %v2482_v6  ;;  %1275 = vmatpush.msrb.mxu1 %v3242_v59 }
 0x24f   :  { %1295 = vmatpush.msrb.mxu2 %v2486_v8  ;;  %1315 = vmatpush.msrb.mxu3 %v3243_v60 }
 0x250   :  { %1256 = vmatpush.msrb.mxu0 %v3244_v0  ;;  %1276 = vmatpush.msrb.mxu1 %v3245_v39 }
 0x251   :  { %1296 = vmatpush.msrb.mxu2 %v2498_v12  ;;  %1316 = vmatpush.msrb.mxu3 %v2502_v14 }
 0x252   :  { %1257 = vmatpush.msrb.mxu0 %v2506_v15  ;;  %1277 = vmatpush.msrb.mxu1 %v3246_v3 }
 0x253   :  { %1297 = vmatpush.msrb.mxu2 %v2510_v17  ;;  %1317 = vmatpush.msrb.mxu3 %v2514_v18 }
 0x254   :  { %1258 = vmatpush.msrb.mxu0 %v2516_v19  ;;  %1278 = vmatpush.msrb.mxu1 %v2518_v20  ;;  %v1896_v19 = vld [vmem:[%s3169_s0 + $0x18] sm:$0xff] }
 0x255   :  { %1298 = vmatpush.msrb.mxu2 %v2522_v22  ;;  %1318 = vmatpush.msrb.mxu3 %v2524_v23 }
 0x256   :  { %1259 = vmatpush.msrb.mxu0 %v2526_v24  ;;  %1279 = vmatpush.msrb.mxu1 %v2530_v27 }
 0x257   :  { %1299 = vmatpush.msrb.mxu2 %v2532_v28  ;;  %1319 = vmatpush.msrb.mxu3 %v2534_v29 }
 0x258   :  { %1260 = vmatpush.msrb.mxu0 %v2538_v32  ;;  %1280 = vmatpush.msrb.mxu1 %v2540_v33 }
 0x259   :  { %1300 = vmatpush.msrb.mxu2 %v2547_v36  ;;  %1320 = vmatpush.msrb.mxu3 %v2549_v37 }
 0x25a   :  { %1261 = vmatpush.msrb.mxu0 %v2555_v40  ;;  %1281 = vmatpush.msrb.mxu1 %v2557_v41 }
 0x25b   :  { %1301 = vmatpush.msrb.mxu2 %v2562_v43  ;;  %1321 = vmatpush.msrb.mxu3 %v2564_v44 }
 0x25c   :  { %1262 = vmatpush.msrb.mxu0 %v2570_v46  ;;  %1282 = vmatpush.msrb.mxu1 %v2572_v47 }
 0x25d   :  { %1302 = vmatpush.msrb.mxu2 %v2576_v48  ;;  %1322 = vmatpush.msrb.mxu3 %v2578_v50 }
 0x25e   :  { %1263 = vmatpush.msrb.mxu0 %v2585_v55  ;;  %1283 = vmatpush.msrb.mxu1 %v2587_v56 }
 0x25f   :  { %1303 = vmatpush.msrb.mxu2 %v2591_v57  ;;  %1323 = vmatpush.msrb.mxu3 %v2593_v58 }
 0x260   :  { %1264 = vmatpush.msrb.mxu0 %v2597_v25  ;;  %1284 = vmatpush.msrb.mxu1 %v3228_v1 }
 0x261   :  { %1304 = vmatpush.msrb.mxu2 %v3229_v2  ;;  %1324 = vmatpush.msrb.mxu3 %v3230_v30 }
 0x262   :  { %1265 = vmatpush.msrb.mxu0 %v3231_v13  ;;  %1285 = vmatpush.msrb.mxu1 %v3232_v7 }
 0x263   :  { %1305 = vmatpush.msrb.mxu2 %v3233_v5  ;;  %1325 = vmatpush.msrb.mxu3 %v3234_v10 }
 0x264   :  { %1266 = vmatpush.msrb.mxu0 %v2621_v42  ;;  %1286 = vmatpush.msrb.mxu1 %v2623_v51 }
 0x265   :  { %1306 = vmatpush.msrb.mxu2 %v2627_v52  ;;  %1326 = vmatpush.msrb.mxu3 %v2629_v54 }
 0x266   :  { %1267 = vmatpush.msrb.mxu0 %v2633_v21  ;;  %1287 = vmatpush.msrb.mxu1 %v2635_v31 }
 0x267   :  { %1307 = vmatpush.msrb.mxu2 %v2641_v35  ;;  %1327 = vmatpush.msrb.mxu3 %v2643_v34 }
 0x2c3   :  { %v829_v6 = vpop.f32.mrf.mxu1  ;;  %v809_v18 = vpop.f32.mrf.mxu0 }
 0x2c4   :  { %v876_v8 = vrot.slane %v829_v6, 6 }
 0x2c6   :  { %v879_v20 = vsel %vm187_vm0, %v809_v18, %v876_v8 }
 0x2ca   :  { %v849_v12 = vpop.f32.mrf.mxu2  ;;  %v869_v14 = vpop.f32.mrf.mxu3 }
 0x2cb   :  { %v877_v15 = vrot.slane %v849_v12, 4  ;;  %v878_v17 = vrot.slane %v869_v14, 2  ;;  %v1901_v14 = vld [vmem:[%s3169_s0 + $0x20] sm:$0xff] }
 0x2cd   :  { %v880_v22 = vsel %vm189_vm1, %v877_v15, %v878_v17 }
 0x2ce   :  { %v881_v23 = vsel %vm191_vm2, %v879_v20, %v880_v22 }
 0x2cf   :  { %v883_v24 = vadd.f32 %v1896_v19, %v881_v23 }
 0x2d1   :  { %v1897_v27 = vmul.f32 -1.442695, %v883_v24  ;;  %v904_v28 = vrot.slane %v883_v24, 2  ;;  %v928_v29 = vrot.slane %v883_v24, 6  ;;  %v925_v50 = vrot.slane %v883_v24, 4 }
 0x2d3   :  { %1973 = vpow2.f32 %v1897_v27  ;;  %v1898_v32 = vmul.f32 -1.442695, %v904_v28  ;;  %v1899_v33 = vmul.f32 -1.442695, %v928_v29 }
 0x2d5   :  { %1975 = vpow2.f32 %v1898_v32 }
 0x2d6   :  { %1977 = vpow2.f32 %v1899_v33 }
 0x2d9   :  { %v1974_v36 = vpop.eup %1973 }
 0x2da   :  { %v887_v37 = vadd.f32 1.0, %v1974_v36 }
 0x2db   :  { %v1976_v40 = vpop.eup %1975 }
 0x2dc   :  { %v1978_v41 = vpop.eup %1977  ;;  %1979 = vrcp.f32 %v887_v37  ;;  %v909_v43 = vadd.f32 1.0, %v1976_v40  ;;  %v899_v58 = vand.u32 2147483648, %v887_v37  ;;  %v897_v35 = vand.u32 2147483647, %v887_v37 }
 0x2dd   :  { %v933_v44 = vadd.f32 1.0, %v1978_v41  ;;  %vm893_vm14 = vweird.f32 %v887_v37 }
 0x2de   :  { %1981 = vrcp.f32 %v909_v43  ;;  %v921_v42 = vand.u32 2147483648, %v909_v43  ;;  %v919_v54 = vand.u32 2147483647, %v909_v43  ;;  %v900_v21 = vor.u32 1.1754944e-38, %v899_v58 }
 0x2df   :  { %1983 = vrcp.f32 %v933_v44  ;;  %vm898_vm4 = vcmp.eq.f32.partialorder %v897_v35, 8.507059e+37  ;;  %vm915_vm5 = vweird.f32 %v909_v43  ;;  %v945_v38 = vand.u32 2147483648, %v933_v44 }
 0x2e0   :  { %1985 = vtanh.f32 %v925_v50  ;;  %v922_v13 = vor.u32 1.1754944e-38, %v921_v42  ;;  %vm920_vm7 = vcmp.eq.f32.partialorder %v919_v54, 8.507059e+37  ;;  %vm939_vm9 = vweird.f32 %v933_v44 }
 0x2e1   :  { %v943_v16 = vand.u32 2147483647, %v933_v44  ;;  %v946_v26 = vor.u32 1.1754944e-38, %v945_v38 }
 0x2e2   :  { %v1980_v46 = vpop.eup %1979 }
 0x2e3   :  { %v889_v47 = vmul.f32 %v1980_v46, %v887_v37  ;;  %vm894_vm13 = vweird.f32 %v1980_v46  ;;  %vm944_vm11 = vcmp.eq.f32.partialorder %v943_v16, 8.507059e+37 }
 0x2e4   :  { %v1982_v48 = vpop.eup %1981  ;;  %vm895_vm3 = vmor %vm893_vm14, %vm894_vm13 }
 0x2e5   :  { %v1984_v55 = vpop.eup %1983  ;;  %v890_v56 = vsub.f32 1.0, %v889_v47  ;;  %v911_v57 = vmul.f32 %v1982_v48, %v909_v43  ;;  %vm916_vm15 = vweird.f32 %v1982_v48 }
 0x2e6   :  { %v935_v25 = vmul.f32 %v1984_v55, %v933_v44  ;;  %vm917_vm6 = vmor %vm915_vm5, %vm916_vm15  ;;  %v1986_v45 = vpop.eup %1985  ;;  %vm940_vm8 = vweird.f32 %v1984_v55 }
 0x2e7   :  { %v912_v31 = vsub.f32 1.0, %v911_v57  ;;  %v891_v34 = vmul.f32 %v1980_v46, %v890_v56  ;;  %vm941_vm10 = vmor %vm939_vm9, %vm940_vm8 }
 0x2e8   :  { %v936_v1 = vsub.f32 1.0, %v935_v25 }
 0x2e9   :  { %v892_v51 = vadd.f32 %v1980_v46, %v891_v34  ;;  %v913_v52 = vmul.f32 %v1982_v48, %v912_v31 }
 0x2ea   :  { %v937_v5 = vmul.f32 %v1984_v55, %v936_v1 }
 0x2eb   :  { %v896_v63 = vsel %vm895_vm3, %v1980_v46, %v892_v51  ;;  %v914_v2 = vadd.f32 %v1982_v48, %v913_v52 }
 0x2ec   :  { %v901_v30 = vsel %vm898_vm4, %v900_v21, %v896_v63  ;;  %v938_v9 = vadd.f32 %v1984_v55, %v937_v5 }
 0x2ed   :  { %v918_v7 = vsel %vm917_vm6, %v1982_v48, %v914_v2  ;;  %v950_v61 = vmul.f32 %v1986_v45, %v901_v30 }
 0x2ee   :  { %v923_v4 = vsel %vm920_vm7, %v922_v13, %v918_v7  ;;  %v942_v49 = vsel %vm941_vm10, %v1984_v55, %v938_v9 }
 0x2ef   :  { %v949_v10 = vmul.f32 %v923_v4, %v2713_v62  ;;  %v947_v59 = vsel %vm944_vm11, %v946_v26, %v942_v49 }
 0x2f1   :  { %v2822_v11 = vadd.f32 %v950_v61, %v949_v10 }
 0x2f3   :  { %1987 = vtanh.f32 %v2822_v11 }
 0x2f9   :  { %v1988_v53 = vpop.eup %1987 }
 0x2fa   :  { %v953_v60 = vmul.f32 %v1988_v53, %v947_v59  ;;  %v2843_v53 = vld [vmem:[#allocation4 + $0x1e8] sm:$0xff]  ;;  %v2845_v59 = vld [vmem:[#allocation4 + $0x1f0] sm:$0xff] }
 0x2fc   :  { %1900 = vst [vmem:[%s3171_s2 + $0x6] sm:$0x3] %v953_v60  ;;  %1038 = vmatmul.f32.vlgmr.msra.gmra.mxu0 %v953_v60  ;;  %1058 = vmatmul.f32.vlgmr.msra.gmra.mxu1 %v953_v60 }
 0x2fd   :  { %1078 = vmatmul.f32.vlgmr.msra.gmra.mxu2 %v953_v60  ;;  %1098 = vmatmul.f32.vlgmr.msra.gmra.mxu3 %v953_v60  ;;  %v2849_v60 = vld [vmem:[#allocation4 + $0x1f8] sm:$0xff] }
 0x2fe   :  { %1502 = vmatpush.msra.mxu1 %v2843_v53  ;;  %1522 = vmatpush.msra.mxu2 %v2845_v59 }
 0x2ff   :  { %1542 = vmatpush.msra.mxu3 %v2849_v60 }
 0x379   :  { %v1059_v62 = vpop.f32.mrf.mxu1  ;;  %v1039_v12 = vpop.f32.mrf.mxu0 }
 0x37a   :  { %v1106_v0 = vrot.slane %v1059_v62, 6  ;;  %v2853_v62 = vld [vmem:[#allocation4 + $0x1c0] sm:$0xff] }
 0x37c   :  { %v1109_v15 = vsel %vm187_vm0, %v1039_v12, %v1106_v0  ;;  %v2855_v0 = vld [vmem:[#allocation4 + $0x1c8] sm:$0xff]  ;;  %v2869_v12 = vld [vmem:[#allocation4 + $0x1b0] sm:$0xff] }
 0x37d   :  { %1503 = vmatpush.msra.mxu1 %v2855_v0 }
 0x380   :  { %v1079_v39 = vpop.f32.mrf.mxu2  ;;  %v1099_v3 = vpop.f32.mrf.mxu3 }
 0x381   :  { %v1107_v6 = vrot.slane %v1079_v39, 4  ;;  %v1108_v8 = vrot.slane %v1099_v3, 2  ;;  %v2857_v39 = vld [vmem:[#allocation4 + $0x1d0] sm:$0xff]  ;;  %v2861_v3 = vld [vmem:[#allocation4 + $0x1d8] sm:$0xff] }
 0x382   :  { %1523 = vmatpush.msra.mxu2 %v2857_v39  ;;  %1543 = vmatpush.msra.mxu3 %v2861_v3 }
 0x383   :  { %v1110_v17 = vsel %vm189_vm1, %v1107_v6, %v1108_v8  ;;  %v2865_v6 = vld [vmem:[#allocation4 + $0x1a0] sm:$0xff]  ;;  %v2867_v8 = vld [vmem:[#allocation4 + $0x1a8] sm:$0xff] }
 0x384   :  { %v1111_v18 = vsel %vm191_vm2, %v1109_v15, %v1110_v17  ;;  %1504 = vmatpush.msra.mxu1 %v2867_v8  ;;  %1524 = vmatpush.msra.mxu2 %v2869_v12  ;;  %v2877_v15 = vld [vmem:[#allocation4 + $0x180] sm:$0xff]  ;;  %v2879_v17 = vld [vmem:[#allocation4 + $0x188] sm:$0xff] }
 0x385   :  { %v1113_v19 = vadd.f32 %v1901_v14, %v1111_v18  ;;  %v2873_v14 = vld [vmem:[#allocation4 + $0x1b8] sm:$0xff]  ;;  %v2881_v18 = vld [vmem:[#allocation4 + $0x190] sm:$0xff] }
 0x386   :  { %1544 = vmatpush.msra.mxu3 %v2873_v14  ;;  %1505 = vmatpush.msra.mxu1 %v2879_v17 }
 0x387   :  { %v1902_v20 = vmul.f32 -1.442695, %v1113_v19  ;;  %v1134_v22 = vrot.slane %v1113_v19, 2  ;;  %v1158_v23 = vrot.slane %v1113_v19, 6  ;;  %v1155_v44 = vrot.slane %v1113_v19, 4  ;;  %v2885_v19 = vld [vmem:[#allocation4 + $0x198] sm:$0xff]  ;;  %1525 = vmatpush.msra.mxu2 %v2881_v18 }
 0x388   :  { %1545 = vmatpush.msra.mxu3 %v2885_v19 }
 0x389   :  { %1989 = vpow2.f32 %v1902_v20  ;;  %v1903_v24 = vmul.f32 -1.442695, %v1134_v22  ;;  %v1904_v27 = vmul.f32 -1.442695, %v1158_v23  ;;  %v2889_v20 = vld [vmem:[#allocation4 + $0x160] sm:$0xff]  ;;  %v2891_v22 = vld [vmem:[#allocation4 + $0x168] sm:$0xff] }
 0x38a   :  { %v2893_v23 = vld [vmem:[#allocation4 + $0x170] sm:$0xff]  ;;  %1506 = vmatpush.msra.mxu1 %v2891_v22 }
 0x38b   :  { %1991 = vpow2.f32 %v1903_v24  ;;  %1526 = vmatpush.msra.mxu2 %v2893_v23 }
 0x38c   :  { %1993 = vpow2.f32 %v1904_v27  ;;  %v2897_v27 = vld [vmem:[#allocation4 + $0x178] sm:$0xff] }
 0x38d   :  { %1546 = vmatpush.msra.mxu3 %v2897_v27 }
 0x38f   :  { %v1990_v28 = vpop.eup %1989 }
 0x390   :  { %v1117_v29 = vadd.f32 1.0, %v1990_v28  ;;  %v2901_v28 = vld [vmem:[#allocation4 + $0x140] sm:$0xff] }
 0x391   :  { %v1992_v32 = vpop.eup %1991 }
 0x392   :  { %v1994_v33 = vpop.eup %1993  ;;  %1995 = vrcp.f32 %v1117_v29  ;;  %v1139_v36 = vadd.f32 1.0, %v1992_v32  ;;  %v1129_v50 = vand.u32 2147483648, %v1117_v29  ;;  %v1127_v58 = vand.u32 2147483647, %v1117_v29  ;;  %v2905_v32 = vld [vmem:[#allocation4 + $0x150] sm:$0xff] }
 0x393   :  { %v1163_v37 = vadd.f32 1.0, %v1994_v33  ;;  %vm1123_vm13 = vweird.f32 %v1117_v29  ;;  %v2909_v33 = vld [vmem:[#allocation4 + $0x158] sm:$0xff]  ;;  %1527 = vmatpush.msra.mxu2 %v2905_v32 }
 0x394   :  { %1997 = vrcp.f32 %v1139_v36  ;;  %v1151_v25 = vand.u32 2147483648, %v1139_v36  ;;  %v1149_v35 = vand.u32 2147483647, %v1139_v36  ;;  %v1130_v42 = vor.u32 1.1754944e-38, %v1129_v50  ;;  %1547 = vmatpush.msra.mxu3 %v2909_v33  ;;  %v2927_v50 = vld [vmem:[#allocation4 + $0x110] sm:$0xff] }
 0x395   :  { %1999 = vrcp.f32 %v1163_v37  ;;  %vm1128_vm3 = vcmp.eq.f32.partialorder %v1127_v58, 8.507059e+37  ;;  %vm1145_vm4 = vweird.f32 %v1139_v36  ;;  %v1175_v10 = vand.u32 2147483648, %v1163_v37  ;;  %v2933_v58 = vld [vmem:[#allocation4 + $0xe0] sm:$0xff] }
 0x396   :  { %2001 = vtanh.f32 %v1155_v44  ;;  %v1152_v1 = vor.u32 1.1754944e-38, %v1151_v25  ;;  %vm1150_vm6 = vcmp.eq.f32.partialorder %v1149_v35, 8.507059e+37  ;;  %vm1169_vm8 = vweird.f32 %v1163_v37  ;;  %v2921_v44 = vld [vmem:[#allocation4 + $0x100] sm:$0xff]  ;;  %v2935_v25 = vld [vmem:[#allocation4 + $0xe8] sm:$0xff]  ;;  %v2942_v35 = vld [vmem:[#allocation4 + $0xf0] sm:$0xff] }
 0x397   :  { %v1173_v61 = vand.u32 2147483647, %v1163_v37  ;;  %v1176_v38 = vor.u32 1.1754944e-38, %v1175_v10 }
 0x398   :  { %v1996_v40 = vpop.eup %1995 }
 0x399   :  { %v1119_v41 = vmul.f32 %v1996_v40, %v1117_v29  ;;  %vm1124_vm12 = vweird.f32 %v1996_v40  ;;  %vm1174_vm10 = vcmp.eq.f32.partialorder %v1173_v61, 8.507059e+37  ;;  %v2903_v29 = vld [vmem:[#allocation4 + $0x148] sm:$0xff] }
 0x39a   :  { %v1998_v43 = vpop.eup %1997  ;;  %vm1125_vm15 = vmor %vm1123_vm13, %vm1124_vm12  ;;  %1507 = vmatpush.msra.mxu1 %v2903_v29 }
 0x39b   :  { %v2000_v46 = vpop.eup %1999  ;;  %v1120_v47 = vsub.f32 1.0, %v1119_v41  ;;  %v1141_v48 = vmul.f32 %v1998_v43, %v1139_v36  ;;  %vm1146_vm14 = vweird.f32 %v1998_v43  ;;  %v2911_v36 = vld [vmem:[#allocation4 + $0x120] sm:$0xff]  ;;  %v2917_v41 = vld [vmem:[#allocation4 + $0x130] sm:$0xff] }
 0x39c   :  { %v1165_v55 = vmul.f32 %v2000_v46, %v1163_v37  ;;  %vm1147_vm5 = vmor %vm1145_vm4, %vm1146_vm14  ;;  %v2002_v2 = vpop.eup %2001  ;;  %vm1170_vm7 = vweird.f32 %v2000_v46  ;;  %v2913_v37 = vld [vmem:[#allocation4 + $0x128] sm:$0xff]  ;;  %1528 = vmatpush.msra.mxu2 %v2917_v41 }
 0x39d   :  { %v1142_v56 = vsub.f32 1.0, %v1141_v48  ;;  %v1121_v57 = vmul.f32 %v1996_v40, %v1120_v47  ;;  %vm1171_vm9 = vmor %vm1169_vm8, %vm1170_vm7  ;;  %1508 = vmatpush.msra.mxu1 %v2913_v37  ;;  %v2925_v48 = vld [vmem:[#allocation4 + $0x108] sm:$0xff] }
 0x39e   :  { %v1166_v51 = vsub.f32 1.0, %v1165_v55  ;;  %v2929_v55 = vld [vmem:[#allocation4 + $0x118] sm:$0xff]  ;;  %1529 = vmatpush.msra.mxu2 %v2927_v50 }
 0x39f   :  { %v1122_v31 = vadd.f32 %v1996_v40, %v1121_v57  ;;  %v1143_v34 = vmul.f32 %v1998_v43, %v1142_v56  ;;  %1509 = vmatpush.msra.mxu1 %v2925_v48 }
 0x3a0   :  { %v1167_v13 = vmul.f32 %v2000_v46, %v1166_v51  ;;  %1530 = vmatpush.msra.mxu2 %v2942_v35 }
 0x3a1   :  { %v1126_v52 = vsel %vm1125_vm15, %v1996_v40, %v1122_v31  ;;  %v1144_v54 = vadd.f32 %v1998_v43, %v1143_v34  ;;  %v1906_v34 = vld [vmem:[%s3169_s0 + $0x28] sm:$0xff]  ;;  %1510 = vmatpush.msra.mxu1 %v2935_v25 }
 0x3a2   :  { %v1131_v21 = vsel %vm1128_vm3, %v1130_v42, %v1126_v52  ;;  %v1168_v5 = vadd.f32 %v2000_v46, %v1167_v13  ;;  %v2944_v42 = vld [vmem:[#allocation4 + $0xf8] sm:$0xff]  ;;  %v2965_v13 = vld [vmem:[#allocation4 + $0xa0] sm:$0xff] }
 0x3a3   :  { %v1148_v63 = vsel %vm1147_vm5, %v1998_v43, %v1144_v54  ;;  %v1180_v45 = vmul.f32 %v2002_v2, %v1131_v21  ;;  %v2919_v43 = vld [vmem:[#allocation4 + $0x138] sm:$0xff]  ;;  %v2950_v54 = vld [vmem:[#allocation4 + $0xc0] sm:$0xff]  ;;  %v2952_v21 = vld [vmem:[#allocation4 + $0xc8] sm:$0xff] }
 0x3a4   :  { %v1153_v30 = vsel %vm1150_vm6, %v1152_v1, %v1148_v63  ;;  %v1172_v9 = vsel %vm1171_vm9, %v2000_v46, %v1168_v5  ;;  %1548 = vmatpush.msra.mxu3 %v2919_v43  ;;  %v2957_v63 = vld [vmem:[#allocation4 + $0xd0] sm:$0xff]  ;;  %v2959_v2 = vld [vmem:[#allocation4 + $0xd8] sm:$0xff]  ;;  %1511 = vmatpush.msra.mxu1 %v2952_v21 }
 0x3a5   :  { %v1179_v7 = vmul.f32 %v1153_v30, %v2822_v11  ;;  %v1177_v49 = vsel %vm1174_vm10, %v1176_v38, %v1172_v9  ;;  %v2841_v11 = vld [vmem:[#allocation4 + $0x1e0] sm:$0xff]  ;;  %v2973_v5 = vld [vmem:[#allocation4 + $0xb8] sm:$0xff]  ;;  %1531 = vmatpush.msra.mxu2 %v2957_v63 }
 0x3a6   :  { %1482 = vmatpush.msra.mxu0 %v2841_v11  ;;  %1549 = vmatpush.msra.mxu3 %v2929_v55  ;;  %v2980_v38 = vld [vmem:[#allocation4 + $0x80] sm:$0xff] }
 0x3a7   :  { %v2835_v4 = vadd.f32 %v1180_v45, %v1179_v7  ;;  %v2967_v7 = vld [vmem:[#allocation4 + $0xa8] sm:$0xff]  ;;  %v2971_v45 = vld [vmem:[#allocation4 + $0xb0] sm:$0xff] }
 0x3a8   :  { %1483 = vmatpush.msra.mxu0 %v2853_v62  ;;  %1550 = vmatpush.msra.mxu3 %v2944_v42 }
 0x3a9   :  { %2003 = vtanh.f32 %v2835_v4  ;;  %1512 = vmatpush.msra.mxu1 %v2967_v7  ;;  %1532 = vmatpush.msra.mxu2 %v2971_v45 }
 0x3aa   :  { %1484 = vmatpush.msra.mxu0 %v2865_v6  ;;  %1551 = vmatpush.msra.mxu3 %v2959_v2 }
 0x3ac   :  { %1485 = vmatpush.msra.mxu0 %v2877_v15  ;;  %1552 = vmatpush.msra.mxu3 %v2973_v5 }
 0x3ae   :  { %1486 = vmatpush.msra.mxu0 %v2889_v20 }
 0x3af   :  { %v2004_v16 = vpop.eup %2003 }
 0x3b0   :  { %v1183_v26 = vmul.f32 %v2004_v16, %v1177_v49  ;;  %1487 = vmatpush.msra.mxu0 %v2901_v28  ;;  %v2982_v16 = vld [vmem:[#allocation4 + $0x88] sm:$0xff]  ;;  %v2986_v49 = vld [vmem:[#allocation4 + $0x90] sm:$0xff] }
 0x3b1   :  { %1513 = vmatpush.msra.mxu1 %v2982_v16  ;;  %1533 = vmatpush.msra.mxu2 %v2986_v49 }
 0x3b2   :  { %1905 = vst [vmem:[%s3171_s2 + $0x8] sm:$0x3] %v1183_v26  ;;  %1268 = vmatmul.f32.vlgmr.msrb.gmra.mxu0 %v1183_v26  ;;  %1288 = vmatmul.f32.vlgmr.msrb.gmra.mxu1 %v1183_v26 }
 0x3b3   :  { %1308 = vmatmul.f32.vlgmr.msrb.gmra.mxu2 %v1183_v26  ;;  %1328 = vmatmul.f32.vlgmr.msrb.gmra.mxu3 %v1183_v26  ;;  %v2988_v26 = vld [vmem:[#allocation4 + $0x98] sm:$0xff] }
 0x3b4   :  { %1488 = vmatpush.msra.mxu0 %v2911_v36  ;;  %1553 = vmatpush.msra.mxu3 %v2988_v26 }
 0x3b6   :  { %1489 = vmatpush.msra.mxu0 %v2921_v44 }
 0x3b8   :  { %1490 = vmatpush.msra.mxu0 %v2933_v58 }
 0x3ba   :  { %1491 = vmatpush.msra.mxu0 %v2950_v54 }
 0x3bc   :  { %1492 = vmatpush.msra.mxu0 %v2965_v13 }
 0x3be   :  { %1493 = vmatpush.msra.mxu0 %v2980_v38 }
 0x42f   :  { %v1289_v24 = vpop.f32.mrf.mxu1  ;;  %v1269_v31 = vpop.f32.mrf.mxu0 }
 0x430   :  { %v1336_v40 = vrot.slane %v1289_v24, 6 }
 0x432   :  { %v1339_v51 = vsel %vm187_vm0, %v1269_v31, %v1336_v40  ;;  %v3004_v31 = vld [vmem:[#allocation4 + $0x40] sm:$0xff] }
 0x433   :  { %3250 = vst [vmem:[#allocation22_spill] sm:$0xff] %v3004_v31 }
 0x436   :  { %v1309_v46 = vpop.f32.mrf.mxu2  ;;  %v1329_v47 = vpop.f32.mrf.mxu3 }
 0x437   :  { %v1337_v56 = vrot.slane %v1309_v46, 4  ;;  %v1338_v57 = vrot.slane %v1329_v47, 2  ;;  %v2992_v46 = vld [vmem:[#allocation4 + $0x60] sm:$0xff]  ;;  %v2994_v47 = vld [vmem:[#allocation4 + $0x68] sm:$0xff] }
 0x438   :  { %3247 = vst [vmem:[#allocation19_spill] sm:$0xff] %v2994_v47  ;;  %1494 = vmatpush.msra.mxu0 %v2992_v46  ;;  %1514 = vmatpush.msra.mxu1 %v2994_v47 }
 0x439   :  { %v1340_v52 = vsel %vm189_vm1, %v1337_v56, %v1338_v57  ;;  %v2998_v56 = vld [vmem:[#allocation4 + $0x70] sm:$0xff]  ;;  %v3000_v57 = vld [vmem:[#allocation4 + $0x78] sm:$0xff] }
 0x43a   :  { %v1341_v1 = vsel %vm191_vm2, %v1339_v51, %v1340_v52  ;;  %3248 = vst [vmem:[#allocation20_spill] sm:$0xff] %v2998_v56  ;;  %v3010_v51 = vld [vmem:[#allocation4 + $0x50] sm:$0xff]  ;;  %v3012_v52 = vld [vmem:[#allocation4 + $0x58] sm:$0xff]  ;;  %1534 = vmatpush.msra.mxu2 %v2998_v56  ;;  %1554 = vmatpush.msra.mxu3 %v3000_v57 }
 0x43b   :  { %v2961_v30 = vadd.f32 %v1906_v34, %v1341_v1  ;;  %3249 = vst [vmem:[#allocation21_spill] sm:$0xff] %v3000_v57  ;;  %v3006_v34 = vld [vmem:[#allocation4 + $0x48] sm:$0xff]  ;;  %v3016_v1 = vld [vmem:[#allocation4 + $0x20] sm:$0xff]  ;;  %1495 = vmatpush.msra.mxu0 %v3004_v31  ;;  %v3038_v31 = vld [vmem:[#allocation4 + $0x18] sm:$0xff] }
 0x43c   :  { %3251 = vst [vmem:[#allocation23_spill] sm:$0xff] %v3006_v34  ;;  %1515 = vmatpush.msra.mxu1 %v3006_v34  ;;  %1535 = vmatpush.msra.mxu2 %v3010_v51  ;;  %v3030_v57 = vld [vmem:[#allocation4 + $0x8] sm:$0xff]  ;;  %v3036_v34 = vld [vmem:[#allocation4 + $0x10] sm:$0xff] }
 0x43d   :  { %v1907_v10 = vmul.f32 -1.442695, %v2961_v30  ;;  %v1364_v61 = vrot.slane %v2961_v30, 2  ;;  %v1388_v9 = vrot.slane %v2961_v30, 6  ;;  %3252 = vst [vmem:[#allocation24_spill] sm:$0xff] %v3010_v51  ;;  %1555 = vmatpush.msra.mxu3 %v3012_v52  ;;  %1496 = vmatpush.msra.mxu0 %v3016_v1 }
 0x43e   :  { %3253 = vst [vmem:[#allocation25_spill] sm:$0xff] %v3012_v52 }
 0x43f   :  { %2005 = vpow2.f32 %v1907_v10  ;;  %v1908_v24 = vmul.f32 -1.442695, %v1364_v61  ;;  %v1909_v40 = vmul.f32 -1.442695, %v1388_v9  ;;  %v3018_v10 = vld [vmem:[#allocation4 + $0x28] sm:$0xff]  ;;  %v3022_v61 = vld [vmem:[#allocation4 + $0x30] sm:$0xff] }
 0x440   :  { %v3024_v9 = vld [vmem:[#allocation4 + $0x38] sm:$0xff]  ;;  %1516 = vmatpush.msra.mxu1 %v3018_v10  ;;  %1536 = vmatpush.msra.mxu2 %v3022_v61 }
 0x441   :  { %2007 = vpow2.f32 %v1908_v24  ;;  %1556 = vmatpush.msra.mxu3 %v3024_v9 }
 0x442   :  { %2009 = vpow2.f32 %v1909_v40  ;;  %v3028_v40 = vld [vmem:[#allocation4] sm:$0xff]  ;;  %1517 = vmatpush.msra.mxu1 %v3030_v57  ;;  %1537 = vmatpush.msra.mxu2 %v3036_v34 }
 0x443   :  { %1497 = vmatpush.msra.mxu0 %v3028_v40  ;;  %1557 = vmatpush.msra.mxu3 %v3038_v31 }
 0x444   :  { %1732 = vmatpush.msrb.mxu1 %v2843_v53  ;;  %1752 = vmatpush.msrb.mxu2 %v2845_v59  ;;  %v1385_v59 = vrot.slane %v2961_v30, 4 }
 0x445   :  { %v2006_v24 = vpop.eup %2005  ;;  %1712 = vmatpush.msrb.mxu0 %v2841_v11  ;;  %1772 = vmatpush.msrb.mxu3 %v2849_v60  ;;  %v3260_v30 = vld [vmem:[#allocation25_spill] sm:$0xff] }
 0x446   :  { %v3032_v56 = vadd.f32 1.0, %v2006_v24  ;;  %1733 = vmatpush.msrb.mxu1 %v2855_v0  ;;  %1753 = vmatpush.msrb.mxu2 %v2857_v39 }
 0x447   :  { %v2008_v47 = vpop.eup %2007  ;;  %1713 = vmatpush.msrb.mxu0 %v2853_v62  ;;  %1773 = vmatpush.msrb.mxu3 %v2861_v3 }
 0x448   :  { %v2010_v52 = vpop.eup %2009  ;;  %2011 = vrcp.f32 %v3032_v56  ;;  %v3043_v51 = vadd.f32 1.0, %v2008_v47  ;;  %1734 = vmatpush.msrb.mxu1 %v2867_v8  ;;  %1754 = vmatpush.msrb.mxu2 %v2869_v12  ;;  %v1359_v39 = vand.u32 2147483648, %v3032_v56  ;;  %v1357_v12 = vand.u32 2147483647, %v3032_v56 }
 0x449   :  { %v3047_v24 = vadd.f32 1.0, %v2010_v52  ;;  %1714 = vmatpush.msrb.mxu0 %v2865_v6  ;;  %1774 = vmatpush.msrb.mxu3 %v2873_v14  ;;  %vm1353_vm12 = vweird.f32 %v3032_v56 }
 0x44a   :  { %2013 = vrcp.f32 %v3043_v51  ;;  %1735 = vmatpush.msrb.mxu1 %v2879_v17  ;;  %1755 = vmatpush.msrb.mxu2 %v2881_v18  ;;  %v1381_v14 = vand.u32 2147483648, %v3043_v51  ;;  %v1379_v18 = vand.u32 2147483647, %v3043_v51  ;;  %vm1358_vm15 = vcmp.eq.f32.partialorder %v1357_v12, 8.507059e+37 }
 0x44b   :  { %2015 = vrcp.f32 %v3047_v24  ;;  %1715 = vmatpush.msrb.mxu0 %v2877_v15  ;;  %1775 = vmatpush.msrb.mxu3 %v2885_v19  ;;  %v1360_v19 = vor.u32 1.1754944e-38, %v1359_v39  ;;  %vm1375_vm3 = vweird.f32 %v3043_v51  ;;  %vm1399_vm7 = vweird.f32 %v3047_v24 }
 0x44c   :  { %1736 = vmatpush.msrb.mxu1 %v2891_v22  ;;  %1756 = vmatpush.msrb.mxu2 %v2893_v23  ;;  %2017 = vtanh.f32 %v1385_v59  ;;  %vm1380_vm5 = vcmp.eq.f32.partialorder %v1379_v18, 8.507059e+37 }
 0x44d   :  { %1716 = vmatpush.msrb.mxu0 %v2889_v20  ;;  %1776 = vmatpush.msrb.mxu3 %v2897_v27 }
 0x44e   :  { %v2012_v47 = vpop.eup %2011  ;;  %1737 = vmatpush.msrb.mxu1 %v2903_v29  ;;  %1757 = vmatpush.msrb.mxu2 %v2905_v32 }
 0x44f   :  { %v1349_v11 = vmul.f32 %v2012_v47, %v3032_v56  ;;  %vm1354_vm11 = vweird.f32 %v2012_v47  ;;  %1717 = vmatpush.msrb.mxu0 %v2901_v28  ;;  %1777 = vmatpush.msrb.mxu3 %v2909_v33  ;;  %v1382_v28 = vor.u32 1.1754944e-38, %v1381_v14 }
 0x450   :  { %v2014_v53 = vpop.eup %2013  ;;  %vm1355_vm14 = vmor %vm1353_vm12, %vm1354_vm11  ;;  %1738 = vmatpush.msrb.mxu1 %v2913_v37  ;;  %1758 = vmatpush.msrb.mxu2 %v2917_v41 }
 0x451   :  { %v3069_v60 = vpop.eup %2015  ;;  %v1350_v62 = vsub.f32 1.0, %v1349_v11  ;;  %v1371_v0 = vmul.f32 %v2014_v53, %v3043_v51  ;;  %vm1376_vm13 = vweird.f32 %v2014_v53  ;;  %1718 = vmatpush.msrb.mxu0 %v2911_v36  ;;  %1778 = vmatpush.msrb.mxu3 %v2919_v43 }
 0x452   :  { %v1395_v3 = vmul.f32 %v3069_v60, %v3047_v24  ;;  %vm1377_vm4 = vmor %vm1375_vm3, %vm1376_vm13  ;;  %1739 = vmatpush.msrb.mxu1 %v2925_v48  ;;  %1759 = vmatpush.msrb.mxu2 %v2927_v50  ;;  %v2018_v32 = vpop.eup %2017  ;;  %vm1400_vm6 = vweird.f32 %v3069_v60  ;;  %v1403_v48 = vand.u32 2147483647, %v3047_v24 }
 0x453   :  { %v1372_v6 = vsub.f32 1.0, %v1371_v0  ;;  %v1351_v8 = vmul.f32 %v2012_v47, %v1350_v62  ;;  %1719 = vmatpush.msrb.mxu0 %v2921_v44  ;;  %1779 = vmatpush.msrb.mxu3 %v2929_v55  ;;  %vm1401_vm8 = vmor %vm1399_vm7, %vm1400_vm6  ;;  %v3254_v55 = vld [vmem:[#allocation19_spill] sm:$0xff] }
 0x454   :  { %v1396_v20 = vsub.f32 1.0, %v1395_v3  ;;  %1740 = vmatpush.msrb.mxu1 %v2935_v25  ;;  %1760 = vmatpush.msrb.mxu2 %v2942_v35  ;;  %v3255_v25 = vld [vmem:[#allocation20_spill] sm:$0xff]  ;;  %v3256_v35 = vld [vmem:[#allocation21_spill] sm:$0xff]  ;;  %vm1404_vm9 = vcmp.eq.f32.partialorder %v1403_v48, 8.507059e+37 }
 0x455   :  { %v1352_v15 = vadd.f32 %v2012_v47, %v1351_v8  ;;  %v1373_v17 = vmul.f32 %v2014_v53, %v1372_v6  ;;  %1720 = vmatpush.msrb.mxu0 %v2933_v58  ;;  %1780 = vmatpush.msrb.mxu3 %v2944_v42  ;;  %v3257_v42 = vld [vmem:[#allocation22_spill] sm:$0xff] }
 0x456   :  { %v1397_v36 = vmul.f32 %v3069_v60, %v1396_v20  ;;  %1741 = vmatpush.msrb.mxu1 %v2952_v21  ;;  %1761 = vmatpush.msrb.mxu2 %v2957_v63 }
 0x457   :  { %v1356_v22 = vsel %vm1355_vm14, %v2012_v47, %v1352_v15  ;;  %v1374_v23 = vadd.f32 %v2014_v53, %v1373_v17  ;;  %1721 = vmatpush.msrb.mxu0 %v2950_v54  ;;  %1781 = vmatpush.msrb.mxu3 %v2959_v2  ;;  %v3258_v54 = vld [vmem:[#allocation23_spill] sm:$0xff]  ;;  %v3259_v2 = vld [vmem:[#allocation24_spill] sm:$0xff] }
 0x458   :  { %v1361_v27 = vsel %vm1358_vm15, %v1360_v19, %v1356_v22  ;;  %v1398_v44 = vadd.f32 %v3069_v60, %v1397_v36  ;;  %1742 = vmatpush.msrb.mxu1 %v2967_v7  ;;  %1762 = vmatpush.msrb.mxu2 %v2971_v45 }
 0x459   :  { %v1378_v29 = vsel %vm1377_vm4, %v2014_v53, %v1374_v23  ;;  %v1410_v41 = vmul.f32 %v2018_v32, %v1361_v27  ;;  %1722 = vmatpush.msrb.mxu0 %v2965_v13  ;;  %1782 = vmatpush.msrb.mxu3 %v2973_v5 }
 0x45a   :  { %v1383_v33 = vsel %vm1380_vm5, %v1382_v28, %v1378_v29  ;;  %1743 = vmatpush.msrb.mxu1 %v2982_v16  ;;  %1763 = vmatpush.msrb.mxu2 %v2986_v49  ;;  %v1402_v50 = vsel %vm1401_vm8, %v3069_v60, %v1398_v44 }
 0x45b   :  { %v1409_v37 = vmul.f32 %v1383_v33, %v2835_v4  ;;  %v1405_v4 = vand.u32 2147483648, %v3047_v24  ;;  %1723 = vmatpush.msrb.mxu0 %v2980_v38  ;;  %1783 = vmatpush.msrb.mxu3 %v2988_v26 }
 0x45c   :  { %1744 = vmatpush.msrb.mxu1 %v3254_v55  ;;  %1764 = vmatpush.msrb.mxu2 %v3255_v25 }
 0x45d   :  { %v3108_v43 = vadd.f32 %v1410_v41, %v1409_v37  ;;  %1724 = vmatpush.msrb.mxu0 %v2992_v46  ;;  %v1406_v58 = vor.u32 1.1754944e-38, %v1405_v4  ;;  %1784 = vmatpush.msrb.mxu3 %v3256_v35  ;;  %v1911_v46 = vld [vmem:[%s3169_s0 + $0x30] sm:$0xff] }
 0x45e   :  { %1745 = vmatpush.msrb.mxu1 %v3258_v54  ;;  %1765 = vmatpush.msrb.mxu2 %v3259_v2 }
 0x45f   :  { %2019 = vtanh.f32 %v3108_v43  ;;  %1725 = vmatpush.msrb.mxu0 %v3257_v42  ;;  %v1407_v63 = vsel %vm1404_vm9, %v1406_v58, %v1402_v50  ;;  %1785 = vmatpush.msrb.mxu3 %v3260_v30 }
 0x460   :  { %1746 = vmatpush.msrb.mxu1 %v3018_v10  ;;  %1766 = vmatpush.msrb.mxu2 %v3022_v61 }
 0x461   :  { %1726 = vmatpush.msrb.mxu0 %v3016_v1  ;;  %1786 = vmatpush.msrb.mxu3 %v3024_v9 }
 0x462   :  { %1747 = vmatpush.msrb.mxu1 %v3030_v57  ;;  %1767 = vmatpush.msrb.mxu2 %v3036_v34 }
 0x463   :  { %1727 = vmatpush.msrb.mxu0 %v3028_v40  ;;  %1787 = vmatpush.msrb.mxu3 %v3038_v31 }
 0x465   :  { %v2020_v21 = vpop.eup %2019 }
 0x466   :  { %v1413_v13 = vmul.f32 %v2020_v21, %v1407_v63 }
 0x468   :  { %1910 = vst [vmem:[%s3171_s2 + $0xa] sm:$0x3] %v1413_v13  ;;  %1498 = vmatmul.f32.vlgmr.msra.gmra.mxu0 %v1413_v13  ;;  %1518 = vmatmul.f32.vlgmr.msra.gmra.mxu1 %v1413_v13 }
 0x469   :  { %1538 = vmatmul.f32.vlgmr.msra.gmra.mxu2 %v1413_v13  ;;  %1558 = vmatmul.f32.vlgmr.msra.gmra.mxu3 %v1413_v13 }
 0x4e5   :  { %v1519_v7 = vpop.f32.mrf.mxu1  ;;  %v1499_v26 = vpop.f32.mrf.mxu0 }
 0x4e6   :  { %v1566_v45 = vrot.slane %v1519_v7, 6 }
 0x4e8   :  { %v1569_v56 = vsel %vm187_vm0, %v1499_v26, %v1566_v45 }
 0x4ec   :  { %v1539_v5 = vpop.f32.mrf.mxu2  ;;  %v1559_v38 = vpop.f32.mrf.mxu3 }
 0x4ed   :  { %v1567_v16 = vrot.slane %v1539_v5, 4  ;;  %v1568_v49 = vrot.slane %v1559_v38, 2  ;;  %v1916_v38 = vld [vmem:[%s3169_s0 + $0x38] sm:$0xff] }
 0x4ef   :  { %v1570_v51 = vsel %vm189_vm1, %v1567_v16, %v1568_v49 }
 0x4f0   :  { %v1571_v57 = vsel %vm191_vm2, %v1569_v56, %v1570_v51 }
 0x4f1   :  { %v1573_v34 = vadd.f32 %v1911_v46, %v1571_v57 }
 0x4f3   :  { %v1912_v52 = vmul.f32 -1.442695, %v1573_v34  ;;  %v1594_v31 = vrot.slane %v1573_v34, 2  ;;  %v1618_v1 = vrot.slane %v1573_v34, 6  ;;  %v1615_v0 = vrot.slane %v1573_v34, 4 }
 0x4f5   :  { %2021 = vpow2.f32 %v1912_v52  ;;  %v1913_v10 = vmul.f32 -1.442695, %v1594_v31  ;;  %v1914_v61 = vmul.f32 -1.442695, %v1618_v1 }
 0x4f7   :  { %2023 = vpow2.f32 %v1913_v10 }
 0x4f8   :  { %2025 = vpow2.f32 %v1914_v61 }
 0x4fb   :  { %v2022_v9 = vpop.eup %2021 }
 0x4fc   :  { %v1577_v40 = vadd.f32 1.0, %v2022_v9 }
 0x4fd   :  { %v2024_v24 = vpop.eup %2023 }
 0x4fe   :  { %v2026_v47 = vpop.eup %2025  ;;  %2027 = vrcp.f32 %v1577_v40  ;;  %v1599_v11 = vadd.f32 1.0, %v2024_v24  ;;  %v1589_v8 = vand.u32 2147483648, %v1577_v40  ;;  %v1587_v17 = vand.u32 2147483647, %v1577_v40 }
 0x4ff   :  { %v1623_v53 = vadd.f32 1.0, %v2026_v47  ;;  %vm1583_vm11 = vweird.f32 %v1577_v40 }
 0x500   :  { %2029 = vrcp.f32 %v1599_v11  ;;  %v1611_v18 = vand.u32 2147483648, %v1599_v11  ;;  %v1609_v22 = vand.u32 2147483647, %v1599_v11  ;;  %v1590_v23 = vor.u32 1.1754944e-38, %v1589_v8 }
 0x501   :  { %2031 = vrcp.f32 %v1623_v53  ;;  %vm1588_vm14 = vcmp.eq.f32.partialorder %v1587_v17, 8.507059e+37  ;;  %vm1605_vm15 = vweird.f32 %v1599_v11  ;;  %v1635_v58 = vand.u32 2147483648, %v1623_v53 }
 0x502   :  { %2033 = vtanh.f32 %v1615_v0  ;;  %v1612_v33 = vor.u32 1.1754944e-38, %v1611_v18  ;;  %vm1610_vm4 = vcmp.eq.f32.partialorder %v1609_v22, 8.507059e+37  ;;  %vm1629_vm6 = vweird.f32 %v1623_v53 }
 0x503   :  { %v1633_v25 = vand.u32 2147483647, %v1623_v53  ;;  %v1636_v42 = vor.u32 1.1754944e-38, %v1635_v58 }
 0x504   :  { %v2028_v59 = vpop.eup %2027 }
 0x505   :  { %v1579_v60 = vmul.f32 %v2028_v59, %v1577_v40  ;;  %vm1584_vm10 = vweird.f32 %v2028_v59  ;;  %vm1634_vm8 = vcmp.eq.f32.partialorder %v1633_v25, 8.507059e+37 }
 0x506   :  { %v2030_v62 = vpop.eup %2029  ;;  %vm1585_vm13 = vmor %vm1583_vm11, %vm1584_vm10 }
 0x507   :  { %v2032_v39 = vpop.eup %2031  ;;  %v1580_v3 = vsub.f32 1.0, %v1579_v60  ;;  %v1601_v6 = vmul.f32 %v2030_v62, %v1599_v11  ;;  %vm1606_vm12 = vweird.f32 %v2030_v62 }
 0x508   :  { %v1625_v12 = vmul.f32 %v2032_v39, %v1623_v53  ;;  %vm1607_vm3 = vmor %vm1605_vm15, %vm1606_vm12  ;;  %v2034_v37 = vpop.eup %2033  ;;  %vm1630_vm5 = vweird.f32 %v2032_v39 }
 0x509   :  { %v1602_v14 = vsub.f32 1.0, %v1601_v6  ;;  %v1581_v15 = vmul.f32 %v2028_v59, %v1580_v3  ;;  %vm1631_vm7 = vmor %vm1629_vm6, %vm1630_vm5 }
 0x50a   :  { %v1626_v27 = vsub.f32 1.0, %v1625_v12 }
 0x50b   :  { %v1582_v19 = vadd.f32 %v2028_v59, %v1581_v15  ;;  %v1603_v20 = vmul.f32 %v2030_v62, %v1602_v14 }
 0x50c   :  { %v1627_v44 = vmul.f32 %v2032_v39, %v1626_v27 }
 0x50d   :  { %v1586_v28 = vsel %vm1585_vm13, %v2028_v59, %v1582_v19  ;;  %v1604_v29 = vadd.f32 %v2030_v62, %v1603_v20 }
 0x50e   :  { %v1591_v32 = vsel %vm1588_vm14, %v1590_v23, %v1586_v28  ;;  %v1628_v55 = vadd.f32 %v2032_v39, %v1627_v44 }
 0x50f   :  { %v1608_v36 = vsel %vm1607_vm3, %v2030_v62, %v1604_v29  ;;  %v1640_v48 = vmul.f32 %v2034_v37, %v1591_v32 }
 0x510   :  { %v1613_v41 = vsel %vm1610_vm4, %v1612_v33, %v1608_v36  ;;  %v1632_v35 = vsel %vm1631_vm7, %v2032_v39, %v1628_v55 }
 0x511   :  { %v1639_v4 = vmul.f32 %v1613_v41, %v3108_v43  ;;  %v1637_v21 = vsel %vm1634_vm8, %v1636_v42, %v1632_v35 }
 0x513   :  { %v3153_v50 = vadd.f32 %v1640_v48, %v1639_v4 }
 0x515   :  { %2035 = vtanh.f32 %v3153_v50 }
 0x51b   :  { %v2036_v54 = vpop.eup %2035 }
 0x51c   :  { %v1643_v63 = vmul.f32 %v2036_v54, %v1637_v21 }
 0x51e   :  { %1915 = vst [vmem:[%s3171_s2 + $0xc] sm:$0x3] %v1643_v63  ;;  %1728 = vmatmul.f32.vlgmr.msrb.gmra.mxu0 %v1643_v63  ;;  %1748 = vmatmul.f32.vlgmr.msrb.gmra.mxu1 %v1643_v63 }
 0x51f   :  { %1768 = vmatmul.f32.vlgmr.msrb.gmra.mxu2 %v1643_v63  ;;  %1788 = vmatmul.f32.vlgmr.msrb.gmra.mxu3 %v1643_v63 }
 0x59b   :  { %v1749_v43 = vpop.f32.mrf.mxu1  ;;  %v1729_v5 = vpop.f32.mrf.mxu0 }
 0x59c   :  { %v1796_v2 = vrot.slane %v1749_v43, 6 }
 0x59e   :  { %v1799_v16 = vsel %vm187_vm0, %v1729_v5, %v1796_v2 }
 0x5a2   :  { %v1769_v30 = vpop.f32.mrf.mxu2  ;;  %v1789_v13 = vpop.f32.mrf.mxu3 }
 0x5a3   :  { %v1797_v7 = vrot.slane %v1769_v30, 4  ;;  %v1798_v45 = vrot.slane %v1789_v13, 2 }
 0x5a5   :  { %v1800_v49 = vsel %vm189_vm1, %v1797_v7, %v1798_v45 }
 0x5a6   :  { %v1801_v26 = vsel %vm191_vm2, %v1799_v16, %v1800_v49 }
 0x5a7   :  { %v1803_v46 = vadd.f32 %v1916_v38, %v1801_v26 }
 0x5a9   :  { %v1917_v56 = vmul.f32 -1.442695, %v1803_v46  ;;  %v1824_v51 = vrot.slane %v1803_v46, 2  ;;  %v1848_v57 = vrot.slane %v1803_v46, 6  ;;  %v1845_v59 = vrot.slane %v1803_v46, 4 }
 0x5ab   :  { %2037 = vpow2.f32 %v1917_v56  ;;  %v1918_v34 = vmul.f32 -1.442695, %v1824_v51  ;;  %v1919_v52 = vmul.f32 -1.442695, %v1848_v57 }
 0x5ad   :  { %2039 = vpow2.f32 %v1918_v34 }
 0x5ae   :  { %2041 = vpow2.f32 %v1919_v52 }
 0x5b1   :  { %v2038_v31 = vpop.eup %2037 }
 0x5b2   :  { %v1807_v1 = vadd.f32 1.0, %v2038_v31 }
 0x5b3   :  { %v2040_v10 = vpop.eup %2039 }
 0x5b4   :  { %v2042_v61 = vpop.eup %2041  ;;  %2043 = vrcp.f32 %v1807_v1  ;;  %v1829_v9 = vadd.f32 1.0, %v2040_v10  ;;  %v1819_v39 = vand.u32 2147483648, %v1807_v1  ;;  %v1817_v6 = vand.u32 2147483647, %v1807_v1 }
 0x5b5   :  { %v1853_v40 = vadd.f32 1.0, %v2042_v61  ;;  %vm1813_vm1 = vweird.f32 %v1807_v1 }
 0x5b6   :  { %2045 = vrcp.f32 %v1829_v9  ;;  %v1841_v14 = vand.u32 2147483648, %v1829_v9  ;;  %v1839_v17 = vand.u32 2147483647, %v1829_v9  ;;  %v1820_v19 = vor.u32 1.1754944e-38, %v1819_v39 }
 0x5b7   :  { %2047 = vrcp.f32 %v1853_v40  ;;  %vm1818_vm10 = vcmp.eq.f32.partialorder %v1817_v6, 8.507059e+37  ;;  %vm1835_vm11 = vweird.f32 %v1829_v9  ;;  %v1865_v4 = vand.u32 2147483648, %v1853_v40 }
 0x5b8   :  { %2049 = vtanh.f32 %v1845_v59  ;;  %v1842_v27 = vor.u32 1.1754944e-38, %v1841_v14  ;;  %vm1840_vm13 = vcmp.eq.f32.partialorder %v1839_v17, 8.507059e+37  ;;  %vm1859_vm15 = vweird.f32 %v1853_v40 }
 0x5b9   :  { %v1863_v48 = vand.u32 2147483647, %v1853_v40  ;;  %v1866_v58 = vor.u32 1.1754944e-38, %v1865_v4 }
 0x5ba   :  { %v2044_v24 = vpop.eup %2043 }
 0x5bb   :  { %v1809_v47 = vmul.f32 %v2044_v24, %v1807_v1  ;;  %vm1814_vm0 = vweird.f32 %v2044_v24  ;;  %vm1864_vm4 = vcmp.eq.f32.partialorder %v1863_v48, 8.507059e+37 }
 0x5bc   :  { %v2046_v11 = vpop.eup %2045  ;;  %vm1815_vm2 = vmor %vm1813_vm1, %vm1814_vm0 }
 0x5bd   :  { %v1810_v53 = vsub.f32 1.0, %v1809_v47  ;;  %v2048_v60 = vpop.eup %2047  ;;  %v1831_v62 = vmul.f32 %v2046_v11, %v1829_v9  ;;  %vm1836_vm9 = vweird.f32 %v2046_v11 }
 0x5be   :  { %v1855_v3 = vmul.f32 %v2048_v60, %v1853_v40  ;;  %vm1837_vm12 = vmor %vm1835_vm11, %vm1836_vm9  ;;  %v2050_v29 = vpop.eup %2049  ;;  %vm1860_vm14 = vweird.f32 %v2048_v60 }
 0x5bf   :  { %v1811_v0 = vmul.f32 %v2044_v24, %v1810_v53  ;;  %v1832_v8 = vsub.f32 1.0, %v1831_v62  ;;  %vm1861_vm3 = vmor %vm1859_vm15, %vm1860_vm14 }
 0x5c0   :  { %v1856_v20 = vsub.f32 1.0, %v1855_v3 }
 0x5c1   :  { %v1812_v12 = vadd.f32 %v2044_v24, %v1811_v0  ;;  %v1833_v15 = vmul.f32 %v2046_v11, %v1832_v8 }
 0x5c2   :  { %v1857_v33 = vmul.f32 %v2048_v60, %v1856_v20 }
 0x5c3   :  { %v1816_v18 = vsel %vm1815_vm2, %v2044_v24, %v1812_v12  ;;  %v1834_v22 = vadd.f32 %v2046_v11, %v1833_v15 }
 0x5c4   :  { %v1821_v23 = vsel %vm1818_vm10, %v1820_v19, %v1816_v18  ;;  %v1858_v44 = vadd.f32 %v2048_v60, %v1857_v33 }
 0x5c5   :  { %v1838_v28 = vsel %vm1837_vm12, %v2046_v11, %v1834_v22  ;;  %v1870_v37 = vmul.f32 %v2050_v29, %v1821_v23 }
 0x5c6   :  { %v1843_v32 = vsel %vm1840_vm13, %v1842_v27, %v1838_v28  ;;  %v1862_v55 = vsel %vm1861_vm3, %v2048_v60, %v1858_v44 }
 0x5c7   :  { %v1869_v36 = vmul.f32 %v1843_v32, %v3153_v50  ;;  %v1867_v35 = vsel %vm1864_vm4, %v1866_v58, %v1862_v55 }
 0x5c9   :  { %v1871_v41 = vadd.f32 %v1870_v37, %v1869_v36 }
 0x5cb   :  { %2051 = vtanh.f32 %v1871_v41  ;;  %1877 = vst [vmem:[#allocation3] sm:$0x3] %v1871_v41 }
 0x5d1   :  { %v2052_v25 = vpop.eup %2051 }
 0x5d2   :  { %v1873_v42 = vmul.f32 %v2052_v25, %v1867_v35 }
 0x5d4   :  { %1920 = vst [vmem:[%s3171_s2 + $0xe] sm:$0x3] %v1873_v42 }
 0x5d5   :  { %1876 = vst [vmem:[#allocation2] sm:$0x3] %v1873_v42 }
 0x5d6   :  { %1882 = vsyncpa [#allocation5], 1 }

</bundles_post_ra>
